<compile_context>
chip_gen: v5e
topology: v5e:2x2
jax: 0.10.0
libtpu: 0.0.40
codegen_flags: <defaults>
</compile_context>

<pallas_src>
import functools

import jax
import jax.numpy as jnp
from jax.experimental import pallas as pl
from jax.experimental.pallas import tpu as pltpu


# ----------------------------- shared math -----------------------------------

def _layernorm(y, g, b, eps=1e-5):
    mean = jnp.mean(y, axis=-1, keepdims=True)
    var = jnp.mean((y - mean) ** 2, axis=-1, keepdims=True)
    return (y - mean) * jax.lax.rsqrt(var + eps) * g + b


def _encoder_math(src, in_w, in_b, wqkv, bqkv, wo, bo, ln1_g, ln1_b,
                  w1, b1, w2, b2, ln2_g, ln2_b, out_w, out_b,
                  *, nhead, num_layers, B, S):
    """Works on either Pallas Refs (inside the kernel) or jnp arrays (reference)."""
    D = in_w.shape[1]
    Dh = D // nhead
    scale = 1.0 / (float(Dh) ** 0.5)

    # input_layer
    x = (jnp.dot(src[...], in_w[...], preferred_element_type=jnp.float32)
         + in_b[...])                                                  # (B*S, D)

    for l in range(num_layers):                                        # static unroll
        # ---- self-attention block: in_proj + MHA + out_proj + residual + LN1 ----
        qkv = (jnp.dot(x, wqkv[l], preferred_element_type=jnp.float32)
               + bqkv[l])                                              # (B*S, 3D)
        qkv3 = qkv.reshape(B, S, 3 * D)                                # free split of M
        heads = []
        for h in range(nhead):                                         # static unroll
            q = qkv3[:, :, h * Dh:(h + 1) * Dh] * scale                # (B, S, Dh)
            k = qkv3[:, :, D + h * Dh:D + (h + 1) * Dh]
            v = qkv3[:, :, 2 * D + h * Dh:2 * D + (h + 1) * Dh]
            s = jnp.einsum('bqd,bkd->bqk', q, k,
                           preferred_element_type=jnp.float32)         # (B, S, S)
            m = jnp.max(s, axis=-1, keepdims=True)
            p = jnp.exp(s - m)
            p = p / jnp.sum(p, axis=-1, keepdims=True)                 # exact softmax
            heads.append(jnp.einsum('bqk,bkd->bqd', p, v,
                                    preferred_element_type=jnp.float32))
        attn = jnp.concatenate(heads, axis=-1).reshape(B * S, D)       # (B*S, D)
        y = x + jnp.dot(attn, wo[l], preferred_element_type=jnp.float32) + bo[l]
        x = _layernorm(y, ln1_g[l], ln1_b[l])

        # ---- feed-forward block: ff1(ReLU) + ff2 + residual + LN2 ----
        hid = jnp.maximum(
            jnp.dot(x, w1[l], preferred_element_type=jnp.float32) + b1[l], 0.0)
        y = jnp.dot(hid, w2[l], preferred_element_type=jnp.float32) + b2[l]
        x = _layernorm(x + y, ln2_g[l], ln2_b[l])

    # output_layer (D -> 1)
    return (jnp.dot(x, out_w[...], preferred_element_type=jnp.float32)
            + out_b[...])


# ----------------------------- fused Pallas kernel ---------------------------

def _fused_encoder_kernel(src_ref, in_w_ref, in_b_ref,
                          wqkv_ref, bqkv_ref, wo_ref, bo_ref,
                          ln1_g_ref, ln1_b_ref,
                          w1_ref, b1_ref, w2_ref, b2_ref,
                          ln2_g_ref, ln2_b_ref,
                          out_w_ref, out_b_ref,
                          o_ref, *, nhead, num_layers, B, S):
    # Single grid step: all weights + activations resident in VMEM; the layer loop
    # runs entirely inside the kernel (no HBM round-trips between layers).
    o_ref[...] = _encoder_math(
        src_ref, in_w_ref, in_b_ref, wqkv_ref, bqkv_ref, wo_ref, bo_ref,
        ln1_g_ref, ln1_b_ref, w1_ref, b1_ref, w2_ref, b2_ref,
        ln2_g_ref, ln2_b_ref, out_w_ref, out_b_ref,
        nhead=nhead, num_layers=num_layers, B=B, S=S)


# --------------------------- parameter creation ------------------------------

def init_params(key, input_size, d_model, nhead, num_layers, dim_feedforward=2048):
    """Kernel-ready weights: (K, N) matrices, (1, N) biases, layers stacked on axis 0."""
    assert num_layers >= 1
    assert d_model % nhead == 0

    def lin(k, out_f, in_f):
        kw, kb = jax.random.split(k)
        w = jax.random.normal(kw, (out_f, in_f), jnp.float32) * 0.02   # torch (out,in)
        b = jax.random.normal(kb, (out_f,), jnp.float32) * 0.02
        return w.T, b.reshape(1, out_f)

    keys = jax.random.split(key, 2 + num_layers)
    params = {}
    params["input_w_t"], params["input_b"] = lin(keys[0], d_model, input_size)
    params["output_w_t"], params["output_b"] = lin(keys[1], 1, d_model)

    wqkv, bqkv, wo, bo, w1, b1, w2, b2 = ([] for _ in range(8))
    for l in range(num_layers):
        ks = jax.random.split(keys[2 + l], 4)
        a, c = lin(ks[0], 3 * d_model, d_model); wqkv.append(a); bqkv.append(c)
        a, c = lin(ks[1], d_model, d_model);     wo.append(a);   bo.append(c)
        a, c = lin(ks[2], dim_feedforward, d_model); w1.append(a); b1.append(c)
        a, c = lin(ks[3], d_model, dim_feedforward); w2.append(a); b2.append(c)

    stk = lambda xs: jnp.stack(xs, axis=0)
    params.update(
        wqkv=stk(wqkv), bqkv=stk(bqkv), wo=stk(wo), bo=stk(bo),
        w1=stk(w1), b1=stk(b1), w2=stk(w2), b2=stk(b2),
        ln1_g=jnp.ones((num_layers, 1, d_model), jnp.float32),
        ln1_b=jnp.zeros((num_layers, 1, d_model), jnp.float32),
        ln2_g=jnp.ones((num_layers, 1, d_model), jnp.float32),
        ln2_b=jnp.zeros((num_layers, 1, d_model), jnp.float32),
    )
    return params


# ------------------------------ forward pass ---------------------------------

def transformer_encoder_forward(params, src, nhead):
    """src: (S, B, input_size) -> (S, B, 1). Matches the PyTorch module in eval mode."""
    S, B, in_f = src.shape
    num_layers = int(params["wqkv"].shape[0])

    # Internal layout: (B, S, ...) flattened to (B*S, ...) so attention sees
    # contiguous per-batch slices via a free reshape inside the kernel.
    x = src.transpose(1, 0, 2).reshape(B * S, in_f)

    kernel = functools.partial(_fused_encoder_kernel, nhead=nhead,
                               num_layers=num_layers, B=B, S=S)
    out = pl.pallas_call(
        kernel,
        out_shape=jax.ShapeDtypeStruct((B * S, 1), jnp.float32),
        compiler_params=pltpu.CompilerParams(
            vmem_limit_bytes=32 * 1024 * 1024),
    )(x,
      params["input_w_t"], params["input_b"],
      params["wqkv"], params["bqkv"], params["wo"], params["bo"],
      params["ln1_g"], params["ln1_b"],
      params["w1"], params["b1"], params["w2"], params["b2"],
      params["ln2_g"], params["ln2_b"],
      params["output_w_t"], params["output_b"])

    # (B*S, 1) in (B, S) order -> (S, B, 1)
    return out.reshape(B, S, 1).transpose(1, 0, 2)


def _reference_forward(params, src, nhead):
    """Pure-JAX reference (same math, no Pallas) for a lowering-correctness check."""
    S, B, in_f = src.shape
    num_layers = int(params["wqkv"].shape[0])
    x = src.transpose(1, 0, 2).reshape(B * S, in_f)
    out = _encoder_math(
        x, params["input_w_t"], params["input_b"],
        params["wqkv"], params["bqkv"], params["wo"], params["bo"],
        params["ln1_g"], params["ln1_b"],
        params["w1"], params["b1"], params["w2"], params["b2"],
        params["ln2_g"], params["ln2_b"],
        params["output_w_t"], params["output_b"],
        nhead=nhead, num_layers=num_layers, B=B, S=S)
    return out.reshape(B, S, 1).transpose(1, 0, 2)


# ---------------------------------- main -------------------------------------

if __name__ == "__main__":
    input_size = 8
    d_model = 32
    nhead = 4
    num_layers = 2
    S, B = 8, 2                      # (seq, batch) — batch_first=False layout

    key = jax.random.PRNGKey(0)
    kp, kx = jax.random.split(key)
    params = init_params(kp, input_size, d_model, nhead, num_layers)
    src = jax.random.normal(kx, (S, B, input_size), jnp.float32)

    fwd = jax.jit(functools.partial(transformer_encoder_forward, nhead=nhead))
    out = fwd(params, src)
    jax.block_until_ready(out)

    assert out.shape == (S, B, 1), out.shape
    assert out.dtype == jnp.float32
    assert bool(jnp.all(jnp.isfinite(out)))

    ref = _reference_forward(params, src, nhead)
    assert bool(jnp.allclose(out, ref, atol=2e-3, rtol=2e-3)), (
        float(jnp.max(jnp.abs(out - ref))))

    print("KERNEL_OK")
</pallas_src>

<mosaic_0001>
module attributes {stable_mosaic.version = 11 : i64} {
  func.func @_fused_encoder_kernel(%arg0: memref<16x8xf32, #tpu.memory_space<vmem>>, %arg1: memref<8x32xf32, #tpu.memory_space<vmem>>, %arg2: memref<1x32xf32, #tpu.memory_space<vmem>>, %arg3: memref<2x32x96xf32, #tpu.memory_space<vmem>>, %arg4: memref<2x1x96xf32, #tpu.memory_space<vmem>>, %arg5: memref<2x32x32xf32, #tpu.memory_space<vmem>>, %arg6: memref<2x1x32xf32, #tpu.memory_space<vmem>>, %arg7: memref<2x1x32xf32, #tpu.memory_space<vmem>>, %arg8: memref<2x1x32xf32, #tpu.memory_space<vmem>>, %arg9: memref<2x32x2048xf32, #tpu.memory_space<vmem>>, %arg10: memref<2x1x2048xf32, #tpu.memory_space<vmem>>, %arg11: memref<2x2048x32xf32, #tpu.memory_space<vmem>>, %arg12: memref<2x1x32xf32, #tpu.memory_space<vmem>>, %arg13: memref<2x1x32xf32, #tpu.memory_space<vmem>>, %arg14: memref<2x1x32xf32, #tpu.memory_space<vmem>>, %arg15: memref<32x1xf32, #tpu.memory_space<vmem>>, %arg16: memref<1x1xf32, #tpu.memory_space<vmem>>, %arg17: memref<16x1xf32, #tpu.memory_space<vmem>>) attributes {dimension_semantics = [], scalar_prefetch = 0 : i64, scratch_operands = 0 : i64, tpu.core_type = #tpu.core_type<tc>} {
    %c0 = arith.constant 0 : index
    %c0_0 = arith.constant 0 : index
    %0 = vector.load %arg0[%c0, %c0_0] : memref<16x8xf32, #tpu.memory_space<vmem>>, vector<16x8xf32>
    %c0_1 = arith.constant 0 : index
    %c0_2 = arith.constant 0 : index
    %1 = vector.load %arg1[%c0_1, %c0_2] : memref<8x32xf32, #tpu.memory_space<vmem>>, vector<8x32xf32>
    %cst = arith.constant dense<0.000000e+00> : vector<16x32xf32>
    %2 = tpu.matmul %0, %1, %cst {dimension_numbers = #tpu.dot_dimension_numbers<[1], [0], [0], [1], [0, 0, 1, 1], [], []>} : vector<16x8xf32>, vector<8x32xf32>, vector<16x32xf32> -> vector<16x32xf32>
    %c0_3 = arith.constant 0 : index
    %c0_4 = arith.constant 0 : index
    %3 = vector.load %arg2[%c0_3, %c0_4] : memref<1x32xf32, #tpu.memory_space<vmem>>, vector<1x32xf32>
    %4 = vector.broadcast %3 : vector<1x32xf32> to vector<16x32xf32>
    %5 = arith.addf %2, %4 : vector<16x32xf32>
    %c0_5 = arith.constant 0 : index
    %c0_6 = arith.constant 0 : index
    %c0_7 = arith.constant 0 : index
    %6 = vector.load %arg3[%c0_5, %c0_6, %c0_7] : memref<2x32x96xf32, #tpu.memory_space<vmem>>, vector<1x32x96xf32>
    %7 = vector.shape_cast %6 : vector<1x32x96xf32> to vector<32x96xf32>
    %cst_8 = arith.constant dense<0.000000e+00> : vector<16x96xf32>
    %8 = tpu.matmul %5, %7, %cst_8 {dimension_numbers = #tpu.dot_dimension_numbers<[1], [0], [0], [1], [0, 0, 1, 1], [], []>} : vector<16x32xf32>, vector<32x96xf32>, vector<16x96xf32> -> vector<16x96xf32>
    %c0_9 = arith.constant 0 : index
    %c0_10 = arith.constant 0 : index
    %c0_11 = arith.constant 0 : index
    %9 = vector.load %arg4[%c0_9, %c0_10, %c0_11] : memref<2x1x96xf32, #tpu.memory_space<vmem>>, vector<1x1x96xf32>
    %10 = vector.shape_cast %9 : vector<1x1x96xf32> to vector<1x96xf32>
    %11 = vector.broadcast %10 : vector<1x96xf32> to vector<16x96xf32>
    %12 = arith.addf %8, %11 : vector<16x96xf32>
    %13 = vector.shape_cast %12 : vector<16x96xf32> to vector<2x8x96xf32>
    %14 = vector.extract_strided_slice %13 {offsets = [0, 0, 0], sizes = [2, 8, 8], strides = [1, 1, 1]} : vector<2x8x96xf32> to vector<2x8x8xf32>
    %cst_12 = arith.constant 0.353553385 : f32
    %15 = vector.broadcast %cst_12 : f32 to vector<2x8x8xf32>
    %16 = arith.mulf %14, %15 : vector<2x8x8xf32>
    %17 = vector.extract_strided_slice %13 {offsets = [0, 0, 32], sizes = [2, 8, 8], strides = [1, 1, 1]} : vector<2x8x96xf32> to vector<2x8x8xf32>
    %18 = vector.extract_strided_slice %13 {offsets = [0, 0, 64], sizes = [2, 8, 8], strides = [1, 1, 1]} : vector<2x8x96xf32> to vector<2x8x8xf32>
    "tpu.trace_start"() <{level = 10 : i32, message = "bqd,bkd->bqk"}> : () -> ()
    %cst_13 = arith.constant dense<0.000000e+00> : vector<2x8x8xf32>
    %19 = tpu.matmul %16, %17, %cst_13 {dimension_numbers = #tpu.dot_dimension_numbers<[2], [2], [1], [1], [0, 0, 0, 1, 1, 1], [0], [0]>} : vector<2x8x8xf32>, vector<2x8x8xf32>, vector<2x8x8xf32> -> vector<2x8x8xf32>
    "tpu.trace_stop"() : () -> ()
    %cst_14 = arith.constant dense<0xFF800000> : vector<2x8xf32>
    %20 = vector.multi_reduction <maximumf>, %19, %cst_14 [2] : vector<2x8x8xf32> to vector<2x8xf32>
    %21 = vector.shape_cast %20 : vector<2x8xf32> to vector<2x8x1xf32>
    %22 = vector.broadcast %21 : vector<2x8x1xf32> to vector<2x8x8xf32>
    %23 = arith.subf %19, %22 : vector<2x8x8xf32>
    %24 = math.exp %23 : vector<2x8x8xf32>
    %cst_15 = arith.constant dense<0.000000e+00> : vector<2x8xf32>
    %25 = vector.multi_reduction <add>, %24, %cst_15 [2] : vector<2x8x8xf32> to vector<2x8xf32>
    %26 = vector.shape_cast %25 : vector<2x8xf32> to vector<2x8x1xf32>
    %27 = vector.broadcast %26 : vector<2x8x1xf32> to vector<2x8x8xf32>
    %28 = arith.divf %24, %27 : vector<2x8x8xf32>
    "tpu.trace_start"() <{level = 10 : i32, message = "bqk,bkd->bqd"}> : () -> ()
    %cst_16 = arith.constant dense<0.000000e+00> : vector<2x8x8xf32>
    %29 = tpu.matmul %28, %18, %cst_16 {dimension_numbers = #tpu.dot_dimension_numbers<[2], [1], [1], [2], [0, 0, 0, 1, 1, 2], [0], [0]>} : vector<2x8x8xf32>, vector<2x8x8xf32>, vector<2x8x8xf32> -> vector<2x8x8xf32>
    "tpu.trace_stop"() : () -> ()
    %30 = vector.extract_strided_slice %13 {offsets = [0, 0, 8], sizes = [2, 8, 8], strides = [1, 1, 1]} : vector<2x8x96xf32> to vector<2x8x8xf32>
    %cst_17 = arith.constant 0.353553385 : f32
    %31 = vector.broadcast %cst_17 : f32 to vector<2x8x8xf32>
    %32 = arith.mulf %30, %31 : vector<2x8x8xf32>
    %33 = vector.extract_strided_slice %13 {offsets = [0, 0, 40], sizes = [2, 8, 8], strides = [1, 1, 1]} : vector<2x8x96xf32> to vector<2x8x8xf32>
    %34 = vector.extract_strided_slice %13 {offsets = [0, 0, 72], sizes = [2, 8, 8], strides = [1, 1, 1]} : vector<2x8x96xf32> to vector<2x8x8xf32>
    "tpu.trace_start"() <{level = 10 : i32, message = "bqd,bkd->bqk"}> : () -> ()
    %cst_18 = arith.constant dense<0.000000e+00> : vector<2x8x8xf32>
    %35 = tpu.matmul %32, %33, %cst_18 {dimension_numbers = #tpu.dot_dimension_numbers<[2], [2], [1], [1], [0, 0, 0, 1, 1, 1], [0], [0]>} : vector<2x8x8xf32>, vector<2x8x8xf32>, vector<2x8x8xf32> -> vector<2x8x8xf32>
    "tpu.trace_stop"() : () -> ()
    %cst_19 = arith.constant dense<0xFF800000> : vector<2x8xf32>
    %36 = vector.multi_reduction <maximumf>, %35, %cst_19 [2] : vector<2x8x8xf32> to vector<2x8xf32>
    %37 = vector.shape_cast %36 : vector<2x8xf32> to vector<2x8x1xf32>
    %38 = vector.broadcast %37 : vector<2x8x1xf32> to vector<2x8x8xf32>
    %39 = arith.subf %35, %38 : vector<2x8x8xf32>
    %40 = math.exp %39 : vector<2x8x8xf32>
    %cst_20 = arith.constant dense<0.000000e+00> : vector<2x8xf32>
    %41 = vector.multi_reduction <add>, %40, %cst_20 [2] : vector<2x8x8xf32> to vector<2x8xf32>
    %42 = vector.shape_cast %41 : vector<2x8xf32> to vector<2x8x1xf32>
    %43 = vector.broadcast %42 : vector<2x8x1xf32> to vector<2x8x8xf32>
    %44 = arith.divf %40, %43 : vector<2x8x8xf32>
    "tpu.trace_start"() <{level = 10 : i32, message = "bqk,bkd->bqd"}> : () -> ()
    %cst_21 = arith.constant dense<0.000000e+00> : vector<2x8x8xf32>
    %45 = tpu.matmul %44, %34, %cst_21 {dimension_numbers = #tpu.dot_dimension_numbers<[2], [1], [1], [2], [0, 0, 0, 1, 1, 2], [0], [0]>} : vector<2x8x8xf32>, vector<2x8x8xf32>, vector<2x8x8xf32> -> vector<2x8x8xf32>
    "tpu.trace_stop"() : () -> ()
    %46 = vector.extract_strided_slice %13 {offsets = [0, 0, 16], sizes = [2, 8, 8], strides = [1, 1, 1]} : vector<2x8x96xf32> to vector<2x8x8xf32>
    %cst_22 = arith.constant 0.353553385 : f32
    %47 = vector.broadcast %cst_22 : f32 to vector<2x8x8xf32>
    %48 = arith.mulf %46, %47 : vector<2x8x8xf32>
    %49 = vector.extract_strided_slice %13 {offsets = [0, 0, 48], sizes = [2, 8, 8], strides = [1, 1, 1]} : vector<2x8x96xf32> to vector<2x8x8xf32>
    %50 = vector.extract_strided_slice %13 {offsets = [0, 0, 80], sizes = [2, 8, 8], strides = [1, 1, 1]} : vector<2x8x96xf32> to vector<2x8x8xf32>
    "tpu.trace_start"() <{level = 10 : i32, message = "bqd,bkd->bqk"}> : () -> ()
    %cst_23 = arith.constant dense<0.000000e+00> : vector<2x8x8xf32>
    %51 = tpu.matmul %48, %49, %cst_23 {dimension_numbers = #tpu.dot_dimension_numbers<[2], [2], [1], [1], [0, 0, 0, 1, 1, 1], [0], [0]>} : vector<2x8x8xf32>, vector<2x8x8xf32>, vector<2x8x8xf32> -> vector<2x8x8xf32>
    "tpu.trace_stop"() : () -> ()
    %cst_24 = arith.constant dense<0xFF800000> : vector<2x8xf32>
    %52 = vector.multi_reduction <maximumf>, %51, %cst_24 [2] : vector<2x8x8xf32> to vector<2x8xf32>
    %53 = vector.shape_cast %52 : vector<2x8xf32> to vector<2x8x1xf32>
    %54 = vector.broadcast %53 : vector<2x8x1xf32> to vector<2x8x8xf32>
    %55 = arith.subf %51, %54 : vector<2x8x8xf32>
    %56 = math.exp %55 : vector<2x8x8xf32>
    %cst_25 = arith.constant dense<0.000000e+00> : vector<2x8xf32>
    %57 = vector.multi_reduction <add>, %56, %cst_25 [2] : vector<2x8x8xf32> to vector<2x8xf32>
    %58 = vector.shape_cast %57 : vector<2x8xf32> to vector<2x8x1xf32>
    %59 = vector.broadcast %58 : vector<2x8x1xf32> to vector<2x8x8xf32>
    %60 = arith.divf %56, %59 : vector<2x8x8xf32>
    "tpu.trace_start"() <{level = 10 : i32, message = "bqk,bkd->bqd"}> : () -> ()
    %cst_26 = arith.constant dense<0.000000e+00> : vector<2x8x8xf32>
    %61 = tpu.matmul %60, %50, %cst_26 {dimension_numbers = #tpu.dot_dimension_numbers<[2], [1], [1], [2], [0, 0, 0, 1, 1, 2], [0], [0]>} : vector<2x8x8xf32>, vector<2x8x8xf32>, vector<2x8x8xf32> -> vector<2x8x8xf32>
    "tpu.trace_stop"() : () -> ()
    %62 = vector.extract_strided_slice %13 {offsets = [0, 0, 24], sizes = [2, 8, 8], strides = [1, 1, 1]} : vector<2x8x96xf32> to vector<2x8x8xf32>
    %cst_27 = arith.constant 0.353553385 : f32
    %63 = vector.broadcast %cst_27 : f32 to vector<2x8x8xf32>
    %64 = arith.mulf %62, %63 : vector<2x8x8xf32>
    %65 = vector.extract_strided_slice %13 {offsets = [0, 0, 56], sizes = [2, 8, 8], strides = [1, 1, 1]} : vector<2x8x96xf32> to vector<2x8x8xf32>
    %66 = vector.extract_strided_slice %13 {offsets = [0, 0, 88], sizes = [2, 8, 8], strides = [1, 1, 1]} : vector<2x8x96xf32> to vector<2x8x8xf32>
    "tpu.trace_start"() <{level = 10 : i32, message = "bqd,bkd->bqk"}> : () -> ()
    %cst_28 = arith.constant dense<0.000000e+00> : vector<2x8x8xf32>
    %67 = tpu.matmul %64, %65, %cst_28 {dimension_numbers = #tpu.dot_dimension_numbers<[2], [2], [1], [1], [0, 0, 0, 1, 1, 1], [0], [0]>} : vector<2x8x8xf32>, vector<2x8x8xf32>, vector<2x8x8xf32> -> vector<2x8x8xf32>
    "tpu.trace_stop"() : () -> ()
    %cst_29 = arith.constant dense<0xFF800000> : vector<2x8xf32>
    %68 = vector.multi_reduction <maximumf>, %67, %cst_29 [2] : vector<2x8x8xf32> to vector<2x8xf32>
    %69 = vector.shape_cast %68 : vector<2x8xf32> to vector<2x8x1xf32>
    %70 = vector.broadcast %69 : vector<2x8x1xf32> to vector<2x8x8xf32>
    %71 = arith.subf %67, %70 : vector<2x8x8xf32>
    %72 = math.exp %71 : vector<2x8x8xf32>
    %cst_30 = arith.constant dense<0.000000e+00> : vector<2x8xf32>
    %73 = vector.multi_reduction <add>, %72, %cst_30 [2] : vector<2x8x8xf32> to vector<2x8xf32>
    %74 = vector.shape_cast %73 : vector<2x8xf32> to vector<2x8x1xf32>
    %75 = vector.broadcast %74 : vector<2x8x1xf32> to vector<2x8x8xf32>
    %76 = arith.divf %72, %75 : vector<2x8x8xf32>
    "tpu.trace_start"() <{level = 10 : i32, message = "bqk,bkd->bqd"}> : () -> ()
    %cst_31 = arith.constant dense<0.000000e+00> : vector<2x8x8xf32>
    %77 = tpu.matmul %76, %66, %cst_31 {dimension_numbers = #tpu.dot_dimension_numbers<[2], [1], [1], [2], [0, 0, 0, 1, 1, 2], [0], [0]>} : vector<2x8x8xf32>, vector<2x8x8xf32>, vector<2x8x8xf32> -> vector<2x8x8xf32>
    "tpu.trace_stop"() : () -> ()
    %78 = tpu.concatenate %29, %45, %61, %77 in 2 : vector<2x8x8xf32>, vector<2x8x8xf32>, vector<2x8x8xf32>, vector<2x8x8xf32> -> vector<2x8x32xf32>
    %79 = vector.shape_cast %78 : vector<2x8x32xf32> to vector<16x32xf32>
    %c0_32 = arith.constant 0 : index
    %c0_33 = arith.constant 0 : index
    %c0_34 = arith.constant 0 : index
    %80 = vector.load %arg5[%c0_32, %c0_33, %c0_34] : memref<2x32x32xf32, #tpu.memory_space<vmem>>, vector<1x32x32xf32>
    %81 = vector.shape_cast %80 : vector<1x32x32xf32> to vector<32x32xf32>
    %cst_35 = arith.constant dense<0.000000e+00> : vector<16x32xf32>
    %82 = tpu.matmul %79, %81, %cst_35 {dimension_numbers = #tpu.dot_dimension_numbers<[1], [0], [0], [1], [0, 0, 1, 1], [], []>} : vector<16x32xf32>, vector<32x32xf32>, vector<16x32xf32> -> vector<16x32xf32>
    %83 = arith.addf %5, %82 : vector<16x32xf32>
    %c0_36 = arith.constant 0 : index
    %c0_37 = arith.constant 0 : index
    %c0_38 = arith.constant 0 : index
    %84 = vector.load %arg6[%c0_36, %c0_37, %c0_38] : memref<2x1x32xf32, #tpu.memory_space<vmem>>, vector<1x1x32xf32>
    %85 = vector.shape_cast %84 : vector<1x1x32xf32> to vector<1x32xf32>
    %86 = vector.broadcast %85 : vector<1x32xf32> to vector<16x32xf32>
    %87 = arith.addf %83, %86 : vector<16x32xf32>
    %c0_39 = arith.constant 0 : index
    %c0_40 = arith.constant 0 : index
    %c0_41 = arith.constant 0 : index
    %88 = vector.load %arg7[%c0_39, %c0_40, %c0_41] : memref<2x1x32xf32, #tpu.memory_space<vmem>>, vector<1x1x32xf32>
    %89 = vector.shape_cast %88 : vector<1x1x32xf32> to vector<1x32xf32>
    %c0_42 = arith.constant 0 : index
    %c0_43 = arith.constant 0 : index
    %c0_44 = arith.constant 0 : index
    %90 = vector.load %arg8[%c0_42, %c0_43, %c0_44] : memref<2x1x32xf32, #tpu.memory_space<vmem>>, vector<1x1x32xf32>
    %91 = vector.shape_cast %90 : vector<1x1x32xf32> to vector<1x32xf32>
    %cst_45 = arith.constant dense<0.000000e+00> : vector<16xf32>
    %92 = vector.multi_reduction <add>, %87, %cst_45 [1] : vector<16x32xf32> to vector<16xf32>
    %93 = vector.shape_cast %92 : vector<16xf32> to vector<16x1xf32>
    %cst_46 = arith.constant 3.200000e+01 : f32
    %94 = vector.broadcast %cst_46 : f32 to vector<16x1xf32>
    %95 = arith.divf %93, %94 : vector<16x1xf32>
    %96 = vector.broadcast %95 : vector<16x1xf32> to vector<16x32xf32>
    %97 = arith.subf %87, %96 : vector<16x32xf32>
    %98 = arith.mulf %97, %97 : vector<16x32xf32>
    %cst_47 = arith.constant dense<0.000000e+00> : vector<16xf32>
    %99 = vector.multi_reduction <add>, %98, %cst_47 [1] : vector<16x32xf32> to vector<16xf32>
    %100 = vector.shape_cast %99 : vector<16xf32> to vector<16x1xf32>
    %cst_48 = arith.constant 3.200000e+01 : f32
    %101 = vector.broadcast %cst_48 : f32 to vector<16x1xf32>
    %102 = arith.divf %100, %101 : vector<16x1xf32>
    %103 = vector.broadcast %95 : vector<16x1xf32> to vector<16x32xf32>
    %104 = arith.subf %87, %103 : vector<16x32xf32>
    %cst_49 = arith.constant 9.99999974E-6 : f32
    %105 = vector.broadcast %cst_49 : f32 to vector<16x1xf32>
    %106 = arith.addf %102, %105 : vector<16x1xf32>
    %107 = math.rsqrt %106 : vector<16x1xf32>
    %108 = vector.broadcast %107 : vector<16x1xf32> to vector<16x32xf32>
    %109 = arith.mulf %104, %108 : vector<16x32xf32>
    %110 = vector.broadcast %89 : vector<1x32xf32> to vector<16x32xf32>
    %111 = arith.mulf %109, %110 : vector<16x32xf32>
    %112 = vector.broadcast %91 : vector<1x32xf32> to vector<16x32xf32>
    %113 = arith.addf %111, %112 : vector<16x32xf32>
    %c0_50 = arith.constant 0 : index
    %c0_51 = arith.constant 0 : index
    %c0_52 = arith.constant 0 : index
    %114 = vector.load %arg9[%c0_50, %c0_51, %c0_52] : memref<2x32x2048xf32, #tpu.memory_space<vmem>>, vector<1x32x2048xf32>
    %115 = vector.shape_cast %114 : vector<1x32x2048xf32> to vector<32x2048xf32>
    %cst_53 = arith.constant dense<0.000000e+00> : vector<16x2048xf32>
    %116 = tpu.matmul %113, %115, %cst_53 {dimension_numbers = #tpu.dot_dimension_numbers<[1], [0], [0], [1], [0, 0, 1, 1], [], []>} : vector<16x32xf32>, vector<32x2048xf32>, vector<16x2048xf32> -> vector<16x2048xf32>
    %c0_54 = arith.constant 0 : index
    %c0_55 = arith.constant 0 : index
    %c0_56 = arith.constant 0 : index
    %117 = vector.load %arg10[%c0_54, %c0_55, %c0_56] : memref<2x1x2048xf32, #tpu.memory_space<vmem>>, vector<1x1x2048xf32>
    %118 = vector.shape_cast %117 : vector<1x1x2048xf32> to vector<1x2048xf32>
    %119 = vector.broadcast %118 : vector<1x2048xf32> to vector<16x2048xf32>
    %120 = arith.addf %116, %119 : vector<16x2048xf32>
    %cst_57 = arith.constant 0.000000e+00 : f32
    %121 = vector.broadcast %cst_57 : f32 to vector<16x2048xf32>
    %122 = arith.maximumf %120, %121 : vector<16x2048xf32>
    %c0_58 = arith.constant 0 : index
    %c0_59 = arith.constant 0 : index
    %c0_60 = arith.constant 0 : index
    %123 = vector.load %arg11[%c0_58, %c0_59, %c0_60] : memref<2x2048x32xf32, #tpu.memory_space<vmem>>, vector<1x2048x32xf32>
    %124 = vector.shape_cast %123 : vector<1x2048x32xf32> to vector<2048x32xf32>
    %cst_61 = arith.constant dense<0.000000e+00> : vector<16x32xf32>
    %125 = tpu.matmul %122, %124, %cst_61 {dimension_numbers = #tpu.dot_dimension_numbers<[1], [0], [0], [1], [0, 0, 1, 1], [], []>} : vector<16x2048xf32>, vector<2048x32xf32>, vector<16x32xf32> -> vector<16x32xf32>
    %c0_62 = arith.constant 0 : index
    %c0_63 = arith.constant 0 : index
    %c0_64 = arith.constant 0 : index
    %126 = vector.load %arg12[%c0_62, %c0_63, %c0_64] : memref<2x1x32xf32, #tpu.memory_space<vmem>>, vector<1x1x32xf32>
    %127 = vector.shape_cast %126 : vector<1x1x32xf32> to vector<1x32xf32>
    %128 = vector.broadcast %127 : vector<1x32xf32> to vector<16x32xf32>
    %129 = arith.addf %125, %128 : vector<16x32xf32>
    %130 = arith.addf %113, %129 : vector<16x32xf32>
    %c0_65 = arith.constant 0 : index
    %c0_66 = arith.constant 0 : index
    %c0_67 = arith.constant 0 : index
    %131 = vector.load %arg13[%c0_65, %c0_66, %c0_67] : memref<2x1x32xf32, #tpu.memory_space<vmem>>, vector<1x1x32xf32>
    %132 = vector.shape_cast %131 : vector<1x1x32xf32> to vector<1x32xf32>
    %c0_68 = arith.constant 0 : index
    %c0_69 = arith.constant 0 : index
    %c0_70 = arith.constant 0 : index
    %133 = vector.load %arg14[%c0_68, %c0_69, %c0_70] : memref<2x1x32xf32, #tpu.memory_space<vmem>>, vector<1x1x32xf32>
    %134 = vector.shape_cast %133 : vector<1x1x32xf32> to vector<1x32xf32>
    %cst_71 = arith.constant dense<0.000000e+00> : vector<16xf32>
    %135 = vector.multi_reduction <add>, %130, %cst_71 [1] : vector<16x32xf32> to vector<16xf32>
    %136 = vector.shape_cast %135 : vector<16xf32> to vector<16x1xf32>
    %cst_72 = arith.constant 3.200000e+01 : f32
    %137 = vector.broadcast %cst_72 : f32 to vector<16x1xf32>
    %138 = arith.divf %136, %137 : vector<16x1xf32>
    %139 = vector.broadcast %138 : vector<16x1xf32> to vector<16x32xf32>
    %140 = arith.subf %130, %139 : vector<16x32xf32>
    %141 = arith.mulf %140, %140 : vector<16x32xf32>
    %cst_73 = arith.constant dense<0.000000e+00> : vector<16xf32>
    %142 = vector.multi_reduction <add>, %141, %cst_73 [1] : vector<16x32xf32> to vector<16xf32>
    %143 = vector.shape_cast %142 : vector<16xf32> to vector<16x1xf32>
    %cst_74 = arith.constant 3.200000e+01 : f32
    %144 = vector.broadcast %cst_74 : f32 to vector<16x1xf32>
    %145 = arith.divf %143, %144 : vector<16x1xf32>
    %146 = vector.broadcast %138 : vector<16x1xf32> to vector<16x32xf32>
    %147 = arith.subf %130, %146 : vector<16x32xf32>
    %cst_75 = arith.constant 9.99999974E-6 : f32
    %148 = vector.broadcast %cst_75 : f32 to vector<16x1xf32>
    %149 = arith.addf %145, %148 : vector<16x1xf32>
    %150 = math.rsqrt %149 : vector<16x1xf32>
    %151 = vector.broadcast %150 : vector<16x1xf32> to vector<16x32xf32>
    %152 = arith.mulf %147, %151 : vector<16x32xf32>
    %153 = vector.broadcast %132 : vector<1x32xf32> to vector<16x32xf32>
    %154 = arith.mulf %152, %153 : vector<16x32xf32>
    %155 = vector.broadcast %134 : vector<1x32xf32> to vector<16x32xf32>
    %156 = arith.addf %154, %155 : vector<16x32xf32>
    %c1 = arith.constant 1 : index
    %c0_76 = arith.constant 0 : index
    %c0_77 = arith.constant 0 : index
    %157 = vector.load %arg3[%c1, %c0_76, %c0_77] : memref<2x32x96xf32, #tpu.memory_space<vmem>>, vector<1x32x96xf32>
    %158 = vector.shape_cast %157 : vector<1x32x96xf32> to vector<32x96xf32>
    %cst_78 = arith.constant dense<0.000000e+00> : vector<16x96xf32>
    %159 = tpu.matmul %156, %158, %cst_78 {dimension_numbers = #tpu.dot_dimension_numbers<[1], [0], [0], [1], [0, 0, 1, 1], [], []>} : vector<16x32xf32>, vector<32x96xf32>, vector<16x96xf32> -> vector<16x96xf32>
    %c1_79 = arith.constant 1 : index
    %c0_80 = arith.constant 0 : index
    %c0_81 = arith.constant 0 : index
    %160 = vector.load %arg4[%c1_79, %c0_80, %c0_81] : memref<2x1x96xf32, #tpu.memory_space<vmem>>, vector<1x1x96xf32>
    %161 = vector.shape_cast %160 : vector<1x1x96xf32> to vector<1x96xf32>
    %162 = vector.broadcast %161 : vector<1x96xf32> to vector<16x96xf32>
    %163 = arith.addf %159, %162 : vector<16x96xf32>
    %164 = vector.shape_cast %163 : vector<16x96xf32> to vector<2x8x96xf32>
    %165 = vector.extract_strided_slice %164 {offsets = [0, 0, 0], sizes = [2, 8, 8], strides = [1, 1, 1]} : vector<2x8x96xf32> to vector<2x8x8xf32>
    %cst_82 = arith.constant 0.353553385 : f32
    %166 = vector.broadcast %cst_82 : f32 to vector<2x8x8xf32>
    %167 = arith.mulf %165, %166 : vector<2x8x8xf32>
    %168 = vector.extract_strided_slice %164 {offsets = [0, 0, 32], sizes = [2, 8, 8], strides = [1, 1, 1]} : vector<2x8x96xf32> to vector<2x8x8xf32>
    %169 = vector.extract_strided_slice %164 {offsets = [0, 0, 64], sizes = [2, 8, 8], strides = [1, 1, 1]} : vector<2x8x96xf32> to vector<2x8x8xf32>
    "tpu.trace_start"() <{level = 10 : i32, message = "bqd,bkd->bqk"}> : () -> ()
    %cst_83 = arith.constant dense<0.000000e+00> : vector<2x8x8xf32>
    %170 = tpu.matmul %167, %168, %cst_83 {dimension_numbers = #tpu.dot_dimension_numbers<[2], [2], [1], [1], [0, 0, 0, 1, 1, 1], [0], [0]>} : vector<2x8x8xf32>, vector<2x8x8xf32>, vector<2x8x8xf32> -> vector<2x8x8xf32>
    "tpu.trace_stop"() : () -> ()
    %cst_84 = arith.constant dense<0xFF800000> : vector<2x8xf32>
    %171 = vector.multi_reduction <maximumf>, %170, %cst_84 [2] : vector<2x8x8xf32> to vector<2x8xf32>
    %172 = vector.shape_cast %171 : vector<2x8xf32> to vector<2x8x1xf32>
    %173 = vector.broadcast %172 : vector<2x8x1xf32> to vector<2x8x8xf32>
    %174 = arith.subf %170, %173 : vector<2x8x8xf32>
    %175 = math.exp %174 : vector<2x8x8xf32>
    %cst_85 = arith.constant dense<0.000000e+00> : vector<2x8xf32>
    %176 = vector.multi_reduction <add>, %175, %cst_85 [2] : vector<2x8x8xf32> to vector<2x8xf32>
    %177 = vector.shape_cast %176 : vector<2x8xf32> to vector<2x8x1xf32>
    %178 = vector.broadcast %177 : vector<2x8x1xf32> to vector<2x8x8xf32>
    %179 = arith.divf %175, %178 : vector<2x8x8xf32>
    "tpu.trace_start"() <{level = 10 : i32, message = "bqk,bkd->bqd"}> : () -> ()
    %cst_86 = arith.constant dense<0.000000e+00> : vector<2x8x8xf32>
    %180 = tpu.matmul %179, %169, %cst_86 {dimension_numbers = #tpu.dot_dimension_numbers<[2], [1], [1], [2], [0, 0, 0, 1, 1, 2], [0], [0]>} : vector<2x8x8xf32>, vector<2x8x8xf32>, vector<2x8x8xf32> -> vector<2x8x8xf32>
    "tpu.trace_stop"() : () -> ()
    %181 = vector.extract_strided_slice %164 {offsets = [0, 0, 8], sizes = [2, 8, 8], strides = [1, 1, 1]} : vector<2x8x96xf32> to vector<2x8x8xf32>
    %cst_87 = arith.constant 0.353553385 : f32
    %182 = vector.broadcast %cst_87 : f32 to vector<2x8x8xf32>
    %183 = arith.mulf %181, %182 : vector<2x8x8xf32>
    %184 = vector.extract_strided_slice %164 {offsets = [0, 0, 40], sizes = [2, 8, 8], strides = [1, 1, 1]} : vector<2x8x96xf32> to vector<2x8x8xf32>
    %185 = vector.extract_strided_slice %164 {offsets = [0, 0, 72], sizes = [2, 8, 8], strides = [1, 1, 1]} : vector<2x8x96xf32> to vector<2x8x8xf32>
    "tpu.trace_start"() <{level = 10 : i32, message = "bqd,bkd->bqk"}> : () -> ()
    %cst_88 = arith.constant dense<0.000000e+00> : vector<2x8x8xf32>
    %186 = tpu.matmul %183, %184, %cst_88 {dimension_numbers = #tpu.dot_dimension_numbers<[2], [2], [1], [1], [0, 0, 0, 1, 1, 1], [0], [0]>} : vector<2x8x8xf32>, vector<2x8x8xf32>, vector<2x8x8xf32> -> vector<2x8x8xf32>
    "tpu.trace_stop"() : () -> ()
    %cst_89 = arith.constant dense<0xFF800000> : vector<2x8xf32>
    %187 = vector.multi_reduction <maximumf>, %186, %cst_89 [2] : vector<2x8x8xf32> to vector<2x8xf32>
    %188 = vector.shape_cast %187 : vector<2x8xf32> to vector<2x8x1xf32>
    %189 = vector.broadcast %188 : vector<2x8x1xf32> to vector<2x8x8xf32>
    %190 = arith.subf %186, %189 : vector<2x8x8xf32>
    %191 = math.exp %190 : vector<2x8x8xf32>
    %cst_90 = arith.constant dense<0.000000e+00> : vector<2x8xf32>
    %192 = vector.multi_reduction <add>, %191, %cst_90 [2] : vector<2x8x8xf32> to vector<2x8xf32>
    %193 = vector.shape_cast %192 : vector<2x8xf32> to vector<2x8x1xf32>
    %194 = vector.broadcast %193 : vector<2x8x1xf32> to vector<2x8x8xf32>
    %195 = arith.divf %191, %194 : vector<2x8x8xf32>
    "tpu.trace_start"() <{level = 10 : i32, message = "bqk,bkd->bqd"}> : () -> ()
    %cst_91 = arith.constant dense<0.000000e+00> : vector<2x8x8xf32>
    %196 = tpu.matmul %195, %185, %cst_91 {dimension_numbers = #tpu.dot_dimension_numbers<[2], [1], [1], [2], [0, 0, 0, 1, 1, 2], [0], [0]>} : vector<2x8x8xf32>, vector<2x8x8xf32>, vector<2x8x8xf32> -> vector<2x8x8xf32>
    "tpu.trace_stop"() : () -> ()
    %197 = vector.extract_strided_slice %164 {offsets = [0, 0, 16], sizes = [2, 8, 8], strides = [1, 1, 1]} : vector<2x8x96xf32> to vector<2x8x8xf32>
    %cst_92 = arith.constant 0.353553385 : f32
    %198 = vector.broadcast %cst_92 : f32 to vector<2x8x8xf32>
    %199 = arith.mulf %197, %198 : vector<2x8x8xf32>
    %200 = vector.extract_strided_slice %164 {offsets = [0, 0, 48], sizes = [2, 8, 8], strides = [1, 1, 1]} : vector<2x8x96xf32> to vector<2x8x8xf32>
    %201 = vector.extract_strided_slice %164 {offsets = [0, 0, 80], sizes = [2, 8, 8], strides = [1, 1, 1]} : vector<2x8x96xf32> to vector<2x8x8xf32>
    "tpu.trace_start"() <{level = 10 : i32, message = "bqd,bkd->bqk"}> : () -> ()
    %cst_93 = arith.constant dense<0.000000e+00> : vector<2x8x8xf32>
    %202 = tpu.matmul %199, %200, %cst_93 {dimension_numbers = #tpu.dot_dimension_numbers<[2], [2], [1], [1], [0, 0, 0, 1, 1, 1], [0], [0]>} : vector<2x8x8xf32>, vector<2x8x8xf32>, vector<2x8x8xf32> -> vector<2x8x8xf32>
    "tpu.trace_stop"() : () -> ()
    %cst_94 = arith.constant dense<0xFF800000> : vector<2x8xf32>
    %203 = vector.multi_reduction <maximumf>, %202, %cst_94 [2] : vector<2x8x8xf32> to vector<2x8xf32>
    %204 = vector.shape_cast %203 : vector<2x8xf32> to vector<2x8x1xf32>
    %205 = vector.broadcast %204 : vector<2x8x1xf32> to vector<2x8x8xf32>
    %206 = arith.subf %202, %205 : vector<2x8x8xf32>
    %207 = math.exp %206 : vector<2x8x8xf32>
    %cst_95 = arith.constant dense<0.000000e+00> : vector<2x8xf32>
    %208 = vector.multi_reduction <add>, %207, %cst_95 [2] : vector<2x8x8xf32> to vector<2x8xf32>
    %209 = vector.shape_cast %208 : vector<2x8xf32> to vector<2x8x1xf32>
    %210 = vector.broadcast %209 : vector<2x8x1xf32> to vector<2x8x8xf32>
    %211 = arith.divf %207, %210 : vector<2x8x8xf32>
    "tpu.trace_start"() <{level = 10 : i32, message = "bqk,bkd->bqd"}> : () -> ()
    %cst_96 = arith.constant dense<0.000000e+00> : vector<2x8x8xf32>
    %212 = tpu.matmul %211, %201, %cst_96 {dimension_numbers = #tpu.dot_dimension_numbers<[2], [1], [1], [2], [0, 0, 0, 1, 1, 2], [0], [0]>} : vector<2x8x8xf32>, vector<2x8x8xf32>, vector<2x8x8xf32> -> vector<2x8x8xf32>
    "tpu.trace_stop"() : () -> ()
    %213 = vector.extract_strided_slice %164 {offsets = [0, 0, 24], sizes = [2, 8, 8], strides = [1, 1, 1]} : vector<2x8x96xf32> to vector<2x8x8xf32>
    %cst_97 = arith.constant 0.353553385 : f32
    %214 = vector.broadcast %cst_97 : f32 to vector<2x8x8xf32>
    %215 = arith.mulf %213, %214 : vector<2x8x8xf32>
    %216 = vector.extract_strided_slice %164 {offsets = [0, 0, 56], sizes = [2, 8, 8], strides = [1, 1, 1]} : vector<2x8x96xf32> to vector<2x8x8xf32>
    %217 = vector.extract_strided_slice %164 {offsets = [0, 0, 88], sizes = [2, 8, 8], strides = [1, 1, 1]} : vector<2x8x96xf32> to vector<2x8x8xf32>
    "tpu.trace_start"() <{level = 10 : i32, message = "bqd,bkd->bqk"}> : () -> ()
    %cst_98 = arith.constant dense<0.000000e+00> : vector<2x8x8xf32>
    %218 = tpu.matmul %215, %216, %cst_98 {dimension_numbers = #tpu.dot_dimension_numbers<[2], [2], [1], [1], [0, 0, 0, 1, 1, 1], [0], [0]>} : vector<2x8x8xf32>, vector<2x8x8xf32>, vector<2x8x8xf32> -> vector<2x8x8xf32>
    "tpu.trace_stop"() : () -> ()
    %cst_99 = arith.constant dense<0xFF800000> : vector<2x8xf32>
    %219 = vector.multi_reduction <maximumf>, %218, %cst_99 [2] : vector<2x8x8xf32> to vector<2x8xf32>
    %220 = vector.shape_cast %219 : vector<2x8xf32> to vector<2x8x1xf32>
    %221 = vector.broadcast %220 : vector<2x8x1xf32> to vector<2x8x8xf32>
    %222 = arith.subf %218, %221 : vector<2x8x8xf32>
    %223 = math.exp %222 : vector<2x8x8xf32>
    %cst_100 = arith.constant dense<0.000000e+00> : vector<2x8xf32>
    %224 = vector.multi_reduction <add>, %223, %cst_100 [2] : vector<2x8x8xf32> to vector<2x8xf32>
    %225 = vector.shape_cast %224 : vector<2x8xf32> to vector<2x8x1xf32>
    %226 = vector.broadcast %225 : vector<2x8x1xf32> to vector<2x8x8xf32>
    %227 = arith.divf %223, %226 : vector<2x8x8xf32>
    "tpu.trace_start"() <{level = 10 : i32, message = "bqk,bkd->bqd"}> : () -> ()
    %cst_101 = arith.constant dense<0.000000e+00> : vector<2x8x8xf32>
    %228 = tpu.matmul %227, %217, %cst_101 {dimension_numbers = #tpu.dot_dimension_numbers<[2], [1], [1], [2], [0, 0, 0, 1, 1, 2], [0], [0]>} : vector<2x8x8xf32>, vector<2x8x8xf32>, vector<2x8x8xf32> -> vector<2x8x8xf32>
    "tpu.trace_stop"() : () -> ()
    %229 = tpu.concatenate %180, %196, %212, %228 in 2 : vector<2x8x8xf32>, vector<2x8x8xf32>, vector<2x8x8xf32>, vector<2x8x8xf32> -> vector<2x8x32xf32>
    %230 = vector.shape_cast %229 : vector<2x8x32xf32> to vector<16x32xf32>
    %c1_102 = arith.constant 1 : index
    %c0_103 = arith.constant 0 : index
    %c0_104 = arith.constant 0 : index
    %231 = vector.load %arg5[%c1_102, %c0_103, %c0_104] : memref<2x32x32xf32, #tpu.memory_space<vmem>>, vector<1x32x32xf32>
    %232 = vector.shape_cast %231 : vector<1x32x32xf32> to vector<32x32xf32>
    %cst_105 = arith.constant dense<0.000000e+00> : vector<16x32xf32>
    %233 = tpu.matmul %230, %232, %cst_105 {dimension_numbers = #tpu.dot_dimension_numbers<[1], [0], [0], [1], [0, 0, 1, 1], [], []>} : vector<16x32xf32>, vector<32x32xf32>, vector<16x32xf32> -> vector<16x32xf32>
    %234 = arith.addf %156, %233 : vector<16x32xf32>
    %c1_106 = arith.constant 1 : index
    %c0_107 = arith.constant 0 : index
    %c0_108 = arith.constant 0 : index
    %235 = vector.load %arg6[%c1_106, %c0_107, %c0_108] : memref<2x1x32xf32, #tpu.memory_space<vmem>>, vector<1x1x32xf32>
    %236 = vector.shape_cast %235 : vector<1x1x32xf32> to vector<1x32xf32>
    %237 = vector.broadcast %236 : vector<1x32xf32> to vector<16x32xf32>
    %238 = arith.addf %234, %237 : vector<16x32xf32>
    %c1_109 = arith.constant 1 : index
    %c0_110 = arith.constant 0 : index
    %c0_111 = arith.constant 0 : index
    %239 = vector.load %arg7[%c1_109, %c0_110, %c0_111] : memref<2x1x32xf32, #tpu.memory_space<vmem>>, vector<1x1x32xf32>
    %240 = vector.shape_cast %239 : vector<1x1x32xf32> to vector<1x32xf32>
    %c1_112 = arith.constant 1 : index
    %c0_113 = arith.constant 0 : index
    %c0_114 = arith.constant 0 : index
    %241 = vector.load %arg8[%c1_112, %c0_113, %c0_114] : memref<2x1x32xf32, #tpu.memory_space<vmem>>, vector<1x1x32xf32>
    %242 = vector.shape_cast %241 : vector<1x1x32xf32> to vector<1x32xf32>
    %cst_115 = arith.constant dense<0.000000e+00> : vector<16xf32>
    %243 = vector.multi_reduction <add>, %238, %cst_115 [1] : vector<16x32xf32> to vector<16xf32>
    %244 = vector.shape_cast %243 : vector<16xf32> to vector<16x1xf32>
    %cst_116 = arith.constant 3.200000e+01 : f32
    %245 = vector.broadcast %cst_116 : f32 to vector<16x1xf32>
    %246 = arith.divf %244, %245 : vector<16x1xf32>
    %247 = vector.broadcast %246 : vector<16x1xf32> to vector<16x32xf32>
    %248 = arith.subf %238, %247 : vector<16x32xf32>
    %249 = arith.mulf %248, %248 : vector<16x32xf32>
    %cst_117 = arith.constant dense<0.000000e+00> : vector<16xf32>
    %250 = vector.multi_reduction <add>, %249, %cst_117 [1] : vector<16x32xf32> to vector<16xf32>
    %251 = vector.shape_cast %250 : vector<16xf32> to vector<16x1xf32>
    %cst_118 = arith.constant 3.200000e+01 : f32
    %252 = vector.broadcast %cst_118 : f32 to vector<16x1xf32>
    %253 = arith.divf %251, %252 : vector<16x1xf32>
    %254 = vector.broadcast %246 : vector<16x1xf32> to vector<16x32xf32>
    %255 = arith.subf %238, %254 : vector<16x32xf32>
    %cst_119 = arith.constant 9.99999974E-6 : f32
    %256 = vector.broadcast %cst_119 : f32 to vector<16x1xf32>
    %257 = arith.addf %253, %256 : vector<16x1xf32>
    %258 = math.rsqrt %257 : vector<16x1xf32>
    %259 = vector.broadcast %258 : vector<16x1xf32> to vector<16x32xf32>
    %260 = arith.mulf %255, %259 : vector<16x32xf32>
    %261 = vector.broadcast %240 : vector<1x32xf32> to vector<16x32xf32>
    %262 = arith.mulf %260, %261 : vector<16x32xf32>
    %263 = vector.broadcast %242 : vector<1x32xf32> to vector<16x32xf32>
    %264 = arith.addf %262, %263 : vector<16x32xf32>
    %c1_120 = arith.constant 1 : index
    %c0_121 = arith.constant 0 : index
    %c0_122 = arith.constant 0 : index
    %265 = vector.load %arg9[%c1_120, %c0_121, %c0_122] : memref<2x32x2048xf32, #tpu.memory_space<vmem>>, vector<1x32x2048xf32>
    %266 = vector.shape_cast %265 : vector<1x32x2048xf32> to vector<32x2048xf32>
    %cst_123 = arith.constant dense<0.000000e+00> : vector<16x2048xf32>
    %267 = tpu.matmul %264, %266, %cst_123 {dimension_numbers = #tpu.dot_dimension_numbers<[1], [0], [0], [1], [0, 0, 1, 1], [], []>} : vector<16x32xf32>, vector<32x2048xf32>, vector<16x2048xf32> -> vector<16x2048xf32>
    %c1_124 = arith.constant 1 : index
    %c0_125 = arith.constant 0 : index
    %c0_126 = arith.constant 0 : index
    %268 = vector.load %arg10[%c1_124, %c0_125, %c0_126] : memref<2x1x2048xf32, #tpu.memory_space<vmem>>, vector<1x1x2048xf32>
    %269 = vector.shape_cast %268 : vector<1x1x2048xf32> to vector<1x2048xf32>
    %270 = vector.broadcast %269 : vector<1x2048xf32> to vector<16x2048xf32>
    %271 = arith.addf %267, %270 : vector<16x2048xf32>
    %cst_127 = arith.constant 0.000000e+00 : f32
    %272 = vector.broadcast %cst_127 : f32 to vector<16x2048xf32>
    %273 = arith.maximumf %271, %272 : vector<16x2048xf32>
    %c1_128 = arith.constant 1 : index
    %c0_129 = arith.constant 0 : index
    %c0_130 = arith.constant 0 : index
    %274 = vector.load %arg11[%c1_128, %c0_129, %c0_130] : memref<2x2048x32xf32, #tpu.memory_space<vmem>>, vector<1x2048x32xf32>
    %275 = vector.shape_cast %274 : vector<1x2048x32xf32> to vector<2048x32xf32>
    %cst_131 = arith.constant dense<0.000000e+00> : vector<16x32xf32>
    %276 = tpu.matmul %273, %275, %cst_131 {dimension_numbers = #tpu.dot_dimension_numbers<[1], [0], [0], [1], [0, 0, 1, 1], [], []>} : vector<16x2048xf32>, vector<2048x32xf32>, vector<16x32xf32> -> vector<16x32xf32>
    %c1_132 = arith.constant 1 : index
    %c0_133 = arith.constant 0 : index
    %c0_134 = arith.constant 0 : index
    %277 = vector.load %arg12[%c1_132, %c0_133, %c0_134] : memref<2x1x32xf32, #tpu.memory_space<vmem>>, vector<1x1x32xf32>
    %278 = vector.shape_cast %277 : vector<1x1x32xf32> to vector<1x32xf32>
    %279 = vector.broadcast %278 : vector<1x32xf32> to vector<16x32xf32>
    %280 = arith.addf %276, %279 : vector<16x32xf32>
    %281 = arith.addf %264, %280 : vector<16x32xf32>
    %c1_135 = arith.constant 1 : index
    %c0_136 = arith.constant 0 : index
    %c0_137 = arith.constant 0 : index
    %282 = vector.load %arg13[%c1_135, %c0_136, %c0_137] : memref<2x1x32xf32, #tpu.memory_space<vmem>>, vector<1x1x32xf32>
    %283 = vector.shape_cast %282 : vector<1x1x32xf32> to vector<1x32xf32>
    %c1_138 = arith.constant 1 : index
    %c0_139 = arith.constant 0 : index
    %c0_140 = arith.constant 0 : index
    %284 = vector.load %arg14[%c1_138, %c0_139, %c0_140] : memref<2x1x32xf32, #tpu.memory_space<vmem>>, vector<1x1x32xf32>
    %285 = vector.shape_cast %284 : vector<1x1x32xf32> to vector<1x32xf32>
    %cst_141 = arith.constant dense<0.000000e+00> : vector<16xf32>
    %286 = vector.multi_reduction <add>, %281, %cst_141 [1] : vector<16x32xf32> to vector<16xf32>
    %287 = vector.shape_cast %286 : vector<16xf32> to vector<16x1xf32>
    %cst_142 = arith.constant 3.200000e+01 : f32
    %288 = vector.broadcast %cst_142 : f32 to vector<16x1xf32>
    %289 = arith.divf %287, %288 : vector<16x1xf32>
    %290 = vector.broadcast %289 : vector<16x1xf32> to vector<16x32xf32>
    %291 = arith.subf %281, %290 : vector<16x32xf32>
    %292 = arith.mulf %291, %291 : vector<16x32xf32>
    %cst_143 = arith.constant dense<0.000000e+00> : vector<16xf32>
    %293 = vector.multi_reduction <add>, %292, %cst_143 [1] : vector<16x32xf32> to vector<16xf32>
    %294 = vector.shape_cast %293 : vector<16xf32> to vector<16x1xf32>
    %cst_144 = arith.constant 3.200000e+01 : f32
    %295 = vector.broadcast %cst_144 : f32 to vector<16x1xf32>
    %296 = arith.divf %294, %295 : vector<16x1xf32>
    %297 = vector.broadcast %289 : vector<16x1xf32> to vector<16x32xf32>
    %298 = arith.subf %281, %297 : vector<16x32xf32>
    %cst_145 = arith.constant 9.99999974E-6 : f32
    %299 = vector.broadcast %cst_145 : f32 to vector<16x1xf32>
    %300 = arith.addf %296, %299 : vector<16x1xf32>
    %301 = math.rsqrt %300 : vector<16x1xf32>
    %302 = vector.broadcast %301 : vector<16x1xf32> to vector<16x32xf32>
    %303 = arith.mulf %298, %302 : vector<16x32xf32>
    %304 = vector.broadcast %283 : vector<1x32xf32> to vector<16x32xf32>
    %305 = arith.mulf %303, %304 : vector<16x32xf32>
    %306 = vector.broadcast %285 : vector<1x32xf32> to vector<16x32xf32>
    %307 = arith.addf %305, %306 : vector<16x32xf32>
    %c0_146 = arith.constant 0 : index
    %c0_147 = arith.constant 0 : index
    %308 = vector.load %arg15[%c0_146, %c0_147] : memref<32x1xf32, #tpu.memory_space<vmem>>, vector<32x1xf32>
    %cst_148 = arith.constant dense<0.000000e+00> : vector<16x1xf32>
    %309 = tpu.matmul %307, %308, %cst_148 {dimension_numbers = #tpu.dot_dimension_numbers<[1], [0], [0], [1], [0, 0, 1, 1], [], []>} : vector<16x32xf32>, vector<32x1xf32>, vector<16x1xf32> -> vector<16x1xf32>
    %c0_149 = arith.constant 0 : index
    %c0_150 = arith.constant 0 : index
    %310 = vector.load %arg16[%c0_149, %c0_150] : memref<1x1xf32, #tpu.memory_space<vmem>>, vector<1x1xf32>
    %311 = vector.broadcast %310 : vector<1x1xf32> to vector<16x1xf32>
    %312 = arith.addf %309, %311 : vector<16x1xf32>
    %c0_151 = arith.constant 0 : index
    %c0_152 = arith.constant 0 : index
    %313 = vector.load %arg17[%c0_151, %c0_152] : memref<16x1xf32, #tpu.memory_space<vmem>>, vector<16x1xf32>
    tpu.vector_store %arg17[%c0_151, %c0_152], %312 {strides = array<i32>} : memref<16x1xf32, #tpu.memory_space<vmem>>, vector<16x1xf32>,
    return
  }
}

</mosaic_0001>

<bundles_post_ra>
// kernel: transformer_encoder_forward.1
= control target key start
LH: loop header
LB: loop body
LE: loop exit
PB: predicated region body
PF: predicated region fallthrough
CT: control target
= control target key end

     0   :  { %vm65_vm0 = vcmask 64512   ;;  %vm103_vm1 = vcmask 261120   ;;  %s4708_s30 = smov 120   ;;  %s4709_s18 = smov 80   ;;  %s7547_s1 = inlined_call_operand.vmem [shape: f32[8,32], index: 1, kind: input, shape index: {}]   ;;  %s7548_s0 = inlined_call_operand.vmem [shape: f32[16,8], index: 0, kind: input, shape index: {}]   ;;  %s7549_s3 = inlined_call_operand.vmem [shape: f32[2,32,96], index: 3, kind: input, shape index: {}]   ;;  %s7550_s2 = inlined_call_operand.vmem [shape: f32[1,32], index: 2, kind: input, shape index: {}]   ;;  %s7551_s4 = inlined_call_operand.vmem [shape: f32[2,1,96], index: 4, kind: input, shape index: {}]   ;;  %s7552_s5 = inlined_call_operand.vmem [shape: f32[2,32,32], index: 5, kind: input, shape index: {}]   ;;  %s7553_s6 = inlined_call_operand.vmem [shape: f32[2,1,32], index: 6, kind: input, shape index: {}]   ;;  %s7554_s7 = inlined_call_operand.vmem [shape: f32[2,1,32], index: 7, kind: input, shape index: {}]   ;;  %s7555_s8 = inlined_call_operand.vmem [shape: f32[2,1,32], index: 8, kind: input, shape index: {}]   ;;  %s7556_s9 = inlined_call_operand.vmem [shape: f32[2,32,2048], index: 9, kind: input, shape index: {}]   ;;  %s7557_s11 = inlined_call_operand.vmem [shape: f32[2,2048,32], index: 11, kind: input, shape index: {}]   ;;  %s7558_s10 = inlined_call_operand.vmem [shape: f32[2,1,2048], index: 10, kind: input, shape index: {}]   ;;  %s7559_s12 = inlined_call_operand.vmem [shape: f32[2,1,32], index: 12, kind: input, shape index: {}]   ;;  %s7560_s13 = inlined_call_operand.vmem [shape: f32[2,1,32], index: 13, kind: input, shape index: {}]   ;;  %s7561_s14 = inlined_call_operand.vmem [shape: f32[2,1,32], index: 14, kind: input, shape index: {}]   ;;  %s7562_s15 = inlined_call_operand.vmem [shape: f32[32,1], index: 15, kind: input, shape index: {}]   ;;  %s7563_s16 = inlined_call_operand.<no memory space> [shape: f32[1,1], index: 16, kind: input, shape index: {}]   ;;  %s7564_s17 = inlined_call_operand.vmem [shape: f32[16,1], index: 17, kind: output, shape index: {}]  }
   0x1   :  { %7581 = sst [smem:[#allocation3_spill]] %s7547_s1  ;;  %v98_v3 = vld [vmem:[%s7549_s3 + $0x18] sm:$0xff]  ;;  %v97_v4 = vld [vmem:[%s7549_s3 + $0x10] sm:$0xff]  ;;  %v96_v5 = vld [vmem:[%s7549_s3 + $0x8] sm:$0xff]  ;;  %s7568_s1 = smov 64  }
   0x2   :  { %7582 = sst [smem:[#allocation4_spill]] %s7548_s0  ;;  %v95_v6 = vld [vmem:[%s7549_s3] sm:$0xff]  ;;  %s4710_s19 = smov 112  }
   0x3   :  { %s7583_s26 = sld [smem:[#allocation3_spill]]  ;;  %v4607_v7 = vld [vmem:[%s7550_s2] ss:$0 sm:$0xff]  ;;  %s4705_s2 = smov 88  }
   0x4   :  { %s7584_s29 = sld [smem:[#allocation4_spill]]  ;;  %v4608_v12 = vld [vmem:[%s7551_s4] ss:$0 sm:$0xff]  ;;  %s7579_s0 = smov 72  }
   0x5   :  { %s4712_s20 = smov 104   ;;  %s7569_s21 = smov 56  }
   0x6   :  { %s7577_s22 = smov 48   ;;  %s7566_s23 = smov 40  }
   0x7   :  { %s7575_s24 = smov 8   ;;  %s7573_s25 = smov 16  }
   0x9   :  { %v60_v0 = vld [vmem:[%s7583_s26] sm:$0xff]  ;;  %s7571_s26 = smov 24  }
   0xa   :  { %v58_v1 = vld [vmem:[%s7584_s29] sm:$0xff]  ;;  %v59_v2 = vld [vmem:[%s7584_s29 + $0x8] sm:$0xff]  ;;  %87 = vmatpush.msra.mxu0 %v60_v0  ;;  %4586 = vmatpush.msra.mxu1 %v60_v0  ;;  %s4706_s29 = smov 96  }
   0xb   :  { %4125 = vmatmul.msk.f32.vlgmr.msra.gmra.mxu0 %vm65_vm0, %v58_v1  ;;  %4126 = vmatmul.msk.f32.vlgmr.msra.gmra.mxu1 %vm65_vm0, %v59_v2 }
   0xc   :  { %122 = vmatpush.msrb.mxu1 %v98_v3 }
   0xe   :  { %123 = vmatpush.msrb.mxu1 %v97_v4 }
  0x10   :  { %124 = vmatpush.msrb.mxu1 %v96_v5 }
  0x12   :  { %125 = vmatpush.msrb.mxu1 %v95_v6 }
  0x88   :  { %v89_v8 = vpop.f32.mrf.mxu0  ;;  %v92_v10 = vpop.f32.mrf.mxu1 }
  0x89   :  { %v4836_v9 = vadd.f32 %v4607_v7, %v89_v8  ;;  %v4840_v11 = vadd.f32 %v4607_v7, %v92_v10 }
  0x8b   :  { %4127 = vmatmul.msk.f32.vlgmr.msrb.gmra.mxu1 %vm103_vm1, %v4836_v9 }
  0x93   :  { %4128 = vmatmul.msk.f32.gmra.mxu1 %vm103_vm1, %v4840_v11 }
 0x108   :  { %v127_v13 = vpop.f32.mrf.mxu1 }
 0x109   :  { %v4847_v14 = vadd.f32 %v4608_v12, %v127_v13 }
 0x10b   :  { %293 = vrot.lane.b32.xlu2 %v4847_v14, %s4705_s2  ;;  %136 = vrot.lane.b32.xlu0 %v4847_v14, %s4706_s29  ;;  %v133_v17 = vmul.f32 0.35355338, %v4847_v14 }
 0x110   :  { %v130_v15 = vpop.f32.mrf.mxu1 }
 0x111   :  { %v4853_v16 = vadd.f32 %v4608_v12, %v130_v15 }
 0x113   :  { %164 = vrot.lane.b32.xlu1 %v4853_v16, %s4706_s29  ;;  %239 = vrot.lane.b32.xlu2 %v4847_v14, %s7568_s1  ;;  %v134_v18 = vmul.f32 0.35355338, %v4853_v16 }
 0x11b   :  { %291 = vrot.lane.b32.xlu2 %v133_v17, %s4708_s30  ;;  %319 = vrot.lane.b32.xlu1 %v134_v18, %s4708_s30 }
 0x123   :  { %321 = vrot.lane.b32.xlu2 %v4853_v16, %s4705_s2  ;;  %477 = vrot.lane.b32.xlu1 %v4853_v16, %s4709_s18 }
 0x12b   :  { %449 = vrot.lane.b32.xlu2 %v4847_v14, %s4709_s18 }
 0x133   :  { %447 = vrot.lane.b32.xlu2 %v133_v17, %s4710_s19 }
 0x13b   :  { %605 = vrot.lane.b32.xlu2 %v4847_v14, %s7579_s0 }
 0x143   :  { %633 = vrot.lane.b32.xlu2 %v4853_v16, %s7579_s0 }
 0x165   :  { %v294_v19 = vpop.permute.xlu2 %293 }
 0x166   :  { %4135 = vmatpush.xpose.msk.msrb.mxu0 %vm65_vm0, %v294_v19 }
 0x16d   :  { %v240_v20 = vpop.permute.xlu2 %239 }
 0x16e   :  { %260 = vmatpush.msra.mxu2 %v240_v20 }
 0x175   :  { %v292_v21 = vpop.permute.xlu2 %291 }
 0x176   :  { %4136 = vmatmul.msk.f32.vlgmr.msrb.gmra.mxu0 %vm65_vm0, %v292_v21 }
 0x17d   :  { %v137_v22 = vpop.permute.xlu0 %136  ;;  %v322_v23 = vpop.permute.xlu2 %321 }
 0x17e   :  { %4129 = vmatpush.xpose.msk.msra.mxu3 %vm65_vm0, %v137_v22  ;;  %4137 = vmatpush.xpose.msk.msrb.mxu2 %vm65_vm0, %v322_v23 }
 0x181   :  { %4130 = vmatmul.msk.f32.vlgmr.msra.gmra.mxu3 %vm65_vm0, %v133_v17 }
 0x185   :  { %v165_v24 = vpop.permute.xlu1 %164  ;;  %v450_v25 = vpop.permute.xlu2 %449 }
 0x186   :  { %4131 = vmatpush.xpose.msk.msrb.mxu3 %vm65_vm0, %v165_v24  ;;  %4141 = vmatpush.xpose.msk.msra.mxu0 %vm65_vm0, %v450_v25 }
 0x189   :  { %4132 = vmatmul.msk.f32.vlgmr.msrb.gmra.mxu3 %vm65_vm0, %v134_v18 }
 0x18d   :  { %v448_v26 = vpop.permute.xlu2 %447  ;;  %v320_v47 = vpop.permute.xlu1 %319 }
 0x18e   :  { %4142 = vmatmul.msk.f32.vlgmr.msra.gmra.mxu0 %vm65_vm0, %v448_v26 }
 0x195   :  { %v606_v27 = vpop.permute.xlu2 %605  ;;  %v478_v48 = vpop.permute.xlu1 %477 }
 0x196   :  { %4147 = vmatpush.xpose.msk.msrb.mxu0 %vm65_vm0, %v606_v27 }
 0x19d   :  { %v634_v49 = vpop.permute.xlu2 %633 }
 0x1f3   :  { %v4887_v32 = vpop.f32.mrf.mxu0 }
 0x1f4   :  { %v347_v46 = vsel %vm65_vm0, %v4887_v32, -inf }
 0x204   :  { %v160_v28 = vpop.f32.mrf.mxu3 }
 0x205   :  { %v191_v29 = vsel %vm65_vm0, %v160_v28, -inf }
 0x206   :  { %192 = vmax.xlane.f32.xlu0 %v191_v29 }
 0x20b   :  { %v472_v33 = vpop.f32.mrf.mxu0 }
 0x20c   :  { %v188_v30 = vpop.f32.mrf.mxu3  ;;  %v503_v34 = vsel %vm65_vm0, %v472_v33, -inf }
 0x20d   :  { %v194_v31 = vsel %vm65_vm0, %v188_v30, -inf }
 0x20e   :  { %195 = vmax.xlane.f32.xlu2 %v194_v31 }
 0x21a   :  { %603 = vrot.lane.b32.xlu0 %v133_v17, %s4712_s20 }
 0x244   :  { %504 = vmax.xlane.f32.xlu0 %v503_v34 }
 0x279   :  { %v193_v35 = vpop.xlane.xlu0 %192 }
 0x27a   :  { %v197_v36 = vsub.f32 %v160_v28, %v193_v35 }
 0x27c   :  { %v199_v37 = vmul.f32 1.442695, %v197_v36 }
 0x27e   :  { %4623 = vpow2.f32 %v199_v37 }
 0x281   :  { %v196_v51 = vpop.xlane.xlu2 %195 }
 0x282   :  { %v198_v54 = vsub.f32 %v188_v30, %v196_v51 }
 0x284   :  { %v4624_v38 = vpop.eup %4623  ;;  %v201_v59 = vmul.f32 1.442695, %v198_v54 }
 0x285   :  { %v203_v39 = vsel %vm65_vm0, %v4624_v38, 0.0 }
 0x286   :  { %204 = vadd.xlane.f32.xlu1 %v203_v39 }
 0x28c   :  { %v604_v40 = vpop.permute.xlu0 %603 }
 0x28d   :  { %4148 = vmatmul.msk.f32.vlgmr.msrb.gmra.mxu0 %vm65_vm0, %v604_v40 }
 0x29f   :  { %475 = vrot.lane.b32.xlu1 %v134_v18, %s4710_s19 }
 0x2a7   :  { %631 = vrot.lane.b32.xlu1 %v134_v18, %s4712_s20 }
 0x2b7   :  { %v505_v41 = vpop.xlane.xlu0 %504 }
 0x2b8   :  { %v509_v42 = vsub.f32 %v472_v33, %v505_v41 }
 0x2ba   :  { %v511_v43 = vmul.f32 1.442695, %v509_v42 }
 0x2bc   :  { %4625 = vpow2.f32 %v511_v43 }
 0x2c2   :  { %v4894_v44 = vpop.eup %4625 }
 0x2c3   :  { %v515_v45 = vsel %vm65_vm0, %v4894_v44, 0.0 }
 0x2c4   :  { %516 = vadd.xlane.f32.xlu2 %v515_v45 }
 0x2d1   :  { %348 = vmax.xlane.f32.xlu1 %v347_v46 }
 0x2f9   :  { %v205_v50 = vpop.xlane.xlu1 %204 }
 0x2fa   :  { %4627 = vrcp.f32 %v205_v50  ;;  %v220_v56 = vand.u32 2147483648, %v205_v50  ;;  %v218_v58 = vand.u32 2147483647, %v205_v50  ;;  %vm214_vm3 = vweird.f32 %v205_v50 }
 0x2fb   :  { %4629 = vpow2.f32 %v201_v59 }
 0x2fc   :  { %v221_v61 = vor.u32 1.1754944e-38, %v220_v56  ;;  %vm219_vm5 = vcmp.eq.f32.partialorder %v218_v58, 8.507059e+37 }
 0x300   :  { %v4628_v52 = vpop.eup %4627 }
 0x301   :  { %v210_v53 = vmul.f32 %v4628_v52, %v205_v50  ;;  %vm215_vm2 = vweird.f32 %v4628_v52  ;;  %v4630_v3 = vpop.eup %4629 }
 0x302   :  { %vm216_vm4 = vmor %vm214_vm3, %vm215_vm2  ;;  %v206_v4 = vsel %vm65_vm0, %v4630_v3, 0.0 }
 0x303   :  { %v211_v55 = vsub.f32 1.0, %v210_v53 }
 0x305   :  { %v212_v57 = vmul.f32 %v4628_v52, %v211_v55 }
 0x307   :  { %v213_v60 = vadd.f32 %v4628_v52, %v212_v57 }
 0x309   :  { %v217_v62 = vsel %vm216_vm4, %v4628_v52, %v213_v60 }
 0x30a   :  { %v628_v63 = vpop.f32.mrf.mxu0  ;;  %v222_v0 = vsel %vm219_vm5, %v221_v61, %v217_v62 }
 0x30b   :  { %v659_v1 = vsel %vm65_vm0, %v628_v63, -inf  ;;  %v223_v2 = vmul.f32 %v4624_v38, %v222_v0 }
 0x30c   :  { %660 = vmax.xlane.f32.xlu1 %v659_v1 }
 0x30d   :  { %4133 = vmatmul.msk.f32.vlgmr.msra.gmra.mxu2 %vm65_vm0, %v223_v2 }
 0x30e   :  { %4143 = vmatpush.xpose.msk.msra.mxu2 %vm65_vm0, %v478_v48 }
 0x311   :  { %v476_v5 = vpop.permute.xlu1 %475 }
 0x314   :  { %207 = vadd.xlane.f32.xlu1 %v206_v4 }
 0x315   :  { %4138 = vmatmul.msk.f32.vlgmr.msrb.gmra.mxu2 %vm65_vm0, %v320_v47 }
 0x316   :  { %4149 = vmatpush.xpose.msk.msrb.mxu2 %vm65_vm0, %v634_v49 }
 0x319   :  { %v632_v6 = vpop.permute.xlu1 %631 }
 0x31d   :  { %4144 = vmatmul.msk.f32.vlgmr.msra.gmra.mxu2 %vm65_vm0, %v476_v5 }
 0x325   :  { %4150 = vmatmul.msk.f32.vlgmr.msrb.gmra.mxu2 %vm65_vm0, %v632_v6 }
 0x32d   :  { %265 = vrot.lane.b32.xlu1 %v4853_v16, %s7568_s1  ;;  %s7596_s1 = smov 24  }
 0x337   :  { %v517_v41 = vpop.xlane.xlu2 %516 }
 0x338   :  { %vm526_vm15 = vweird.f32 %v517_v41 }
 0x344   :  { %v349_v7 = vpop.xlane.xlu1 %348 }
 0x345   :  { %v353_v8 = vsub.f32 %v4887_v32, %v349_v7 }
 0x347   :  { %v355_v10 = vmul.f32 1.442695, %v353_v8 }
 0x349   :  { %4631 = vpow2.f32 %v355_v10  ;;  %v532_v10 = vand.u32 2147483648, %v517_v41 }
 0x34f   :  { %v4911_v12 = vpop.eup %4631 }
 0x350   :  { %v359_v13 = vsel %vm65_vm0, %v4911_v12, 0.0 }
 0x351   :  { %360 = vadd.xlane.f32.xlu0 %v359_v13 }
 0x37f   :  { %v661_v15 = vpop.xlane.xlu1 %660 }
 0x380   :  { %v665_v17 = vsub.f32 %v628_v63, %v661_v15  ;;  %v530_v15 = vand.u32 2147483647, %v517_v41 }
 0x382   :  { %v667_v18 = vmul.f32 1.442695, %v665_v17  ;;  %vm531_vm3 = vcmp.eq.f32.partialorder %v530_v15, 8.507059e+37 }
 0x384   :  { %4633 = vpow2.f32 %v667_v18 }
 0x387   :  { %v208_v19 = vpop.xlane.xlu1 %207 }
 0x388   :  { %4635 = vrcp.f32 %v208_v19  ;;  %v235_v28 = vand.u32 2147483648, %v208_v19  ;;  %vm229_vm7 = vweird.f32 %v208_v19  ;;  %v233_v29 = vand.u32 2147483647, %v208_v19 }
 0x38a   :  { %v4915_v20 = vpop.eup %4633  ;;  %v236_v33 = vor.u32 1.1754944e-38, %v235_v28  ;;  %vm234_vm9 = vcmp.eq.f32.partialorder %v233_v29, 8.507059e+37 }
 0x38b   :  { %v671_v21 = vsel %vm65_vm0, %v4915_v20, 0.0 }
 0x38c   :  { %672 = vadd.xlane.f32.xlu2 %v671_v21 }
 0x38e   :  { %v4636_v22 = vpop.eup %4635 }
 0x38f   :  { %v225_v23 = vmul.f32 %v4636_v22, %v208_v19  ;;  %vm230_vm6 = vweird.f32 %v4636_v22 }
 0x390   :  { %v4919_v24 = vpop.f32.mrf.mxu2  ;;  %vm231_vm8 = vmor %vm229_vm7, %vm230_vm6 }
 0x391   :  { %v226_v25 = vsub.f32 1.0, %v225_v23  ;;  %v533_v23 = vor.u32 1.1754944e-38, %v532_v10 }
 0x393   :  { %v227_v26 = vmul.f32 %v4636_v22, %v226_v25 }
 0x395   :  { %v228_v27 = vadd.f32 %v4636_v22, %v227_v26 }
 0x397   :  { %v232_v31 = vsel %vm231_vm8, %v4636_v22, %v228_v27 }
 0x398   :  { %v344_v30 = vpop.f32.mrf.mxu2  ;;  %v237_v34 = vsel %vm234_vm9, %v236_v33, %v232_v31 }
 0x399   :  { %v350_v32 = vsel %vm65_vm0, %v344_v30, -inf  ;;  %v238_v36 = vmul.f32 %v4630_v3, %v237_v34 }
 0x39a   :  { %351 = vmax.xlane.f32.xlu2 %v350_v32 }
 0x39f   :  { %v266_v35 = vpop.permute.xlu1 %265 }
 0x3a0   :  { %286 = vmatpush.msra.mxu3 %v266_v35  ;;  %v500_v37 = vpop.f32.mrf.mxu2 }
 0x3a1   :  { %4134 = vmatmul.msk.f32.vlgmr.msra.gmra.mxu3 %vm65_vm0, %v238_v36  ;;  %v506_v38 = vsel %vm65_vm0, %v500_v37, -inf }
 0x3a2   :  { %507 = vmax.xlane.f32.xlu0 %v506_v38 }
 0x3a8   :  { %v656_v39 = vpop.f32.mrf.mxu2 }
 0x3a9   :  { %v662_v40 = vsel %vm65_vm0, %v656_v39, -inf }
 0x3aa   :  { %663 = vmax.xlane.f32.xlu2 %v662_v40 }
 0x3b6   :  { %395 = vrot.lane.b32.xlu0 %v4847_v14, %s7569_s21 }
 0x3c2   :  { %551 = vrot.lane.b32.xlu2 %v4847_v14, %s7577_s22 }
 0x3c4   :  { %v361_v43 = vpop.xlane.xlu0 %360 }
 0x3c5   :  { %4637 = vrcp.f32 %v361_v43  ;;  %v376_v63 = vand.u32 2147483648, %v361_v43  ;;  %vm370_vm11 = vweird.f32 %v361_v43  ;;  %v374_v1 = vand.u32 2147483647, %v361_v43 }
 0x3c6   :  { %4639 = vrcp.f32 %v517_v41 }
 0x3c7   :  { %v377_v6 = vor.u32 1.1754944e-38, %v376_v63  ;;  %vm375_vm13 = vcmp.eq.f32.partialorder %v374_v1, 8.507059e+37 }
 0x3cb   :  { %v4638_v47 = vpop.eup %4637 }
 0x3cc   :  { %v366_v49 = vmul.f32 %v4638_v47, %v361_v43  ;;  %v4640_v53 = vpop.eup %4639  ;;  %vm371_vm10 = vweird.f32 %v4638_v47 }
 0x3cd   :  { %v522_v57 = vmul.f32 %v4640_v53, %v517_v41  ;;  %vm372_vm12 = vmor %vm370_vm11, %vm371_vm10  ;;  %vm527_vm14 = vweird.f32 %v4640_v53 }
 0x3ce   :  { %v367_v51 = vsub.f32 1.0, %v366_v49  ;;  %vm528_vm2 = vmor %vm526_vm15, %vm527_vm14 }
 0x3cf   :  { %v523_v60 = vsub.f32 1.0, %v522_v57 }
 0x3d0   :  { %v368_v58 = vmul.f32 %v4638_v47, %v367_v51 }
 0x3d1   :  { %v524_v4 = vmul.f32 %v4640_v53, %v523_v60 }
 0x3d2   :  { %v369_v61 = vadd.f32 %v4638_v47, %v368_v58 }
 0x3d3   :  { %v525_v8 = vadd.f32 %v4640_v53, %v524_v4 }
 0x3d4   :  { %v373_v5 = vsel %vm372_vm12, %v4638_v47, %v369_v61 }
 0x3d5   :  { %v378_v7 = vsel %vm375_vm13, %v377_v6, %v373_v5  ;;  %v529_v21 = vsel %vm528_vm2, %v4640_v53, %v525_v8 }
 0x3d6   :  { %v379_v18 = vmul.f32 %v4911_v12, %v378_v7  ;;  %v534_v25 = vsel %vm531_vm3, %v533_v23, %v529_v21  ;;  %v794_v21 = vld [vmem:[%s7552_s5 + $0x18] sm:$0xff] }
 0x3d7   :  { %v535_v26 = vmul.f32 %v4894_v44, %v534_v25  ;;  %813 = vmatpush.msra.mxu0 %v794_v21 }
 0x3ff   :  { %v4929_v42 = vpop.xlane.xlu2 %672 }
 0x400   :  { %vm682_vm9 = vweird.f32 %v4929_v42 }
 0x40d   :  { %v352_v45 = vpop.xlane.xlu2 %351 }
 0x40e   :  { %v354_v46 = vsub.f32 %v344_v30, %v352_v45  ;;  %v688_v45 = vand.u32 2147483648, %v4929_v42 }
 0x410   :  { %v357_v48 = vmul.f32 1.442695, %v354_v46 }
 0x412   :  { %4641 = vpow2.f32 %v357_v48  ;;  %v686_v48 = vand.u32 2147483647, %v4929_v42 }
 0x414   :  { %vm687_vm13 = vcmp.eq.f32.partialorder %v686_v48, 8.507059e+37 }
 0x415   :  { %v508_v50 = vpop.xlane.xlu0 %507 }
 0x416   :  { %v510_v52 = vsub.f32 %v500_v37, %v508_v50 }
 0x418   :  { %v4931_v54 = vpop.eup %4641  ;;  %v513_v55 = vmul.f32 1.442695, %v510_v52 }
 0x419   :  { %v362_v56 = vsel %vm65_vm0, %v4931_v54, 0.0 }
 0x41a   :  { %4643 = vpow2.f32 %v513_v55  ;;  %363 = vadd.xlane.f32.xlu0 %v362_v56 }
 0x41d   :  { %v664_v59 = vpop.xlane.xlu2 %663 }
 0x41e   :  { %v666_v62 = vsub.f32 %v656_v39, %v664_v59 }
 0x420   :  { %v4935_v0 = vpop.eup %4643  ;;  %v669_v2 = vmul.f32 1.442695, %v666_v62 }
 0x421   :  { %v518_v3 = vsel %vm65_vm0, %v4935_v0, 0.0 }
 0x422   :  { %4645 = vpow2.f32 %v669_v2  ;;  %519 = vadd.xlane.f32.xlu2 %v518_v3 }
 0x423   :  { %4647 = vrcp.f32 %v4929_v42 }
 0x424   :  { %v4968_v60 = vpop.f32.mrf.mxu3 }
 0x425   :  { %v552_v22 = vpop.permute.xlu2 %551 }
 0x428   :  { %v4939_v13 = vpop.eup %4645  ;;  %v396_v17 = vpop.permute.xlu0 %395 }
 0x429   :  { %416 = vmatpush.msrb.mxu3 %v396_v17  ;;  %v674_v19 = vsel %vm65_vm0, %v4939_v13, 0.0  ;;  %v4648_v27 = vpop.eup %4647 }
 0x42a   :  { %4139 = vmatmul.msk.f32.vlgmr.msrb.gmra.mxu3 %vm65_vm0, %v379_v18  ;;  %675 = vadd.xlane.f32.xlu1 %v674_v19  ;;  %v678_v28 = vmul.f32 %v4648_v27, %v4929_v42  ;;  %vm683_vm8 = vweird.f32 %v4648_v27 }
 0x42b   :  { %572 = vmatpush.msra.mxu3 %v552_v22  ;;  %vm4961_vm10 = vmor %vm682_vm9, %vm683_vm8  ;;  %v793_v22 = vld [vmem:[%s7552_s5 + $0x10] sm:$0xff] }
 0x42c   :  { %v679_v31 = vsub.f32 1.0, %v678_v28  ;;  %814 = vmatpush.msra.mxu0 %v793_v22 }
 0x42e   :  { %421 = vrot.lane.b32.xlu0 %v4853_v16, %s7569_s21  ;;  %v680_v35 = vmul.f32 %v4648_v27, %v679_v31 }
 0x430   :  { %v681_v41 = vadd.f32 %v4648_v27, %v680_v35 }
 0x432   :  { %4145 = vmatmul.msk.f32.vlgmr.msra.gmra.mxu3 %vm65_vm0, %v535_v26  ;;  %v685_v55 = vsel %vm4961_vm10, %v4648_v27, %v681_v41  ;;  %v791_v27 = vld [vmem:[%s7552_s5] sm:$0xff] }
 0x436   :  { %707 = vrot.lane.b32.xlu0 %v4847_v14, %s7566_s23 }
 0x43a   :  { %577 = vrot.lane.b32.xlu2 %v4853_v16, %s7577_s22 }
 0x43e   :  { %733 = vrot.lane.b32.xlu0 %v4853_v16, %s7566_s23 }
 0x48d   :  { %v364_v12 = vpop.xlane.xlu0 %363 }
 0x48e   :  { %4649 = vrcp.f32 %v364_v12  ;;  %v391_v14 = vand.u32 2147483648, %v364_v12  ;;  %v389_v34 = vand.u32 2147483647, %v364_v12  ;;  %vm385_vm5 = vweird.f32 %v364_v12 }
 0x490   :  { %v392_v37 = vor.u32 1.1754944e-38, %v391_v14  ;;  %vm390_vm7 = vcmp.eq.f32.partialorder %v389_v34, 8.507059e+37 }
 0x494   :  { %v4650_v44 = vpop.eup %4649 }
 0x495   :  { %v381_v29 = vmul.f32 %v4650_v44, %v364_v12  ;;  %v520_v30 = vpop.xlane.xlu2 %519  ;;  %vm386_vm4 = vweird.f32 %v4650_v44 }
 0x496   :  { %4651 = vrcp.f32 %v520_v30  ;;  %vm387_vm6 = vmor %vm385_vm5, %vm386_vm4  ;;  %v547_v49 = vand.u32 2147483648, %v520_v30  ;;  %v545_v53 = vand.u32 2147483647, %v520_v30  ;;  %vm541_vm12 = vweird.f32 %v520_v30 }
 0x497   :  { %v382_v32 = vsub.f32 1.0, %v381_v29 }
 0x498   :  { %v548_v58 = vor.u32 1.1754944e-38, %v547_v49  ;;  %vm546_vm15 = vcmp.eq.f32.partialorder %v545_v53, 8.507059e+37 }
 0x499   :  { %v383_v33 = vmul.f32 %v4650_v44, %v382_v32 }
 0x49b   :  { %v384_v36 = vadd.f32 %v4650_v44, %v383_v33 }
 0x49c   :  { %v4652_v16 = vpop.eup %4651 }
 0x49d   :  { %v388_v38 = vsel %vm387_vm6, %v4650_v44, %v384_v36  ;;  %v537_v39 = vmul.f32 %v4652_v16, %v520_v30  ;;  %v676_v40 = vpop.xlane.xlu1 %675  ;;  %vm542_vm11 = vweird.f32 %v4652_v16  ;;  %v578_v56 = vpop.permute.xlu2 %577  ;;  %vm785_vm6 = vcmask 130048  }
 0x49e   :  { %v393_v43 = vsel %vm390_vm7, %v392_v37, %v388_v38  ;;  %4653 = vrcp.f32 %v676_v40  ;;  %vm543_vm14 = vmor %vm541_vm12, %vm542_vm11  ;;  %v703_v3 = vand.u32 2147483648, %v676_v40  ;;  %v701_v7 = vand.u32 2147483647, %v676_v40 }
 0x49f   :  { %v538_v46 = vsub.f32 1.0, %v537_v39  ;;  %v394_v47 = vmul.f32 %v4931_v54, %v393_v43  ;;  %v689_v54 = vor.u32 1.1754944e-38, %v688_v45  ;;  %vm697_vm3 = vweird.f32 %v676_v40 }
 0x4a0   :  { %v422_v50 = vpop.permute.xlu0 %421  ;;  %v704_v10 = vor.u32 1.1754944e-38, %v703_v3  ;;  %vm702_vm5 = vcmp.eq.f32.partialorder %v701_v7, 8.507059e+37  ;;  %vm788_vm7 = vcmask 195584   ;;  %v928_v3 = vld [vmem:[%s7556_s9 + $0x108] sm:$0xff] }
 0x4a1   :  { %v539_v52 = vmul.f32 %v4652_v16, %v538_v46  ;;  %442 = vmatpush.msra.mxu1 %v422_v50  ;;  %v690_v59 = vsel %vm687_vm13, %v689_v54, %v685_v55  ;;  %v912_v7 = vld [vmem:[%s7556_s9 + $0x88] sm:$0xff] }
 0x4a2   :  { %4140 = vmatmul.msk.f32.vlgmr.msra.gmra.mxu1 %vm65_vm0, %v394_v47  ;;  %v691_v5 = vmul.f32 %v4915_v20, %v690_v59  ;;  %v4719_v47 = vmov 32.0  }
 0x4a3   :  { %v540_v57 = vadd.f32 %v4652_v16, %v539_v52  ;;  %598 = vmatpush.msrb.mxu1 %v578_v56  ;;  %4655 = vrcp.f32 %v4719_v47 }
 0x4a4   :  { %v4654_v42 = vpop.eup %4653 }
 0x4a5   :  { %v544_v61 = vsel %vm543_vm14, %v4652_v16, %v540_v57  ;;  %v693_v62 = vmul.f32 %v4654_v42, %v676_v40  ;;  %vm698_vm2 = vweird.f32 %v4654_v42 }
 0x4a6   :  { %v549_v63 = vsel %vm546_vm15, %v548_v58, %v544_v61  ;;  %vm699_vm4 = vmor %vm697_vm3, %vm698_vm2  ;;  %v943_v61 = vld [vmem:[%s7556_s9 + $0x180] sm:$0xff] }
 0x4a7   :  { %v694_v1 = vsub.f32 1.0, %v693_v62  ;;  %v550_v2 = vmul.f32 %v4935_v0, %v549_v63  ;;  %v944_v62 = vld [vmem:[%s7556_s9 + $0x188] sm:$0xff]  ;;  %v945_v63 = vld [vmem:[%s7556_s9 + $0x190] sm:$0xff]  ;;  %1013 = vmatpush.msra.mxu2 %v943_v61  ;;  %v919_v61 = vld [vmem:[%s7556_s9 + $0xc0] sm:$0xff] }
 0x4a8   :  { %v708_v4 = vpop.permute.xlu0 %707 }
 0x4a9   :  { %v695_v6 = vmul.f32 %v4654_v42, %v694_v1  ;;  %728 = vmatpush.msrb.mxu3 %v708_v4  ;;  %v4656_v48 = vpop.eup %4655  ;;  %v946_v1 = vld [vmem:[%s7556_s9 + $0x198] sm:$0xff]  ;;  %v929_v4 = vld [vmem:[%s7556_s9 + $0x110] sm:$0xff] }
 0x4aa   :  { %4146 = vmatmul.msk.f32.vlgmr.msrb.gmra.mxu1 %vm65_vm0, %v550_v2  ;;  %4151 = vmatmul.msk.f32.vlgmr.msrb.gmra.mxu3 %vm65_vm0, %v691_v5  ;;  %v841_v49 = vmul.f32 32.0, %v4656_v48  ;;  %vm845_vm8 = vweird.f32 %v4656_v48  ;;  %v927_v2 = vld [vmem:[%s7556_s9 + $0x100] sm:$0xff]  ;;  %v930_v5 = vld [vmem:[%s7556_s9 + $0x118] sm:$0xff] }
 0x4ab   :  { %v696_v8 = vadd.f32 %v4654_v42, %v695_v6  ;;  %1036 = vmatpush.msra.mxu3 %v944_v62  ;;  %1014 = vmatpush.msra.mxu2 %v927_v2  ;;  %v911_v6 = vld [vmem:[%s7556_s9 + $0x80] sm:$0xff]  ;;  %v920_v62 = vld [vmem:[%s7556_s9 + $0xc8] sm:$0xff] }
 0x4ac   :  { %v842_v50 = vsub.f32 1.0, %v841_v49 }
 0x4ad   :  { %v700_v15 = vsel %vm699_vm4, %v4654_v42, %v696_v8  ;;  %v418_v17 = vpop.f32.mrf.mxu3  ;;  %1037 = vmatpush.msra.mxu3 %v928_v3  ;;  %v913_v8 = vld [vmem:[%s7556_s9 + $0x90] sm:$0xff]  ;;  %1015 = vmatpush.msra.mxu2 %v911_v6  ;;  %v903_v3 = vld [vmem:[%s7556_s9 + $0x40] sm:$0xff]  ;;  %v906_v6 = vld [vmem:[%s7556_s9 + $0x58] sm:$0xff] }
 0x4ae   :  { %v705_v0 = vsel %vm702_vm5, %v704_v10, %v700_v15  ;;  %761 = vrot.lane.b32.xlu2 %v418_v17, %s7575_s24  ;;  %v843_v51 = vmul.f32 %v4656_v48, %v842_v50  ;;  %v914_v10 = vld [vmem:[%s7556_s9 + $0x98] sm:$0xff]  ;;  %v895_v15 = vld [vmem:[%s7556_s9] sm:$0xff]  ;;  %v896_v17 = vld [vmem:[%s7556_s9 + $0x8] sm:$0xff] }
 0x4af   :  { %v706_v20 = vmul.f32 %v4939_v13, %v705_v0  ;;  %v792_v13 = vld [vmem:[%s7552_s5 + $0x8] sm:$0xff]  ;;  %1038 = vmatpush.msra.mxu3 %v912_v7  ;;  %v897_v0 = vld [vmem:[%s7556_s9 + $0x10] sm:$0xff]  ;;  %1016 = vmatpush.msra.mxu2 %v895_v15 }
 0x4b0   :  { %v734_v18 = vpop.permute.xlu0 %733  ;;  %815 = vmatpush.msra.mxu0 %v792_v13  ;;  %v844_v52 = vadd.f32 %v4656_v48, %v843_v51 }
 0x4b1   :  { %754 = vmatpush.msra.mxu1 %v734_v18  ;;  %1039 = vmatpush.msra.mxu3 %v896_v17 }
 0x4b2   :  { %4152 = vmatmul.msk.f32.vlgmr.msra.gmra.mxu1 %vm65_vm0, %v706_v20  ;;  %816 = vmatpush.msra.mxu0 %v791_v27  ;;  %v898_v20 = vld [vmem:[%s7556_s9 + $0x18] sm:$0xff]  ;;  %v949_v27 = vld [vmem:[%s7556_s9 + $0x1b0] sm:$0xff] }
 0x4b3   :  { %1059 = vmatpush.msrb.mxu1 %v945_v63  ;;  %v921_v63 = vld [vmem:[%s7556_s9 + $0xd0] sm:$0xff] }
 0x4b4   :  { %1082 = vmatpush.msrb.mxu0 %v946_v1  ;;  %v922_v1 = vld [vmem:[%s7556_s9 + $0xd8] sm:$0xff] }
 0x4b5   :  { %v574_v19 = vpop.f32.mrf.mxu3  ;;  %1060 = vmatpush.msrb.mxu1 %v929_v4  ;;  %v904_v4 = vld [vmem:[%s7556_s9 + $0x48] sm:$0xff] }
 0x4b6   :  { %769 = vrot.lane.b32.xlu0 %v574_v19, %s7573_s25  ;;  %1083 = vmatpush.msrb.mxu0 %v930_v5  ;;  %v905_v5 = vld [vmem:[%s7556_s9 + $0x50] sm:$0xff] }
 0x4b7   :  { %1061 = vmatpush.msrb.mxu1 %v913_v8 }
 0x4b8   :  { %1084 = vmatpush.msrb.mxu0 %v914_v10 }
 0x4b9   :  { %1062 = vmatpush.msrb.mxu1 %v897_v0  ;;  %v956_v0 = vld [vmem:[%s7556_s9 + $0x1e8] sm:$0xff] }
 0x4ba   :  { %1085 = vmatpush.msrb.mxu0 %v898_v20  ;;  %v957_v20 = vld [vmem:[%s7556_s9 + $0x1f0] sm:$0xff] }
 0x4bb   :  { %1151 = vmatpush.msra.mxu1 %v949_v27  ;;  %v907_v27 = vld [vmem:[%s7556_s9 + $0x60] sm:$0xff] }
 0x508   :  { %v762_v28 = vpop.permute.xlu2 %761 }
 0x509   :  { %v783_v29 = vsel %vm65_vm0, %v4919_v24, %v762_v28  ;;  %v4609_v24 = vld [vmem:[%s7553_s6] ss:$0 sm:$0xff] }
 0x51f   :  { %v444_v23 = vpop.f32.mrf.mxu1 }
 0x520   :  { %763 = vrot.lane.b32.xlu0 %v444_v23, %s7575_s24 }
 0x527   :  { %v600_v25 = vpop.f32.mrf.mxu1 }
 0x528   :  { %771 = vrot.lane.b32.xlu1 %v600_v25, %s7573_s25  ;;  %v770_v44 = vpop.permute.xlu0 %769 }
 0x529   :  { %v786_v30 = vsel %vm785_vm6, %v783_v29, %v770_v44  ;;  %v950_v44 = vld [vmem:[%s7556_s9 + $0x1b8] sm:$0xff]  ;;  %v931_v29 = vld [vmem:[%s7556_s9 + $0x120] sm:$0xff] }
 0x52d   :  { %v730_v26 = vpop.f32.mrf.mxu3 }
 0x52e   :  { %777 = vrot.lane.b32.xlu2 %v730_v26, %s7571_s26  ;;  %v947_v26 = vld [vmem:[%s7556_s9 + $0x1a0] sm:$0xff] }
 0x52f   :  { %v756_v12 = vpop.f32.mrf.mxu1  ;;  %1105 = vmatpush.msrb.mxu2 %v947_v26  ;;  %v925_v26 = vld [vmem:[%s7556_s9 + $0xf0] sm:$0xff] }
 0x531   :  { %1106 = vmatpush.msrb.mxu2 %v931_v29  ;;  %v910_v29 = vld [vmem:[%s7556_s9 + $0x78] sm:$0xff] }
 0x536   :  { %779 = vrot.lane.b32.xlu2 %v756_v12, %s7571_s26  ;;  %v948_v12 = vld [vmem:[%s7556_s9 + $0x1a8] sm:$0xff] }
 0x537   :  { %1128 = vmatpush.msrb.mxu3 %v948_v12  ;;  %v926_v12 = vld [vmem:[%s7556_s9 + $0xf8] sm:$0xff] }
 0x588   :  { %v778_v31 = vpop.permute.xlu2 %777 }
 0x589   :  { %v789_v32 = vsel %vm788_vm7, %v786_v30, %v778_v31  ;;  %v932_v30 = vld [vmem:[%s7556_s9 + $0x128] sm:$0xff]  ;;  %v5095_v31 = vld [vmem:[%s7554_s7] ss:$0 sm:$0xff] }
 0x58a   :  { %4153 = vmatmul.msk.f32.vlgmr.msra.gmra.mxu0 %vm103_vm1, %v789_v32  ;;  %1129 = vmatpush.msrb.mxu3 %v932_v30  ;;  %v1448_v30 = vld [vmem:[%s7557_s11 + $0x178] sm:$0xff] }
 0x58b   :  { %1174 = vmatpush.msra.mxu0 %v950_v44  ;;  %v909_v44 = vld [vmem:[%s7556_s9 + $0x70] sm:$0xff] }
 0x590   :  { %v780_v35 = vpop.permute.xlu2 %779 }
 0x592   :  { %v764_v14 = vpop.permute.xlu0 %763 }
 0x593   :  { %v784_v33 = vsel %vm65_vm0, %v4968_v60, %v764_v14  ;;  %v933_v14 = vld [vmem:[%s7556_s9 + $0x130] sm:$0xff] }
 0x594   :  { %1152 = vmatpush.msra.mxu1 %v933_v14  ;;  %v1432_v14 = vld [vmem:[%s7557_s11 + $0xf8] sm:$0xff] }
 0x59a   :  { %v772_v34 = vpop.permute.xlu1 %771 }
 0x59b   :  { %v787_v36 = vsel %vm785_vm6, %v784_v33, %v772_v34  ;;  %v934_v33 = vld [vmem:[%s7556_s9 + $0x138] sm:$0xff]  ;;  %v915_v34 = vld [vmem:[%s7556_s9 + $0xa0] sm:$0xff] }
 0x59c   :  { %v790_v16 = vsel %vm788_vm7, %v787_v36, %v780_v35  ;;  %1175 = vmatpush.msra.mxu0 %v934_v33  ;;  %1107 = vmatpush.msrb.mxu2 %v915_v34  ;;  %v1447_v33 = vld [vmem:[%s7557_s11 + $0x170] sm:$0xff] }
 0x59d   :  { %4154 = vmatmul.msk.f32.gmra.mxu0 %vm103_vm1, %v790_v16  ;;  %v916_v16 = vld [vmem:[%s7556_s9 + $0xa8] sm:$0xff]  ;;  %v1463_v34 = vld [vmem:[%s7557_s11 + $0x1f0] sm:$0xff] }
 0x59e   :  { %1130 = vmatpush.msrb.mxu3 %v916_v16  ;;  %v1446_v16 = vld [vmem:[%s7557_s11 + $0x168] sm:$0xff] }
 0x607   :  { %v818_v37 = vpop.f32.mrf.mxu0 }
 0x608   :  { %v824_v38 = vadd.f32 %v818_v37, %v4836_v9  ;;  %v5011_v9 = vsel %vm845_vm8, %v4656_v48, %v844_v52  ;;  %v918_v37 = vld [vmem:[%s7556_s9 + $0xb8] sm:$0xff] }
 0x609   :  { %1176 = vmatpush.msra.mxu0 %v918_v37  ;;  %v1414_v37 = vld [vmem:[%s7557_s11 + $0x68] sm:$0xff] }
 0x60a   :  { %v830_v39 = vadd.f32 %v4609_v24, %v824_v38  ;;  %v899_v38 = vld [vmem:[%s7556_s9 + $0x20] sm:$0xff] }
 0x60b   :  { %1108 = vmatpush.msrb.mxu2 %v899_v38  ;;  %v1430_v38 = vld [vmem:[%s7557_s11 + $0xe8] sm:$0xff] }
 0x60c   :  { %v834_v40 = vsel %vm103_vm1, %v830_v39, 0.0 }
 0x60d   :  { %835 = vadd.xlane.f32.xlu0 %v834_v40 }
 0x61a   :  { %v821_v41 = vpop.f32.mrf.mxu0 }
 0x61b   :  { %v825_v43 = vadd.f32 %v821_v41, %v4840_v11 }
 0x61d   :  { %v831_v45 = vadd.f32 %v4609_v24, %v825_v43  ;;  %v917_v24 = vld [vmem:[%s7556_s9 + $0xb0] sm:$0xff] }
 0x61e   :  { %v901_v43 = vld [vmem:[%s7556_s9 + $0x30] sm:$0xff]  ;;  %1153 = vmatpush.msra.mxu1 %v917_v24  ;;  %v1462_v24 = vld [vmem:[%s7557_s11 + $0x1e8] sm:$0xff] }
 0x61f   :  { %v837_v46 = vsel %vm103_vm1, %v831_v45, 0.0 }
 0x620   :  { %838 = vadd.xlane.f32.xlu2 %v837_v46  ;;  %v4611_v46 = vld [vmem:[%s7555_s8] ss:$0 sm:$0xff]  ;;  %1154 = vmatpush.msra.mxu1 %v901_v43 }
 0x621   :  { %v1429_v43 = vld [vmem:[%s7557_s11 + $0xe0] sm:$0xff] }
 0x680   :  { %v836_v53 = vpop.xlane.xlu0 %835 }
 0x681   :  { %v847_v55 = vmul.f32 %v5011_v9, %v836_v53  ;;  %v951_v53 = vld [vmem:[%s7556_s9 + $0x1c0] sm:$0xff] }
 0x683   :  { %v5014_v56 = vsub.f32 %v830_v39, %v847_v55  ;;  %v900_v39 = vld [vmem:[%s7556_s9 + $0x28] sm:$0xff] }
 0x684   :  { %1131 = vmatpush.msrb.mxu3 %v900_v39  ;;  %v952_v55 = vld [vmem:[%s7556_s9 + $0x1c8] sm:$0xff]  ;;  %v1445_v39 = vld [vmem:[%s7557_s11 + $0x160] sm:$0xff] }
 0x685   :  { %v851_v11 = vmul.f32 %v5014_v56, %v5014_v56 }
 0x687   :  { %v853_v54 = vsel %vm103_vm1, %v851_v11, 0.0  ;;  %v954_v11 = vld [vmem:[%s7556_s9 + $0x1d8] sm:$0xff] }
 0x688   :  { %854 = vadd.xlane.f32.xlu1 %v853_v54  ;;  %v935_v54 = vld [vmem:[%s7556_s9 + $0x140] sm:$0xff] }
 0x693   :  { %v839_v57 = vpop.xlane.xlu2 %838 }
 0x694   :  { %v848_v42 = vmul.f32 %v5011_v9, %v839_v57  ;;  %v936_v57 = vld [vmem:[%s7556_s9 + $0x148] sm:$0xff] }
 0x696   :  { %v5020_v58 = vsub.f32 %v831_v45, %v848_v42  ;;  %v902_v45 = vld [vmem:[%s7556_s9 + $0x38] sm:$0xff] }
 0x697   :  { %1177 = vmatpush.msra.mxu0 %v902_v45  ;;  %v1444_v45 = vld [vmem:[%s7557_s11 + $0x158] sm:$0xff] }
 0x698   :  { %v852_v59 = vmul.f32 %v5020_v58, %v5020_v58 }
 0x69a   :  { %v856_v60 = vsel %vm103_vm1, %v852_v59, 0.0  ;;  %v937_v59 = vld [vmem:[%s7556_s9 + $0x150] sm:$0xff] }
 0x69b   :  { %857 = vadd.xlane.f32.xlu0 %v856_v60  ;;  %v938_v60 = vld [vmem:[%s7556_s9 + $0x158] sm:$0xff] }
 0x6fb   :  { %v855_v18 = vpop.xlane.xlu1 %854 }
 0x6fc   :  { %v859_v19 = vmul.f32 %v855_v18, %v5011_v9  ;;  %v958_v18 = vld [vmem:[%s7556_s9 + $0x1f8] sm:$0xff] }
 0x6fe   :  { %v861_v21 = vadd.f32 1e-05, %v859_v19  ;;  %v939_v19 = vld [vmem:[%s7556_s9 + $0x160] sm:$0xff] }
 0x700   :  { %4657 = vrsqrt.f32 %v861_v21  ;;  %vm869_vm10 = vweird.f32 %v861_v21 }
 0x706   :  { %v4658_v22 = vpop.eup %4657 }
 0x707   :  { %v864_v13 = vmul.f32 %v4658_v22, %v861_v21  ;;  %vm870_vm9 = vweird.f32 %v4658_v22  ;;  %v940_v21 = vld [vmem:[%s7556_s9 + $0x168] sm:$0xff] }
 0x708   :  { %vm871_vm11 = vmor %vm869_vm10, %vm870_vm9 }
 0x709   :  { %v865_v23 = vmul.f32 %v4658_v22, %v864_v13  ;;  %v942_v13 = vld [vmem:[%s7556_s9 + $0x178] sm:$0xff] }
 0x70b   :  { %v866_v25 = vmul.f32 0.5, %v865_v23  ;;  %v923_v23 = vld [vmem:[%s7556_s9 + $0xe0] sm:$0xff] }
 0x70d   :  { %v867_v28 = vsub.f32 1.5, %v866_v25  ;;  %v924_v25 = vld [vmem:[%s7556_s9 + $0xe8] sm:$0xff] }
 0x70e   :  { %v858_v32 = vpop.xlane.xlu0 %857 }
 0x70f   :  { %v868_v35 = vmul.f32 %v4658_v22, %v867_v28  ;;  %v860_v36 = vmul.f32 %v858_v32, %v5011_v9  ;;  %v908_v28 = vld [vmem:[%s7556_s9 + $0x68] sm:$0xff]  ;;  %v1416_v32 = vld [vmem:[%s7557_s11 + $0x78] sm:$0xff] }
 0x711   :  { %v872_v40 = vsel %vm871_vm11, %v4658_v22, %v868_v35  ;;  %v862_v41 = vadd.f32 1e-05, %v860_v36  ;;  %v941_v22 = vld [vmem:[%s7556_s9 + $0x170] sm:$0xff] }
 0x712   :  { %v883_v47 = vmul.f32 %v872_v40, %v5014_v56  ;;  %v953_v56 = vld [vmem:[%s7556_s9 + $0x1d0] sm:$0xff]  ;;  %v1461_v40 = vld [vmem:[%s7557_s11 + $0x1e0] sm:$0xff] }
 0x713   :  { %4659 = vrsqrt.f32 %v862_v41  ;;  %vm879_vm13 = vweird.f32 %v862_v41  ;;  %v1415_v35 = vld [vmem:[%s7557_s11 + $0x70] sm:$0xff] }
 0x714   :  { %v888_v48 = vmul.f32 %v5095_v31, %v883_v47  ;;  %v1431_v36 = vld [vmem:[%s7557_s11 + $0xf0] sm:$0xff]  ;;  %v1412_v47 = vld [vmem:[%s7557_s11 + $0x58] sm:$0xff] }
 0x716   :  { %v5134_v49 = vadd.f32 %v4611_v46, %v888_v48  ;;  %v1428_v48 = vld [vmem:[%s7557_s11 + $0xd8] sm:$0xff] }
 0x718   :  { %4155 = vmatmul.msk.f32.vlgmr.msra.gmra.mxu2 %vm103_vm1, %v5134_v49  ;;  %4157 = vmatmul.msk.f32.vlgmr.msra.gmra.mxu3 %vm103_vm1, %v5134_v49 }
 0x719   :  { %v4660_v50 = vpop.eup %4659  ;;  %4159 = vmatmul.msk.f32.vlgmr.msrb.gmra.mxu1 %vm103_vm1, %v5134_v49  ;;  %4161 = vmatmul.msk.f32.vlgmr.msrb.gmra.mxu0 %vm103_vm1, %v5134_v49 }
 0x71a   :  { %v874_v51 = vmul.f32 %v4660_v50, %v862_v41  ;;  %1197 = vmatpush.msra.mxu2 %v951_v53  ;;  %1220 = vmatpush.msra.mxu3 %v952_v55  ;;  %vm880_vm12 = vweird.f32 %v4660_v50  ;;  %v1413_v41 = vld [vmem:[%s7557_s11 + $0x60] sm:$0xff]  ;;  %v1427_v53 = vld [vmem:[%s7557_s11 + $0xd0] sm:$0xff]  ;;  %v1442_v55 = vld [vmem:[%s7557_s11 + $0x148] sm:$0xff] }
 0x71b   :  { %1243 = vmatpush.msrb.mxu1 %v953_v56  ;;  %1266 = vmatpush.msrb.mxu0 %v954_v11  ;;  %vm881_vm14 = vmor %vm879_vm13, %vm880_vm12  ;;  %v1458_v56 = vld [vmem:[%s7557_s11 + $0x1c8] sm:$0xff] }
 0x71c   :  { %v875_v52 = vmul.f32 %v4660_v50, %v874_v51  ;;  %1198 = vmatpush.msra.mxu2 %v935_v54  ;;  %1221 = vmatpush.msra.mxu3 %v936_v57  ;;  %v1459_v51 = vld [vmem:[%s7557_s11 + $0x1d0] sm:$0xff]  ;;  %v1410_v11 = vld [vmem:[%s7557_s11 + $0x48] sm:$0xff]  ;;  %v1441_v57 = vld [vmem:[%s7557_s11 + $0x140] sm:$0xff] }
 0x71d   :  { %1244 = vmatpush.msrb.mxu1 %v937_v59  ;;  %1267 = vmatpush.msrb.mxu0 %v938_v60  ;;  %v1426_v54 = vld [vmem:[%s7557_s11 + $0xc8] sm:$0xff]  ;;  %v1409_v59 = vld [vmem:[%s7557_s11 + $0x40] sm:$0xff] }
 0x71e   :  { %v876_v42 = vmul.f32 0.5, %v875_v52  ;;  %1199 = vmatpush.msra.mxu2 %v919_v61  ;;  %1222 = vmatpush.msra.mxu3 %v920_v62  ;;  %v1411_v52 = vld [vmem:[%s7557_s11 + $0x50] sm:$0xff]  ;;  %v1425_v60 = vld [vmem:[%s7557_s11 + $0xc0] sm:$0xff]  ;;  %v1440_v61 = vld [vmem:[%s7557_s11 + $0x138] sm:$0xff] }
 0x71f   :  { %1245 = vmatpush.msrb.mxu1 %v921_v63  ;;  %1268 = vmatpush.msrb.mxu0 %v922_v1  ;;  %v1456_v62 = vld [vmem:[%s7557_s11 + $0x1b8] sm:$0xff] }
 0x720   :  { %v877_v2 = vsub.f32 1.5, %v876_v42  ;;  %1200 = vmatpush.msra.mxu2 %v903_v3  ;;  %1223 = vmatpush.msra.mxu3 %v904_v4  ;;  %v1457_v42 = vld [vmem:[%s7557_s11 + $0x1c0] sm:$0xff]  ;;  %v1408_v63 = vld [vmem:[%s7557_s11 + $0x38] sm:$0xff]  ;;  %v1455_v3 = vld [vmem:[%s7557_s11 + $0x1b0] sm:$0xff] }
 0x721   :  { %1246 = vmatpush.msrb.mxu1 %v905_v5  ;;  %1269 = vmatpush.msrb.mxu0 %v906_v6  ;;  %v1424_v1 = vld [vmem:[%s7557_s11 + $0xb8] sm:$0xff]  ;;  %v1407_v4 = vld [vmem:[%s7557_s11 + $0x30] sm:$0xff]  ;;  %v1438_v6 = vld [vmem:[%s7557_s11 + $0x128] sm:$0xff] }
 0x722   :  { %v878_v7 = vmul.f32 %v4660_v50, %v877_v2  ;;  %v1439_v2 = vld [vmem:[%s7557_s11 + $0x130] sm:$0xff] }
 0x723   :  { %v1423_v5 = vld [vmem:[%s7557_s11 + $0xb0] sm:$0xff] }
 0x724   :  { %v882_v8 = vsel %vm881_vm14, %v4660_v50, %v878_v7  ;;  %v1443_v50 = vld [vmem:[%s7557_s11 + $0x150] sm:$0xff]  ;;  %v1454_v7 = vld [vmem:[%s7557_s11 + $0x1a8] sm:$0xff] }
 0x725   :  { %v884_v10 = vmul.f32 %v882_v8, %v5020_v58  ;;  %v955_v58 = vld [vmem:[%s7556_s9 + $0x1e0] sm:$0xff]  ;;  %v1406_v8 = vld [vmem:[%s7557_s11 + $0x28] sm:$0xff] }
 0x727   :  { %v889_v15 = vmul.f32 %v5095_v31, %v884_v10  ;;  %v1464_v31 = vld [vmem:[%s7557_s11 + $0x1f8] sm:$0xff]  ;;  %v1422_v10 = vld [vmem:[%s7557_s11 + $0xa8] sm:$0xff] }
 0x729   :  { %v5194_v17 = vadd.f32 %v4611_v46, %v889_v15  ;;  %v1460_v46 = vld [vmem:[%s7557_s11 + $0x1d8] sm:$0xff]  ;;  %v1437_v15 = vld [vmem:[%s7557_s11 + $0x120] sm:$0xff] }
 0x72b   :  { %4156 = vmatmul.msk.f32.gmra.mxu2 %vm103_vm1, %v5194_v17  ;;  %4158 = vmatmul.msk.f32.gmra.mxu3 %vm103_vm1, %v5194_v17 }
 0x72c   :  { %4160 = vmatmul.msk.f32.gmra.mxu1 %vm103_vm1, %v5194_v17  ;;  %4162 = vmatmul.msk.f32.gmra.mxu0 %vm103_vm1, %v5194_v17 }
 0x733   :  { %4163 = vmatmul.msk.f32.vlgmr.msrb.gmra.mxu2 %vm103_vm1, %v5134_v49  ;;  %4165 = vmatmul.msk.f32.vlgmr.msrb.gmra.mxu3 %vm103_vm1, %v5134_v49 }
 0x734   :  { %4167 = vmatmul.msk.f32.vlgmr.msra.gmra.mxu1 %vm103_vm1, %v5134_v49  ;;  %4169 = vmatmul.msk.f32.vlgmr.msra.gmra.mxu0 %vm103_vm1, %v5134_v49 }
 0x735   :  { %1289 = vmatpush.msrb.mxu2 %v955_v58  ;;  %1312 = vmatpush.msrb.mxu3 %v956_v0  ;;  %v1453_v58 = vld [vmem:[%s7557_s11 + $0x1a0] sm:$0xff] }
 0x736   :  { %1335 = vmatpush.msra.mxu1 %v957_v20  ;;  %1358 = vmatpush.msra.mxu0 %v958_v18  ;;  %v1405_v0 = vld [vmem:[%s7557_s11 + $0x20] sm:$0xff]  ;;  %v1436_v18 = vld [vmem:[%s7557_s11 + $0x118] sm:$0xff] }
 0x737   :  { %1290 = vmatpush.msrb.mxu2 %v939_v19  ;;  %1313 = vmatpush.msrb.mxu3 %v940_v21  ;;  %v1421_v20 = vld [vmem:[%s7557_s11 + $0xa0] sm:$0xff]  ;;  %v1452_v19 = vld [vmem:[%s7557_s11 + $0x198] sm:$0xff] }
 0x738   :  { %1336 = vmatpush.msra.mxu1 %v941_v22  ;;  %1359 = vmatpush.msra.mxu0 %v942_v13  ;;  %v1404_v21 = vld [vmem:[%s7557_s11 + $0x18] sm:$0xff]  ;;  %v1435_v13 = vld [vmem:[%s7557_s11 + $0x110] sm:$0xff] }
 0x739   :  { %1291 = vmatpush.msrb.mxu2 %v923_v23  ;;  %1314 = vmatpush.msrb.mxu3 %v924_v25  ;;  %v1420_v22 = vld [vmem:[%s7557_s11 + $0x98] sm:$0xff]  ;;  %v1451_v23 = vld [vmem:[%s7557_s11 + $0x190] sm:$0xff] }
 0x73a   :  { %1337 = vmatpush.msra.mxu1 %v925_v26  ;;  %1360 = vmatpush.msra.mxu0 %v926_v12  ;;  %v1403_v25 = vld [vmem:[%s7557_s11 + $0x10] sm:$0xff]  ;;  %v1434_v12 = vld [vmem:[%s7557_s11 + $0x108] sm:$0xff] }
 0x73b   :  { %4164 = vmatmul.msk.f32.gmra.mxu2 %vm103_vm1, %v5194_v17  ;;  %4166 = vmatmul.msk.f32.gmra.mxu3 %vm103_vm1, %v5194_v17  ;;  %v1419_v26 = vld [vmem:[%s7557_s11 + $0x90] sm:$0xff] }
 0x73c   :  { %4168 = vmatmul.msk.f32.gmra.mxu1 %vm103_vm1, %v5194_v17  ;;  %4170 = vmatmul.msk.f32.gmra.mxu0 %vm103_vm1, %v5194_v17 }
 0x73d   :  { %1292 = vmatpush.msrb.mxu2 %v907_v27  ;;  %1315 = vmatpush.msrb.mxu3 %v908_v28  ;;  %v1450_v27 = vld [vmem:[%s7557_s11 + $0x188] sm:$0xff] }
 0x73e   :  { %1338 = vmatpush.msra.mxu1 %v909_v44  ;;  %1361 = vmatpush.msra.mxu0 %v910_v29  ;;  %v1402_v28 = vld [vmem:[%s7557_s11 + $0x8] sm:$0xff]  ;;  %v1433_v29 = vld [vmem:[%s7557_s11 + $0x100] sm:$0xff] }
 0x73f   :  { %v1418_v44 = vld [vmem:[%s7557_s11 + $0x88] sm:$0xff] }
 0x743   :  { %4171 = vmatmul.msk.f32.vlgmr.msra.gmra.mxu2 %vm103_vm1, %v5134_v49  ;;  %4173 = vmatmul.msk.f32.vlgmr.msra.gmra.mxu3 %vm103_vm1, %v5134_v49 }
 0x744   :  { %4175 = vmatmul.msk.f32.vlgmr.msrb.gmra.mxu1 %vm103_vm1, %v5134_v49  ;;  %4177 = vmatmul.msk.f32.vlgmr.msrb.gmra.mxu0 %vm103_vm1, %v5134_v49 }
 0x745   :  { %1707 = vmatpush.msrb.mxu1 %v1448_v30  ;;  %1730 = vmatpush.msrb.mxu0 %v1464_v31  ;;  %v1449_v30 = vld [vmem:[%s7557_s11 + $0x180] sm:$0xff]  ;;  %v1512_v31 = vld [vmem:[%s7557_s11 + $0x378] sm:$0xff] }
 0x746   :  { %1661 = vmatpush.msra.mxu2 %v1416_v32  ;;  %1684 = vmatpush.msra.mxu3 %v1432_v14  ;;  %v1528_v32 = vld [vmem:[%s7557_s11 + $0x3f8] sm:$0xff]  ;;  %v1401_v14 = vld [vmem:[%s7557_s11] sm:$0xff] }
 0x747   :  { %1708 = vmatpush.msrb.mxu1 %v1447_v33  ;;  %1731 = vmatpush.msrb.mxu0 %v1463_v34  ;;  %v1417_v33 = vld [vmem:[%s7557_s11 + $0x80] sm:$0xff]  ;;  %v1511_v34 = vld [vmem:[%s7557_s11 + $0x370] sm:$0xff] }
 0x748   :  { %1662 = vmatpush.msra.mxu2 %v1415_v35  ;;  %1685 = vmatpush.msra.mxu3 %v1431_v36  ;;  %v1527_v35 = vld [vmem:[%s7557_s11 + $0x3f0] sm:$0xff]  ;;  %v1480_v36 = vld [vmem:[%s7557_s11 + $0x278] sm:$0xff] }
 0x749   :  { %1709 = vmatpush.msrb.mxu1 %v1446_v16  ;;  %1732 = vmatpush.msrb.mxu0 %v1462_v24  ;;  %v1496_v16 = vld [vmem:[%s7557_s11 + $0x2f8] sm:$0xff]  ;;  %v1510_v24 = vld [vmem:[%s7557_s11 + $0x368] sm:$0xff] }
 0x74a   :  { %1663 = vmatpush.msra.mxu2 %v1414_v37  ;;  %1686 = vmatpush.msra.mxu3 %v1430_v38  ;;  %v1526_v37 = vld [vmem:[%s7557_s11 + $0x3e8] sm:$0xff]  ;;  %v1479_v38 = vld [vmem:[%s7557_s11 + $0x270] sm:$0xff] }
 0x74b   :  { %4172 = vmatmul.msk.f32.gmra.mxu2 %vm103_vm1, %v5194_v17  ;;  %4174 = vmatmul.msk.f32.gmra.mxu3 %vm103_vm1, %v5194_v17 }
 0x74c   :  { %4176 = vmatmul.msk.f32.gmra.mxu1 %vm103_vm1, %v5194_v17  ;;  %4178 = vmatmul.msk.f32.gmra.mxu0 %vm103_vm1, %v5194_v17 }
 0x74d   :  { %1710 = vmatpush.msrb.mxu1 %v1445_v39  ;;  %1733 = vmatpush.msrb.mxu0 %v1461_v40  ;;  %v1495_v39 = vld [vmem:[%s7557_s11 + $0x2f0] sm:$0xff]  ;;  %v1509_v40 = vld [vmem:[%s7557_s11 + $0x360] sm:$0xff] }
 0x74e   :  { %1664 = vmatpush.msra.mxu2 %v1413_v41  ;;  %1687 = vmatpush.msra.mxu3 %v1429_v43  ;;  %v1525_v41 = vld [vmem:[%s7557_s11 + $0x3e0] sm:$0xff]  ;;  %v1478_v43 = vld [vmem:[%s7557_s11 + $0x268] sm:$0xff] }
 0x74f   :  { %1711 = vmatpush.msrb.mxu1 %v1444_v45  ;;  %1734 = vmatpush.msrb.mxu0 %v1460_v46  ;;  %v1494_v45 = vld [vmem:[%s7557_s11 + $0x2e8] sm:$0xff]  ;;  %v1508_v46 = vld [vmem:[%s7557_s11 + $0x358] sm:$0xff] }
 0x750   :  { %1665 = vmatpush.msra.mxu2 %v1412_v47  ;;  %1688 = vmatpush.msra.mxu3 %v1428_v48  ;;  %v1524_v47 = vld [vmem:[%s7557_s11 + $0x3d8] sm:$0xff]  ;;  %v1477_v48 = vld [vmem:[%s7557_s11 + $0x260] sm:$0xff] }
 0x751   :  { %1712 = vmatpush.msrb.mxu1 %v1443_v50  ;;  %1735 = vmatpush.msrb.mxu0 %v1459_v51  ;;  %v1493_v50 = vld [vmem:[%s7557_s11 + $0x2e0] sm:$0xff]  ;;  %v1507_v51 = vld [vmem:[%s7557_s11 + $0x350] sm:$0xff] }
 0x752   :  { %1666 = vmatpush.msra.mxu2 %v1411_v52  ;;  %1689 = vmatpush.msra.mxu3 %v1427_v53  ;;  %v1523_v52 = vld [vmem:[%s7557_s11 + $0x3d0] sm:$0xff]  ;;  %v1476_v53 = vld [vmem:[%s7557_s11 + $0x258] sm:$0xff] }
 0x753   :  { %4179 = vmatmul.msk.f32.vlgmr.msrb.gmra.mxu2 %vm103_vm1, %v5134_v49  ;;  %4181 = vmatmul.msk.f32.vlgmr.msrb.gmra.mxu3 %vm103_vm1, %v5134_v49 }
 0x754   :  { %4183 = vmatmul.msk.f32.vlgmr.msra.gmra.mxu1 %vm103_vm1, %v5134_v49  ;;  %4185 = vmatmul.msk.f32.vlgmr.msra.gmra.mxu0 %vm103_vm1, %v5134_v49 }
 0x755   :  { %1713 = vmatpush.msrb.mxu1 %v1442_v55  ;;  %1736 = vmatpush.msrb.mxu0 %v1458_v56  ;;  %v1492_v55 = vld [vmem:[%s7557_s11 + $0x2d8] sm:$0xff]  ;;  %v1506_v56 = vld [vmem:[%s7557_s11 + $0x348] sm:$0xff] }
 0x756   :  { %1667 = vmatpush.msra.mxu2 %v1410_v11  ;;  %1690 = vmatpush.msra.mxu3 %v1426_v54  ;;  %v1522_v11 = vld [vmem:[%s7557_s11 + $0x3c8] sm:$0xff]  ;;  %v1475_v54 = vld [vmem:[%s7557_s11 + $0x250] sm:$0xff] }
 0x757   :  { %1714 = vmatpush.msrb.mxu1 %v1441_v57  ;;  %1737 = vmatpush.msrb.mxu0 %v1457_v42  ;;  %v1491_v57 = vld [vmem:[%s7557_s11 + $0x2d0] sm:$0xff]  ;;  %v1505_v42 = vld [vmem:[%s7557_s11 + $0x340] sm:$0xff] }
 0x758   :  { %1668 = vmatpush.msra.mxu2 %v1409_v59  ;;  %1691 = vmatpush.msra.mxu3 %v1425_v60  ;;  %v1521_v59 = vld [vmem:[%s7557_s11 + $0x3c0] sm:$0xff]  ;;  %v1474_v60 = vld [vmem:[%s7557_s11 + $0x248] sm:$0xff] }
 0x759   :  { %1715 = vmatpush.msrb.mxu1 %v1440_v61  ;;  %1738 = vmatpush.msrb.mxu0 %v1456_v62  ;;  %v1490_v61 = vld [vmem:[%s7557_s11 + $0x2c8] sm:$0xff]  ;;  %v1504_v62 = vld [vmem:[%s7557_s11 + $0x338] sm:$0xff] }
 0x75a   :  { %1669 = vmatpush.msra.mxu2 %v1408_v63  ;;  %1692 = vmatpush.msra.mxu3 %v1424_v1  ;;  %v1520_v63 = vld [vmem:[%s7557_s11 + $0x3b8] sm:$0xff]  ;;  %v1473_v1 = vld [vmem:[%s7557_s11 + $0x240] sm:$0xff] }
 0x75b   :  { %4180 = vmatmul.msk.f32.gmra.mxu2 %vm103_vm1, %v5194_v17  ;;  %4182 = vmatmul.msk.f32.gmra.mxu3 %vm103_vm1, %v5194_v17 }
 0x75c   :  { %4184 = vmatmul.msk.f32.gmra.mxu1 %vm103_vm1, %v5194_v17  ;;  %4186 = vmatmul.msk.f32.gmra.mxu0 %vm103_vm1, %v5194_v17 }
 0x75d   :  { %1716 = vmatpush.msrb.mxu1 %v1439_v2  ;;  %1739 = vmatpush.msrb.mxu0 %v1455_v3  ;;  %v1489_v2 = vld [vmem:[%s7557_s11 + $0x2c0] sm:$0xff]  ;;  %v1503_v3 = vld [vmem:[%s7557_s11 + $0x330] sm:$0xff] }
 0x75e   :  { %1670 = vmatpush.msra.mxu2 %v1407_v4  ;;  %1693 = vmatpush.msra.mxu3 %v1423_v5  ;;  %v1519_v4 = vld [vmem:[%s7557_s11 + $0x3b0] sm:$0xff]  ;;  %v1472_v5 = vld [vmem:[%s7557_s11 + $0x238] sm:$0xff] }
 0x75f   :  { %1717 = vmatpush.msrb.mxu1 %v1438_v6  ;;  %1740 = vmatpush.msrb.mxu0 %v1454_v7  ;;  %v1488_v6 = vld [vmem:[%s7557_s11 + $0x2b8] sm:$0xff]  ;;  %v1502_v7 = vld [vmem:[%s7557_s11 + $0x328] sm:$0xff] }
 0x760   :  { %1671 = vmatpush.msra.mxu2 %v1406_v8  ;;  %1694 = vmatpush.msra.mxu3 %v1422_v10  ;;  %v1518_v8 = vld [vmem:[%s7557_s11 + $0x3a8] sm:$0xff]  ;;  %v1471_v10 = vld [vmem:[%s7557_s11 + $0x230] sm:$0xff] }
 0x761   :  { %1718 = vmatpush.msrb.mxu1 %v1437_v15  ;;  %1741 = vmatpush.msrb.mxu0 %v1453_v58  ;;  %v1487_v15 = vld [vmem:[%s7557_s11 + $0x2b0] sm:$0xff]  ;;  %v1501_v58 = vld [vmem:[%s7557_s11 + $0x320] sm:$0xff] }
 0x762   :  { %1672 = vmatpush.msra.mxu2 %v1405_v0  ;;  %1695 = vmatpush.msra.mxu3 %v1421_v20  ;;  %v1517_v0 = vld [vmem:[%s7557_s11 + $0x3a0] sm:$0xff]  ;;  %v1470_v20 = vld [vmem:[%s7557_s11 + $0x228] sm:$0xff] }
 0x763   :  { %1719 = vmatpush.msrb.mxu1 %v1436_v18  ;;  %1742 = vmatpush.msrb.mxu0 %v1452_v19  ;;  %v1486_v18 = vld [vmem:[%s7557_s11 + $0x2a8] sm:$0xff]  ;;  %v1500_v19 = vld [vmem:[%s7557_s11 + $0x318] sm:$0xff] }
 0x764   :  { %1673 = vmatpush.msra.mxu2 %v1404_v21  ;;  %1696 = vmatpush.msra.mxu3 %v1420_v22  ;;  %v1516_v21 = vld [vmem:[%s7557_s11 + $0x398] sm:$0xff]  ;;  %v1469_v22 = vld [vmem:[%s7557_s11 + $0x220] sm:$0xff] }
 0x765   :  { %1720 = vmatpush.msrb.mxu1 %v1435_v13  ;;  %1743 = vmatpush.msrb.mxu0 %v1451_v23  ;;  %v1485_v13 = vld [vmem:[%s7557_s11 + $0x2a0] sm:$0xff]  ;;  %v1499_v23 = vld [vmem:[%s7557_s11 + $0x310] sm:$0xff] }
 0x766   :  { %1674 = vmatpush.msra.mxu2 %v1403_v25  ;;  %1697 = vmatpush.msra.mxu3 %v1419_v26  ;;  %v1515_v25 = vld [vmem:[%s7557_s11 + $0x390] sm:$0xff]  ;;  %v1468_v26 = vld [vmem:[%s7557_s11 + $0x218] sm:$0xff] }
 0x767   :  { %1721 = vmatpush.msrb.mxu1 %v1434_v12  ;;  %1744 = vmatpush.msrb.mxu0 %v1450_v27  ;;  %v1484_v12 = vld [vmem:[%s7557_s11 + $0x298] sm:$0xff]  ;;  %v1498_v27 = vld [vmem:[%s7557_s11 + $0x308] sm:$0xff] }
 0x768   :  { %1675 = vmatpush.msra.mxu2 %v1402_v28  ;;  %1698 = vmatpush.msra.mxu3 %v1418_v44  ;;  %v1514_v28 = vld [vmem:[%s7557_s11 + $0x388] sm:$0xff]  ;;  %v1467_v44 = vld [vmem:[%s7557_s11 + $0x210] sm:$0xff] }
 0x769   :  { %1722 = vmatpush.msrb.mxu1 %v1433_v29  ;;  %1745 = vmatpush.msrb.mxu0 %v1449_v30  ;;  %v1483_v29 = vld [vmem:[%s7557_s11 + $0x290] sm:$0xff]  ;;  %v1497_v30 = vld [vmem:[%s7557_s11 + $0x300] sm:$0xff] }
 0x76a   :  { %1676 = vmatpush.msra.mxu2 %v1401_v14  ;;  %1699 = vmatpush.msra.mxu3 %v1417_v33  ;;  %v1482_v14 = vld [vmem:[%s7557_s11 + $0x288] sm:$0xff]  ;;  %v1465_v33 = vld [vmem:[%s7557_s11 + $0x200] sm:$0xff] }
 0x76b   :  { %1799 = vmatpush.msra.mxu1 %v1512_v31  ;;  %1822 = vmatpush.msra.mxu0 %v1528_v32  ;;  %v1513_v31 = vld [vmem:[%s7557_s11 + $0x380] sm:$0xff]  ;;  %v1466_v32 = vld [vmem:[%s7557_s11 + $0x208] sm:$0xff] }
 0x76c   :  { %1753 = vmatpush.msrb.mxu2 %v1480_v36  ;;  %1776 = vmatpush.msrb.mxu3 %v1496_v16 }
 0x76d   :  { %1800 = vmatpush.msra.mxu1 %v1511_v34  ;;  %1823 = vmatpush.msra.mxu0 %v1527_v35  ;;  %v1481_v34 = vld [vmem:[%s7557_s11 + $0x280] sm:$0xff] }
 0x76e   :  { %1754 = vmatpush.msrb.mxu2 %v1479_v38  ;;  %1777 = vmatpush.msrb.mxu3 %v1495_v39  ;;  %v5687_v35 = vld [vmem:[%s7558_s10] sm:$0xff] }
 0x76f   :  { %1801 = vmatpush.msra.mxu1 %v1510_v24  ;;  %1824 = vmatpush.msra.mxu0 %v1526_v37  ;;  %v965_v36 = vperm.slane %v5687_v35, 2  ;;  %v966_v16 = vperm.slane %v5687_v35, 3 }
 0x770   :  { %1755 = vmatpush.msrb.mxu2 %v1478_v43  ;;  %1778 = vmatpush.msrb.mxu3 %v1494_v45  ;;  %v963_v43 = vperm.slane %v5687_v35, 0  ;;  %v964_v45 = vperm.slane %v5687_v35, 1 }
 0x771   :  { %1802 = vmatpush.msra.mxu1 %v1509_v40  ;;  %1825 = vmatpush.msra.mxu0 %v1525_v41  ;;  %v1576_v40 = vld [vmem:[%s7557_s11 + $0x578] sm:$0xff] }
 0x772   :  { %1756 = vmatpush.msrb.mxu2 %v1477_v48  ;;  %1779 = vmatpush.msrb.mxu3 %v1493_v50  ;;  %v1592_v41 = vld [vmem:[%s7557_s11 + $0x5f8] sm:$0xff] }
 0x773   :  { %1803 = vmatpush.msra.mxu1 %v1508_v46  ;;  %1826 = vmatpush.msra.mxu0 %v1524_v47 }
 0x774   :  { %1757 = vmatpush.msrb.mxu2 %v1476_v53  ;;  %1780 = vmatpush.msrb.mxu3 %v1492_v55 }
 0x775   :  { %1804 = vmatpush.msra.mxu1 %v1507_v51  ;;  %1827 = vmatpush.msra.mxu0 %v1523_v52  ;;  %v1575_v51 = vld [vmem:[%s7557_s11 + $0x570] sm:$0xff] }
 0x776   :  { %1758 = vmatpush.msrb.mxu2 %v1475_v54  ;;  %1781 = vmatpush.msrb.mxu3 %v1491_v57  ;;  %v1591_v52 = vld [vmem:[%s7557_s11 + $0x5f0] sm:$0xff] }
 0x777   :  { %1805 = vmatpush.msra.mxu1 %v1506_v56  ;;  %1828 = vmatpush.msra.mxu0 %v1522_v11  ;;  %v1574_v56 = vld [vmem:[%s7557_s11 + $0x568] sm:$0xff] }
 0x778   :  { %1759 = vmatpush.msrb.mxu2 %v1474_v60  ;;  %1782 = vmatpush.msrb.mxu3 %v1490_v61  ;;  %v1590_v11 = vld [vmem:[%s7557_s11 + $0x5e8] sm:$0xff]  ;;  %v1573_v60 = vld [vmem:[%s7557_s11 + $0x560] sm:$0xff] }
 0x779   :  { %1806 = vmatpush.msra.mxu1 %v1505_v42  ;;  %1829 = vmatpush.msra.mxu0 %v1521_v59  ;;  %v1544_v42 = vld [vmem:[%s7557_s11 + $0x478] sm:$0xff]  ;;  %v1589_v61 = vld [vmem:[%s7557_s11 + $0x5e0] sm:$0xff] }
 0x77a   :  { %1760 = vmatpush.msrb.mxu2 %v1473_v1  ;;  %1783 = vmatpush.msrb.mxu3 %v1489_v2  ;;  %v1560_v59 = vld [vmem:[%s7557_s11 + $0x4f8] sm:$0xff] }
 0x77b   :  { %1807 = vmatpush.msra.mxu1 %v1504_v62  ;;  %1830 = vmatpush.msra.mxu0 %v1520_v63  ;;  %v1543_v62 = vld [vmem:[%s7557_s11 + $0x470] sm:$0xff]  ;;  %v1572_v1 = vld [vmem:[%s7557_s11 + $0x558] sm:$0xff] }
 0x77c   :  { %1761 = vmatpush.msrb.mxu2 %v1472_v5  ;;  %1784 = vmatpush.msrb.mxu3 %v1488_v6  ;;  %v1559_v63 = vld [vmem:[%s7557_s11 + $0x4f0] sm:$0xff]  ;;  %v1588_v2 = vld [vmem:[%s7557_s11 + $0x5d8] sm:$0xff] }
 0x77d   :  { %1808 = vmatpush.msra.mxu1 %v1503_v3  ;;  %1831 = vmatpush.msra.mxu0 %v1519_v4  ;;  %v1542_v3 = vld [vmem:[%s7557_s11 + $0x468] sm:$0xff]  ;;  %v1571_v5 = vld [vmem:[%s7557_s11 + $0x550] sm:$0xff] }
 0x77e   :  { %1762 = vmatpush.msrb.mxu2 %v1471_v10  ;;  %1785 = vmatpush.msrb.mxu3 %v1487_v15  ;;  %v1558_v4 = vld [vmem:[%s7557_s11 + $0x4e8] sm:$0xff]  ;;  %v1587_v6 = vld [vmem:[%s7557_s11 + $0x5d0] sm:$0xff] }
 0x77f   :  { %1809 = vmatpush.msra.mxu1 %v1502_v7  ;;  %1832 = vmatpush.msra.mxu0 %v1518_v8  ;;  %v1541_v7 = vld [vmem:[%s7557_s11 + $0x460] sm:$0xff]  ;;  %v1570_v10 = vld [vmem:[%s7557_s11 + $0x548] sm:$0xff] }
 0x780   :  { %1763 = vmatpush.msrb.mxu2 %v1470_v20  ;;  %1786 = vmatpush.msrb.mxu3 %v1486_v18  ;;  %v1557_v8 = vld [vmem:[%s7557_s11 + $0x4e0] sm:$0xff]  ;;  %v1586_v15 = vld [vmem:[%s7557_s11 + $0x5c8] sm:$0xff] }
 0x781   :  { %1810 = vmatpush.msra.mxu1 %v1501_v58  ;;  %1833 = vmatpush.msra.mxu0 %v1517_v0  ;;  %v1540_v58 = vld [vmem:[%s7557_s11 + $0x458] sm:$0xff]  ;;  %v1569_v20 = vld [vmem:[%s7557_s11 + $0x540] sm:$0xff] }
 0x782   :  { %1764 = vmatpush.msrb.mxu2 %v1469_v22  ;;  %1787 = vmatpush.msrb.mxu3 %v1485_v13  ;;  %v1556_v0 = vld [vmem:[%s7557_s11 + $0x4d8] sm:$0xff]  ;;  %v1585_v18 = vld [vmem:[%s7557_s11 + $0x5c0] sm:$0xff]  ;;  %v1539_v22 = vld [vmem:[%s7557_s11 + $0x450] sm:$0xff] }
 0x783   :  { %1811 = vmatpush.msra.mxu1 %v1500_v19  ;;  %1834 = vmatpush.msra.mxu0 %v1516_v21  ;;  %v1555_v13 = vld [vmem:[%s7557_s11 + $0x4d0] sm:$0xff] }
 0x784   :  { %1765 = vmatpush.msrb.mxu2 %v1468_v26  ;;  %1788 = vmatpush.msrb.mxu3 %v1484_v12  ;;  %v1568_v26 = vld [vmem:[%s7557_s11 + $0x538] sm:$0xff] }
 0x785   :  { %1812 = vmatpush.msra.mxu1 %v1499_v23  ;;  %1835 = vmatpush.msra.mxu0 %v1515_v25  ;;  %v1584_v12 = vld [vmem:[%s7557_s11 + $0x5b8] sm:$0xff] }
 0x786   :  { %1766 = vmatpush.msrb.mxu2 %v1467_v44  ;;  %1789 = vmatpush.msrb.mxu3 %v1483_v29  ;;  %v1567_v44 = vld [vmem:[%s7557_s11 + $0x530] sm:$0xff] }
 0x787   :  { %1813 = vmatpush.msra.mxu1 %v1498_v27  ;;  %1836 = vmatpush.msra.mxu0 %v1514_v28  ;;  %v1538_v27 = vld [vmem:[%s7557_s11 + $0x448] sm:$0xff]  ;;  %v1583_v29 = vld [vmem:[%s7557_s11 + $0x5b0] sm:$0xff] }
 0x788   :  { %1767 = vmatpush.msrb.mxu2 %v1466_v32  ;;  %1790 = vmatpush.msrb.mxu3 %v1482_v14  ;;  %v1554_v28 = vld [vmem:[%s7557_s11 + $0x4c8] sm:$0xff] }
 0x789   :  { %1814 = vmatpush.msra.mxu1 %v1497_v30  ;;  %1837 = vmatpush.msra.mxu0 %v1513_v31 }
 0x78a   :  { %1768 = vmatpush.msrb.mxu2 %v1465_v33  ;;  %1791 = vmatpush.msrb.mxu3 %v1481_v34  ;;  %v1537_v33 = vld [vmem:[%s7557_s11 + $0x440] sm:$0xff] }
 0x78b   :  { %v1553_v34 = vld [vmem:[%s7557_s11 + $0x4c0] sm:$0xff] }
 0x796   :  { %v1064_v24 = vpop.f32.mrf.mxu1  ;;  %v1087_v37 = vpop.f32.mrf.mxu0 }
 0x797   :  { %v1065_v38 = vadd.f32 %v1064_v24, %v965_v36  ;;  %v1088_v39 = vadd.f32 %v1087_v37, %v966_v16 }
 0x799   :  { %v1371_v46 = vmax.f32 %v1065_v38, 0.0  ;;  %v1372_v47 = vmax.f32 %v1088_v39, 0.0  ;;  %v1566_v38 = vld [vmem:[%s7557_s11 + $0x528] sm:$0xff] }
 0x79a   :  { %v1582_v39 = vld [vmem:[%s7557_s11 + $0x5a8] sm:$0xff] }
 0x79b   :  { %1723 = vmatmul.f32.vlgmr.msrb.gmra.mxu1 %v1371_v46  ;;  %1746 = vmatmul.f32.vlgmr.msrb.gmra.mxu0 %v1372_v47  ;;  %v1018_v48 = vpop.f32.mrf.mxu2  ;;  %v1041_v50 = vpop.f32.mrf.mxu3  ;;  %v1565_v46 = vld [vmem:[%s7557_s11 + $0x520] sm:$0xff] }
 0x79c   :  { %1891 = vmatpush.msrb.mxu1 %v1576_v40  ;;  %1914 = vmatpush.msrb.mxu0 %v1592_v41  ;;  %v1019_v53 = vadd.f32 %v1018_v48, %v963_v43  ;;  %v1042_v55 = vadd.f32 %v1041_v50, %v964_v45  ;;  %v1536_v40 = vld [vmem:[%s7557_s11 + $0x438] sm:$0xff]  ;;  %v1581_v47 = vld [vmem:[%s7557_s11 + $0x5a0] sm:$0xff] }
 0x79d   :  { %v1552_v41 = vld [vmem:[%s7557_s11 + $0x4b8] sm:$0xff] }
 0x79e   :  { %v1369_v54 = vmax.f32 %v1019_v53, 0.0  ;;  %v1370_v57 = vmax.f32 %v1042_v55, 0.0  ;;  %1892 = vmatpush.msrb.mxu1 %v1575_v51  ;;  %1915 = vmatpush.msrb.mxu0 %v1591_v52  ;;  %v1535_v51 = vld [vmem:[%s7557_s11 + $0x430] sm:$0xff]  ;;  %v1564_v53 = vld [vmem:[%s7557_s11 + $0x518] sm:$0xff] }
 0x79f   :  { %v1551_v52 = vld [vmem:[%s7557_s11 + $0x4b0] sm:$0xff]  ;;  %v1580_v55 = vld [vmem:[%s7557_s11 + $0x598] sm:$0xff] }
 0x7a0   :  { %1893 = vmatpush.msrb.mxu1 %v1574_v56  ;;  %1916 = vmatpush.msrb.mxu0 %v1590_v11 }
 0x7a1   :  { %1677 = vmatmul.f32.vlgmr.msra.gmra.mxu2 %v1369_v54  ;;  %1700 = vmatmul.f32.vlgmr.msra.gmra.mxu3 %v1370_v57  ;;  %v1534_v54 = vld [vmem:[%s7557_s11 + $0x428] sm:$0xff] }
 0x7a2   :  { %1845 = vmatpush.msra.mxu2 %v1544_v42  ;;  %1868 = vmatpush.msra.mxu3 %v1560_v59  ;;  %v1550_v57 = vld [vmem:[%s7557_s11 + $0x4a8] sm:$0xff]  ;;  %v967_v42 = vperm.slane %v5687_v35, 4  ;;  %v968_v59 = vperm.slane %v5687_v35, 5 }
 0x7a3   :  { %1894 = vmatpush.msrb.mxu1 %v1573_v60  ;;  %1917 = vmatpush.msrb.mxu0 %v1589_v61 }
 0x7a4   :  { %1846 = vmatpush.msra.mxu2 %v1543_v62  ;;  %1869 = vmatpush.msra.mxu3 %v1559_v63  ;;  %v1563_v62 = vld [vmem:[%s7557_s11 + $0x510] sm:$0xff] }
 0x7a5   :  { %1895 = vmatpush.msrb.mxu1 %v1572_v1  ;;  %1918 = vmatpush.msrb.mxu0 %v1588_v2  ;;  %v1579_v63 = vld [vmem:[%s7557_s11 + $0x590] sm:$0xff] }
 0x7a6   :  { %1847 = vmatpush.msra.mxu2 %v1542_v3  ;;  %1870 = vmatpush.msra.mxu3 %v1558_v4  ;;  %v1533_v3 = vld [vmem:[%s7557_s11 + $0x420] sm:$0xff] }
 0x7a7   :  { %1896 = vmatpush.msrb.mxu1 %v1571_v5  ;;  %1919 = vmatpush.msrb.mxu0 %v1587_v6  ;;  %v1549_v4 = vld [vmem:[%s7557_s11 + $0x4a0] sm:$0xff] }
 0x7a8   :  { %1848 = vmatpush.msra.mxu2 %v1541_v7  ;;  %1871 = vmatpush.msra.mxu3 %v1557_v8  ;;  %v1562_v7 = vld [vmem:[%s7557_s11 + $0x508] sm:$0xff] }
 0x7a9   :  { %1897 = vmatpush.msrb.mxu1 %v1570_v10  ;;  %1920 = vmatpush.msrb.mxu0 %v1586_v15  ;;  %v1067_v19 = vpop.f32.mrf.mxu1  ;;  %v1090_v21 = vpop.f32.mrf.mxu0  ;;  %v1578_v8 = vld [vmem:[%s7557_s11 + $0x588] sm:$0xff] }
 0x7aa   :  { %v1068_v23 = vadd.f32 %v1067_v19, %v965_v36  ;;  %v1091_v25 = vadd.f32 %v1090_v21, %v966_v16  ;;  %1849 = vmatpush.msra.mxu2 %v1540_v58  ;;  %1872 = vmatpush.msra.mxu3 %v1556_v0  ;;  %v969_v36 = vperm.slane %v5687_v35, 6  ;;  %v970_v16 = vperm.slane %v5687_v35, 7  ;;  %v1532_v58 = vld [vmem:[%s7557_s11 + $0x418] sm:$0xff] }
 0x7ab   :  { %1898 = vmatpush.msrb.mxu1 %v1569_v20  ;;  %1921 = vmatpush.msrb.mxu0 %v1585_v18  ;;  %v1548_v0 = vld [vmem:[%s7557_s11 + $0x498] sm:$0xff]  ;;  %v1561_v20 = vld [vmem:[%s7557_s11 + $0x500] sm:$0xff] }
 0x7ac   :  { %1850 = vmatpush.msra.mxu2 %v1539_v22  ;;  %1873 = vmatpush.msra.mxu3 %v1555_v13  ;;  %v1387_v30 = vmax.f32 %v1068_v23, 0.0  ;;  %v1388_v31 = vmax.f32 %v1091_v25, 0.0  ;;  %v1577_v18 = vld [vmem:[%s7557_s11 + $0x580] sm:$0xff]  ;;  %v1640_v22 = vld [vmem:[%s7557_s11 + $0x778] sm:$0xff] }
 0x7ad   :  { %1899 = vmatpush.msrb.mxu1 %v1568_v26  ;;  %1922 = vmatpush.msrb.mxu0 %v1584_v12  ;;  %v1656_v13 = vld [vmem:[%s7557_s11 + $0x7f8] sm:$0xff]  ;;  %v1531_v26 = vld [vmem:[%s7557_s11 + $0x410] sm:$0xff] }
 0x7ae   :  { %1851 = vmatpush.msra.mxu2 %v1538_v27  ;;  %1874 = vmatpush.msra.mxu3 %v1554_v28  ;;  %v1021_v32 = vpop.f32.mrf.mxu2  ;;  %v1044_v14 = vpop.f32.mrf.mxu3  ;;  %v1547_v12 = vld [vmem:[%s7557_s11 + $0x490] sm:$0xff]  ;;  %v1624_v35 = vld [vmem:[%s7557_s11 + $0x6f8] sm:$0xff] }
 0x7af   :  { %1900 = vmatpush.msrb.mxu1 %v1567_v44  ;;  %1923 = vmatpush.msrb.mxu0 %v1583_v29  ;;  %v1022_v24 = vadd.f32 %v1021_v32, %v963_v43  ;;  %v1045_v37 = vadd.f32 %v1044_v14, %v964_v45  ;;  %v1639_v27 = vld [vmem:[%s7557_s11 + $0x770] sm:$0xff]  ;;  %v5920_v44 = vld [vmem:[%s7558_s10 + $0x8] sm:$0xff] }
 0x7b0   :  { %1726 = vmatmul.f32.gmra.mxu1 %v1387_v30  ;;  %1749 = vmatmul.f32.gmra.mxu0 %v1388_v31  ;;  %v1655_v28 = vld [vmem:[%s7557_s11 + $0x7f0] sm:$0xff]  ;;  %v1530_v29 = vld [vmem:[%s7557_s11 + $0x408] sm:$0xff] }
 0x7b1   :  { %1852 = vmatpush.msra.mxu2 %v1537_v33  ;;  %1875 = vmatpush.msra.mxu3 %v1553_v34  ;;  %v1156_v43 = vpop.f32.mrf.mxu1  ;;  %v1179_v45 = vpop.f32.mrf.mxu0  ;;  %v1385_v56 = vmax.f32 %v1022_v24, 0.0  ;;  %v1386_v11 = vmax.f32 %v1045_v37, 0.0  ;;  %v1546_v30 = vld [vmem:[%s7557_s11 + $0x488] sm:$0xff]  ;;  %v974_v24 = vperm.slane %v5920_v44, 3 }
 0x7b2   :  { %1901 = vmatpush.msrb.mxu1 %v1566_v38  ;;  %1924 = vmatpush.msrb.mxu0 %v1582_v39  ;;  %v1157_v48 = vadd.f32 %v1156_v43, %v969_v36  ;;  %v1180_v50 = vadd.f32 %v1179_v45, %v970_v16  ;;  %v1638_v34 = vld [vmem:[%s7557_s11 + $0x768] sm:$0xff]  ;;  %v1529_v39 = vld [vmem:[%s7557_s11 + $0x400] sm:$0xff]  ;;  %v1608_v45 = vld [vmem:[%s7557_s11 + $0x678] sm:$0xff] }
 0x7b3   :  { %1853 = vmatpush.msra.mxu2 %v1536_v40  ;;  %1876 = vmatpush.msra.mxu3 %v1552_v41  ;;  %v1545_v40 = vld [vmem:[%s7557_s11 + $0x480] sm:$0xff] }
 0x7b4   :  { %1902 = vmatpush.msrb.mxu1 %v1565_v46  ;;  %1925 = vmatpush.msrb.mxu0 %v1581_v47  ;;  %v1375_v60 = vmax.f32 %v1157_v48, 0.0  ;;  %v1376_v61 = vmax.f32 %v1180_v50, 0.0  ;;  %v1637_v46 = vld [vmem:[%s7557_s11 + $0x760] sm:$0xff] }
 0x7b5   :  { %1854 = vmatpush.msra.mxu2 %v1535_v51  ;;  %1877 = vmatpush.msra.mxu3 %v1551_v52  ;;  %v1653_v47 = vld [vmem:[%s7557_s11 + $0x7e0] sm:$0xff]  ;;  %v1607_v51 = vld [vmem:[%s7557_s11 + $0x670] sm:$0xff] }
 0x7b6   :  { %1903 = vmatpush.msrb.mxu1 %v1564_v53  ;;  %1926 = vmatpush.msrb.mxu0 %v1580_v55  ;;  %v1110_v1 = vpop.f32.mrf.mxu2  ;;  %v1133_v2 = vpop.f32.mrf.mxu3  ;;  %v1623_v52 = vld [vmem:[%s7557_s11 + $0x6f0] sm:$0xff]  ;;  %v1636_v53 = vld [vmem:[%s7557_s11 + $0x758] sm:$0xff] }
 0x7b7   :  { %1680 = vmatmul.f32.gmra.mxu2 %v1385_v56  ;;  %1703 = vmatmul.f32.gmra.mxu3 %v1386_v11  ;;  %v1111_v5 = vadd.f32 %v1110_v1, %v967_v42  ;;  %v1134_v6 = vadd.f32 %v1133_v2, %v968_v59  ;;  %v1652_v55 = vld [vmem:[%s7557_s11 + $0x7d8] sm:$0xff] }
 0x7b8   :  { %1855 = vmatpush.msra.mxu2 %v1534_v54  ;;  %1878 = vmatpush.msra.mxu3 %v1550_v57  ;;  %v1606_v54 = vld [vmem:[%s7557_s11 + $0x668] sm:$0xff] }
 0x7b9   :  { %1904 = vmatpush.msrb.mxu1 %v1563_v62  ;;  %1927 = vmatpush.msrb.mxu0 %v1579_v63  ;;  %v1159_v10 = vpop.f32.mrf.mxu1  ;;  %v1182_v15 = vpop.f32.mrf.mxu0  ;;  %v1373_v23 = vmax.f32 %v1111_v5, 0.0  ;;  %v1374_v25 = vmax.f32 %v1134_v6, 0.0  ;;  %v1622_v57 = vld [vmem:[%s7557_s11 + $0x6e8] sm:$0xff]  ;;  %v1635_v62 = vld [vmem:[%s7557_s11 + $0x750] sm:$0xff] }
 0x7ba   :  { %1815 = vmatmul.f32.vlgmr.msra.gmra.mxu1 %v1375_v60  ;;  %1838 = vmatmul.f32.vlgmr.msra.gmra.mxu0 %v1376_v61  ;;  %v1160_v19 = vadd.f32 %v1159_v10, %v969_v36  ;;  %v1183_v21 = vadd.f32 %v1182_v15, %v970_v16  ;;  %v1654_v36 = vld [vmem:[%s7557_s11 + $0x7e8] sm:$0xff]  ;;  %v973_v16 = vperm.slane %v5920_v44, 2  ;;  %v1651_v63 = vld [vmem:[%s7557_s11 + $0x7d0] sm:$0xff] }
 0x7bb   :  { %1856 = vmatpush.msra.mxu2 %v1533_v3  ;;  %1879 = vmatpush.msra.mxu3 %v1549_v4  ;;  %v1605_v3 = vld [vmem:[%s7557_s11 + $0x660] sm:$0xff]  ;;  %v1634_v5 = vld [vmem:[%s7557_s11 + $0x748] sm:$0xff] }
 0x7bc   :  { %1905 = vmatpush.msrb.mxu1 %v1562_v7  ;;  %1928 = vmatpush.msrb.mxu0 %v1578_v8  ;;  %v1391_v31 = vmax.f32 %v1160_v19, 0.0  ;;  %v1392_v32 = vmax.f32 %v1183_v21, 0.0  ;;  %v1621_v4 = vld [vmem:[%s7557_s11 + $0x6e0] sm:$0xff]  ;;  %v1650_v6 = vld [vmem:[%s7557_s11 + $0x7c8] sm:$0xff] }
 0x7bd   :  { %1857 = vmatpush.msra.mxu2 %v1532_v58  ;;  %1880 = vmatpush.msra.mxu3 %v1548_v0  ;;  %v1604_v58 = vld [vmem:[%s7557_s11 + $0x658] sm:$0xff] }
 0x7be   :  { %1906 = vmatpush.msrb.mxu1 %v1561_v20  ;;  %1929 = vmatpush.msrb.mxu0 %v1577_v18  ;;  %v1113_v14 = vpop.f32.mrf.mxu2  ;;  %v1136_v33 = vpop.f32.mrf.mxu3  ;;  %v1620_v0 = vld [vmem:[%s7557_s11 + $0x6d8] sm:$0xff]  ;;  %v1633_v20 = vld [vmem:[%s7557_s11 + $0x740] sm:$0xff] }
 0x7bf   :  { %1858 = vmatpush.msra.mxu2 %v1531_v26  ;;  %1881 = vmatpush.msra.mxu3 %v1547_v12  ;;  %v1114_v37 = vadd.f32 %v1113_v14, %v967_v42  ;;  %v1137_v38 = vadd.f32 %v1136_v33, %v968_v59  ;;  %v971_v42 = vperm.slane %v5920_v44, 0  ;;  %v972_v59 = vperm.slane %v5920_v44, 1  ;;  %v1649_v18 = vld [vmem:[%s7557_s11 + $0x7c0] sm:$0xff]  ;;  %v1632_v26 = vld [vmem:[%s7557_s11 + $0x738] sm:$0xff] }
 0x7c0   :  { %1983 = vmatpush.msra.mxu1 %v1640_v22  ;;  %2006 = vmatpush.msra.mxu0 %v1656_v13  ;;  %v1603_v22 = vld [vmem:[%s7557_s11 + $0x650] sm:$0xff]  ;;  %v1648_v12 = vld [vmem:[%s7557_s11 + $0x7b8] sm:$0xff] }
 0x7c1   :  { %1769 = vmatmul.f32.vlgmr.msrb.gmra.mxu2 %v1373_v23  ;;  %1792 = vmatmul.f32.vlgmr.msrb.gmra.mxu3 %v1374_v25  ;;  %v1248_v41 = vpop.f32.mrf.mxu1  ;;  %v1271_v43 = vpop.f32.mrf.mxu0  ;;  %v1389_v56 = vmax.f32 %v1114_v37, 0.0  ;;  %v1390_v11 = vmax.f32 %v1137_v38, 0.0  ;;  %v1619_v13 = vld [vmem:[%s7557_s11 + $0x6d0] sm:$0xff] }
 0x7c2   :  { %1984 = vmatpush.msra.mxu1 %v1639_v27  ;;  %2007 = vmatpush.msra.mxu0 %v1655_v28  ;;  %v1249_v48 = vadd.f32 %v1248_v41, %v973_v16  ;;  %v1272_v50 = vadd.f32 %v1271_v43, %v974_v24  ;;  %v1602_v27 = vld [vmem:[%s7557_s11 + $0x648] sm:$0xff]  ;;  %v1629_v41 = vld [vmem:[%s7557_s11 + $0x720] sm:$0xff] }
 0x7c3   :  { %1859 = vmatpush.msra.mxu2 %v1530_v29  ;;  %1882 = vmatpush.msra.mxu3 %v1546_v30  ;;  %v1618_v28 = vld [vmem:[%s7557_s11 + $0x6c8] sm:$0xff]  ;;  %v1631_v29 = vld [vmem:[%s7557_s11 + $0x730] sm:$0xff]  ;;  %v1645_v43 = vld [vmem:[%s7557_s11 + $0x7a0] sm:$0xff] }
 0x7c4   :  { %1818 = vmatmul.f32.gmra.mxu1 %v1391_v31  ;;  %1841 = vmatmul.f32.gmra.mxu0 %v1392_v32  ;;  %v1379_v60 = vmax.f32 %v1249_v48, 0.0  ;;  %v1380_v61 = vmax.f32 %v1272_v50, 0.0  ;;  %v1647_v30 = vld [vmem:[%s7557_s11 + $0x7b0] sm:$0xff]  ;;  %v1628_v48 = vld [vmem:[%s7557_s11 + $0x718] sm:$0xff] }
 0x7c5   :  { %1985 = vmatpush.msra.mxu1 %v1638_v34  ;;  %2008 = vmatpush.msra.mxu0 %v1654_v36  ;;  %v1601_v34 = vld [vmem:[%s7557_s11 + $0x640] sm:$0xff]  ;;  %v1644_v50 = vld [vmem:[%s7557_s11 + $0x798] sm:$0xff] }
 0x7c6   :  { %1860 = vmatpush.msra.mxu2 %v1529_v39  ;;  %1883 = vmatpush.msra.mxu3 %v1545_v40  ;;  %v1202_v1 = vpop.f32.mrf.mxu2  ;;  %v1225_v2 = vpop.f32.mrf.mxu3  ;;  %v1617_v36 = vld [vmem:[%s7557_s11 + $0x6c0] sm:$0xff]  ;;  %v1600_v39 = vld [vmem:[%s7557_s11 + $0x638] sm:$0xff] }
 0x7c7   :  { %1986 = vmatpush.msra.mxu1 %v1637_v46  ;;  %2009 = vmatpush.msra.mxu0 %v1653_v47  ;;  %v1203_v7 = vadd.f32 %v1202_v1, %v971_v42  ;;  %v1226_v8 = vadd.f32 %v1225_v2, %v972_v59  ;;  %v1616_v40 = vld [vmem:[%s7557_s11 + $0x6b8] sm:$0xff] }
 0x7c8   :  { %1937 = vmatpush.msrb.mxu2 %v1608_v45  ;;  %1960 = vmatpush.msrb.mxu3 %v1624_v35  ;;  %v1599_v45 = vld [vmem:[%s7557_s11 + $0x630] sm:$0xff] }
 0x7c9   :  { %1987 = vmatpush.msra.mxu1 %v1636_v53  ;;  %2010 = vmatpush.msra.mxu0 %v1652_v55  ;;  %v1251_v10 = vpop.f32.mrf.mxu1  ;;  %v1274_v15 = vpop.f32.mrf.mxu0  ;;  %v1377_v23 = vmax.f32 %v1203_v7, 0.0  ;;  %v1378_v25 = vmax.f32 %v1226_v8, 0.0  ;;  %v1615_v35 = vld [vmem:[%s7557_s11 + $0x6b0] sm:$0xff]  ;;  %v977_v53 = vperm.slane %v5920_v44, 6  ;;  %v978_v55 = vperm.slane %v5920_v44, 7  ;;  %v1625_v7 = vld [vmem:[%s7557_s11 + $0x700] sm:$0xff] }
 0x7ca   :  { %1938 = vmatpush.msrb.mxu2 %v1607_v51  ;;  %1961 = vmatpush.msrb.mxu3 %v1623_v52  ;;  %v1252_v19 = vadd.f32 %v1251_v10, %v973_v16  ;;  %v1275_v21 = vadd.f32 %v1274_v15, %v974_v24  ;;  %v1630_v16 = vld [vmem:[%s7557_s11 + $0x728] sm:$0xff]  ;;  %v1641_v8 = vld [vmem:[%s7557_s11 + $0x780] sm:$0xff] }
 0x7cb   :  { %1772 = vmatmul.f32.gmra.mxu2 %v1389_v56  ;;  %1795 = vmatmul.f32.gmra.mxu3 %v1390_v11  ;;  %v1646_v24 = vld [vmem:[%s7557_s11 + $0x7a8] sm:$0xff] }
 0x7cc   :  { %1939 = vmatpush.msrb.mxu2 %v1606_v54  ;;  %1962 = vmatpush.msrb.mxu3 %v1622_v57  ;;  %v1395_v31 = vmax.f32 %v1252_v19, 0.0  ;;  %v1396_v32 = vmax.f32 %v1275_v21, 0.0  ;;  %v1598_v56 = vld [vmem:[%s7557_s11 + $0x628] sm:$0xff]  ;;  %v1627_v54 = vld [vmem:[%s7557_s11 + $0x710] sm:$0xff] }
 0x7cd   :  { %1988 = vmatpush.msra.mxu1 %v1635_v62  ;;  %2011 = vmatpush.msra.mxu0 %v1651_v63  ;;  %v1614_v11 = vld [vmem:[%s7557_s11 + $0x6a8] sm:$0xff]  ;;  %v1643_v57 = vld [vmem:[%s7557_s11 + $0x790] sm:$0xff] }
 0x7ce   :  { %1907 = vmatmul.f32.vlgmr.msrb.gmra.mxu1 %v1379_v60  ;;  %1930 = vmatmul.f32.vlgmr.msrb.gmra.mxu0 %v1380_v61  ;;  %v1205_v14 = vpop.f32.mrf.mxu2  ;;  %v1228_v33 = vpop.f32.mrf.mxu3  ;;  %v1626_v62 = vld [vmem:[%s7557_s11 + $0x708] sm:$0xff] }
 0x7cf   :  { %1940 = vmatpush.msrb.mxu2 %v1605_v3  ;;  %1963 = vmatpush.msrb.mxu3 %v1621_v4  ;;  %v1206_v37 = vadd.f32 %v1205_v14, %v971_v42  ;;  %v1229_v38 = vadd.f32 %v1228_v33, %v972_v59  ;;  %v1597_v42 = vld [vmem:[%s7557_s11 + $0x620] sm:$0xff]  ;;  %v1642_v63 = vld [vmem:[%s7557_s11 + $0x788] sm:$0xff]  ;;  %v1596_v3 = vld [vmem:[%s7557_s11 + $0x618] sm:$0xff] }
 0x7d0   :  { %1989 = vmatpush.msra.mxu1 %v1634_v5  ;;  %2012 = vmatpush.msra.mxu0 %v1650_v6  ;;  %v1613_v59 = vld [vmem:[%s7557_s11 + $0x6a0] sm:$0xff]  ;;  %v1612_v4 = vld [vmem:[%s7557_s11 + $0x698] sm:$0xff]  ;;  %v975_v5 = vperm.slane %v5920_v44, 4  ;;  %v976_v6 = vperm.slane %v5920_v44, 5  ;;  %v1611_v44 = vld [vmem:[%s7557_s11 + $0x690] sm:$0xff] }
 0x7d1   :  { %1941 = vmatpush.msrb.mxu2 %v1604_v58  ;;  %1964 = vmatpush.msrb.mxu3 %v1620_v0  ;;  %v1340_v46 = vpop.f32.mrf.mxu1  ;;  %v1363_v47 = vpop.f32.mrf.mxu0  ;;  %v1393_v51 = vmax.f32 %v1206_v37, 0.0  ;;  %v1394_v52 = vmax.f32 %v1229_v38, 0.0  ;;  %v1595_v58 = vld [vmem:[%s7557_s11 + $0x610] sm:$0xff]  ;;  %v1594_v21 = vld [vmem:[%s7557_s11 + $0x608] sm:$0xff] }
 0x7d2   :  { %1990 = vmatpush.msra.mxu1 %v1633_v20  ;;  %2013 = vmatpush.msra.mxu0 %v1649_v18  ;;  %v1341_v60 = vadd.f32 %v1340_v46, %v977_v53  ;;  %v1364_v61 = vadd.f32 %v1363_v47, %v978_v55 }
 0x7d3   :  { %1942 = vmatpush.msrb.mxu2 %v1603_v22  ;;  %1965 = vmatpush.msrb.mxu3 %v1619_v13  ;;  %v1610_v22 = vld [vmem:[%s7557_s11 + $0x688] sm:$0xff] }
 0x7d4   :  { %1991 = vmatpush.msra.mxu1 %v1632_v26  ;;  %2014 = vmatpush.msra.mxu0 %v1648_v12  ;;  %v1383_v10 = vmax.f32 %v1341_v60, 0.0  ;;  %v1384_v15 = vmax.f32 %v1364_v61, 0.0  ;;  %v1609_v26 = vld [vmem:[%s7557_s11 + $0x680] sm:$0xff] }
 0x7d5   :  { %1861 = vmatmul.f32.vlgmr.msra.gmra.mxu2 %v1377_v23  ;;  %1884 = vmatmul.f32.vlgmr.msra.gmra.mxu3 %v1378_v25  ;;  %v1593_v25 = vld [vmem:[%s7557_s11 + $0x600] sm:$0xff] }
 0x7d6   :  { %1943 = vmatpush.msrb.mxu2 %v1602_v27  ;;  %1966 = vmatpush.msrb.mxu3 %v1618_v28  ;;  %v1294_v1 = vpop.f32.mrf.mxu2  ;;  %v1317_v2 = vpop.f32.mrf.mxu3 }
 0x7d7   :  { %1992 = vmatpush.msra.mxu1 %v1631_v29  ;;  %2015 = vmatpush.msra.mxu0 %v1647_v30  ;;  %v1295_v18 = vadd.f32 %v1294_v1, %v975_v5  ;;  %v1318_v19 = vadd.f32 %v1317_v2, %v976_v6 }
 0x7d8   :  { %1910 = vmatmul.f32.gmra.mxu1 %v1395_v31  ;;  %1933 = vmatmul.f32.gmra.mxu0 %v1396_v32 }
 0x7d9   :  { %1944 = vmatpush.msrb.mxu2 %v1601_v34  ;;  %1967 = vmatpush.msrb.mxu3 %v1617_v36  ;;  %v1343_v0 = vpop.f32.mrf.mxu1  ;;  %v1366_v20 = vpop.f32.mrf.mxu0  ;;  %v1381_v12 = vmax.f32 %v1295_v18, 0.0  ;;  %v1382_v27 = vmax.f32 %v1318_v19, 0.0 }
 0x7da   :  { %1993 = vmatpush.msra.mxu1 %v1630_v16  ;;  %2016 = vmatpush.msra.mxu0 %v1646_v24  ;;  %v1344_v13 = vadd.f32 %v1343_v0, %v977_v53  ;;  %v1367_v23 = vadd.f32 %v1366_v20, %v978_v55 }
 0x7db   :  { %1945 = vmatpush.msrb.mxu2 %v1600_v39  ;;  %1968 = vmatpush.msrb.mxu3 %v1616_v40 }
 0x7dc   :  { %1994 = vmatpush.msra.mxu1 %v1629_v41  ;;  %2017 = vmatpush.msra.mxu0 %v1645_v43  ;;  %v1399_v30 = vmax.f32 %v1344_v13, 0.0  ;;  %v1400_v31 = vmax.f32 %v1367_v23, 0.0  ;;  %v4612_v41 = vld [vmem:[%s7559_s12] ss:$0 sm:$0xff] }
 0x7dd   :  { %1946 = vmatpush.msrb.mxu2 %v1599_v45  ;;  %1969 = vmatpush.msrb.mxu3 %v1615_v35 }
 0x7de   :  { %1995 = vmatpush.msra.mxu1 %v1628_v48  ;;  %2018 = vmatpush.msra.mxu0 %v1644_v50  ;;  %v1297_v28 = vpop.f32.mrf.mxu2  ;;  %v1320_v29 = vpop.f32.mrf.mxu3 }
 0x7df   :  { %1864 = vmatmul.f32.gmra.mxu2 %v1393_v51  ;;  %1887 = vmatmul.f32.gmra.mxu3 %v1394_v52  ;;  %v1298_v32 = vadd.f32 %v1297_v28, %v975_v5  ;;  %v1321_v14 = vadd.f32 %v1320_v29, %v976_v6 }
 0x7e0   :  { %1947 = vmatpush.msrb.mxu2 %v1598_v56  ;;  %1970 = vmatpush.msrb.mxu3 %v1614_v11 }
 0x7e1   :  { %1996 = vmatpush.msra.mxu1 %v1627_v54  ;;  %2019 = vmatpush.msra.mxu0 %v1643_v57  ;;  %v1397_v33 = vmax.f32 %v1298_v32, 0.0  ;;  %v1398_v34 = vmax.f32 %v1321_v14, 0.0 }
 0x7e2   :  { %1948 = vmatpush.msrb.mxu2 %v1597_v42  ;;  %1971 = vmatpush.msrb.mxu3 %v1613_v59 }
 0x7e3   :  { %1997 = vmatpush.msra.mxu1 %v1626_v62  ;;  %2020 = vmatpush.msra.mxu0 %v1642_v63 }
 0x7e4   :  { %1949 = vmatpush.msrb.mxu2 %v1596_v3  ;;  %1972 = vmatpush.msrb.mxu3 %v1612_v4 }
 0x7e5   :  { %1998 = vmatpush.msra.mxu1 %v1625_v7  ;;  %2021 = vmatpush.msra.mxu0 %v1641_v8 }
 0x7e6   :  { %1999 = vmatmul.f32.vlgmr.msra.gmra.mxu1 %v1383_v10  ;;  %2022 = vmatmul.f32.vlgmr.msra.gmra.mxu0 %v1384_v15 }
 0x7e7   :  { %1950 = vmatpush.msrb.mxu2 %v1595_v58  ;;  %1973 = vmatpush.msrb.mxu3 %v1611_v44 }
 0x7e9   :  { %1951 = vmatpush.msrb.mxu2 %v1594_v21  ;;  %1974 = vmatpush.msrb.mxu3 %v1610_v22 }
 0x7eb   :  { %1952 = vmatpush.msrb.mxu2 %v1593_v25  ;;  %1975 = vmatpush.msrb.mxu3 %v1609_v26 }
 0x7ec   :  { %1953 = vmatmul.f32.vlgmr.msrb.gmra.mxu2 %v1381_v12  ;;  %1976 = vmatmul.f32.vlgmr.msrb.gmra.mxu3 %v1382_v27 }
 0x7ee   :  { %2002 = vmatmul.f32.gmra.mxu1 %v1399_v30  ;;  %2025 = vmatmul.f32.gmra.mxu0 %v1400_v31 }
 0x7f4   :  { %1956 = vmatmul.f32.gmra.mxu2 %v1397_v33  ;;  %1979 = vmatmul.f32.gmra.mxu3 %v1398_v34 }
 0x818   :  { %v1724_v24 = vpop.f32.mrf.mxu1  ;;  %v1747_v37 = vpop.f32.mrf.mxu0 }
 0x824   :  { %v1678_v36 = vpop.f32.mrf.mxu2  ;;  %v1701_v16 = vpop.f32.mrf.mxu3 }
 0x825   :  { %v1679_v45 = vadd.f32 %v4612_v41, %v1678_v36 }
 0x827   :  { %v1702_v47 = vadd.f32 %v1701_v16, %v1679_v45 }
 0x829   :  { %v1725_v51 = vadd.f32 %v1724_v24, %v1702_v47 }
 0x82b   :  { %v1748_v55 = vadd.f32 %v1747_v37, %v1725_v51 }
 0x82d   :  { %v1727_v40 = vpop.f32.mrf.mxu1  ;;  %v1750_v43 = vpop.f32.mrf.mxu0 }
 0x837   :  { %v1816_v48 = vpop.f32.mrf.mxu1  ;;  %v1839_v50 = vpop.f32.mrf.mxu0 }
 0x83a   :  { %v1681_v38 = vpop.f32.mrf.mxu2  ;;  %v1704_v39 = vpop.f32.mrf.mxu3 }
 0x83b   :  { %v1682_v52 = vadd.f32 %v4612_v41, %v1681_v38 }
 0x83d   :  { %v1705_v53 = vadd.f32 %v1704_v39, %v1682_v52 }
 0x83f   :  { %v1728_v42 = vadd.f32 %v1727_v40, %v1705_v53  ;;  %v4189_v53 = vld [vmem:[%s7549_s3 + $0x30] sm:$0xff] }
 0x841   :  { %v1819_v57 = vpop.f32.mrf.mxu1  ;;  %v1842_v59 = vpop.f32.mrf.mxu0  ;;  %v1751_v61 = vadd.f32 %v1750_v43, %v1728_v42 }
 0x844   :  { %v1770_v35 = vpop.f32.mrf.mxu2  ;;  %v1793_v46 = vpop.f32.mrf.mxu3 }
 0x845   :  { %v1771_v54 = vadd.f32 %v1770_v35, %v1748_v55  ;;  %v4188_v55 = vld [vmem:[%s7549_s3 + $0x28] sm:$0xff] }
 0x847   :  { %v1794_v60 = vadd.f32 %v1793_v46, %v1771_v54 }
 0x849   :  { %v1817_v62 = vadd.f32 %v1816_v48, %v1794_v60 }
 0x84b   :  { %v1908_v3 = vpop.f32.mrf.mxu1  ;;  %v1840_v5 = vadd.f32 %v1839_v50, %v1817_v62  ;;  %v1931_v6 = vpop.f32.mrf.mxu0 }
 0x84e   :  { %v1773_v56 = vpop.f32.mrf.mxu2  ;;  %v1796_v11 = vpop.f32.mrf.mxu3 }
 0x84f   :  { %v1774_v63 = vadd.f32 %v1773_v56, %v1751_v61  ;;  %v4187_v56 = vld [vmem:[%s7549_s3 + $0x20] sm:$0xff] }
 0x851   :  { %v1797_v4 = vadd.f32 %v1796_v11, %v1774_v63 }
 0x853   :  { %v1820_v8 = vadd.f32 %v1819_v57, %v1797_v4 }
 0x855   :  { %v1843_v44 = vadd.f32 %v1842_v59, %v1820_v8  ;;  %v1911_v0 = vpop.f32.mrf.mxu1  ;;  %v1934_v19 = vpop.f32.mrf.mxu0 }
 0x858   :  { %v1862_v1 = vpop.f32.mrf.mxu2  ;;  %v1885_v2 = vpop.f32.mrf.mxu3 }
 0x859   :  { %v1863_v7 = vadd.f32 %v1862_v1, %v1840_v5 }
 0x85b   :  { %v1886_v10 = vadd.f32 %v1885_v2, %v1863_v7 }
 0x85d   :  { %v1909_v20 = vadd.f32 %v1908_v3, %v1886_v10 }
 0x85f   :  { %v1932_v22 = vadd.f32 %v1931_v6, %v1909_v20  ;;  %v4613_v6 = vld [vmem:[%s7560_s13] ss:$0 sm:$0xff] }
 0x862   :  { %v1865_v15 = vpop.f32.mrf.mxu2  ;;  %v1888_v58 = vpop.f32.mrf.mxu3 }
 0x863   :  { %v1866_v18 = vadd.f32 %v1865_v15, %v1843_v44  ;;  %v2000_v26 = vpop.f32.mrf.mxu1  ;;  %v2023_v28 = vpop.f32.mrf.mxu0  ;;  %v4614_v15 = vld [vmem:[%s7561_s14] ss:$0 sm:$0xff] }
 0x865   :  { %v1889_v21 = vadd.f32 %v1888_v58, %v1866_v18 }
 0x867   :  { %v1912_v12 = vadd.f32 %v1911_v0, %v1889_v21 }
 0x869   :  { %v1935_v30 = vadd.f32 %v1934_v19, %v1912_v12 }
 0x86b   :  { %v2003_v24 = vpop.f32.mrf.mxu1  ;;  %v2026_v38 = vpop.f32.mrf.mxu0 }
 0x86f   :  { %v1954_v13 = vpop.f32.mrf.mxu2  ;;  %v1977_v23 = vpop.f32.mrf.mxu3 }
 0x870   :  { %v1955_v25 = vadd.f32 %v1954_v13, %v1932_v22 }
 0x872   :  { %v1978_v27 = vadd.f32 %v1977_v23, %v1955_v25  ;;  %v4615_v23 = vld [vmem:[%s7551_s4 + $0x1] ss:$0 sm:$0xff]  ;;  %s7587_s4 = smov 72  }
 0x874   :  { %v2001_v29 = vadd.f32 %v2000_v26, %v1978_v27 }
 0x876   :  { %v2024_v31 = vadd.f32 %v2023_v28, %v2001_v29 }
 0x877   :  { %v1957_v32 = vpop.f32.mrf.mxu2  ;;  %v1980_v34 = vpop.f32.mrf.mxu3 }
 0x878   :  { %v1958_v14 = vadd.f32 %v1957_v32, %v1935_v30  ;;  %v2029_v33 = vadd.f32 %v2024_v31, %v5134_v49 }
 0x87a   :  { %v1981_v36 = vadd.f32 %v1980_v34, %v1958_v14  ;;  %v2033_v16 = vsel %vm103_vm1, %v2029_v33, 0.0 }
 0x87b   :  { %2034 = vadd.xlane.f32.xlu2 %v2033_v16 }
 0x87c   :  { %v2004_v37 = vadd.f32 %v2003_v24, %v1981_v36 }
 0x87e   :  { %v2027_v39 = vadd.f32 %v2026_v38, %v2004_v37 }
 0x880   :  { %v2030_v40 = vadd.f32 %v2027_v39, %v5194_v17  ;;  %v4190_v17 = vld [vmem:[%s7549_s3 + $0x38] sm:$0xff] }
 0x881   :  { %2115 = vmatpush.msra.mxu2 %v4190_v17 }
 0x882   :  { %v2036_v41 = vsel %vm103_vm1, %v2030_v40, 0.0 }
 0x883   :  { %2037 = vadd.xlane.f32.xlu0 %v2036_v41  ;;  %2116 = vmatpush.msra.mxu2 %v4189_v53 }
 0x885   :  { %2117 = vmatpush.msra.mxu2 %v4188_v55 }
 0x887   :  { %2118 = vmatpush.msra.mxu2 %v4187_v56 }
 0x8ee   :  { %v2035_v43 = vpop.xlane.xlu2 %2034 }
 0x8ef   :  { %v2039_v45 = vmul.f32 %v2035_v43, %v5011_v9 }
 0x8f1   :  { %v2041_v35 = vsub.f32 %v2029_v33, %v2039_v45 }
 0x8f3   :  { %v2043_v46 = vmul.f32 %v2041_v35, %v2041_v35 }
 0x8f5   :  { %v2045_v49 = vsel %vm103_vm1, %v2043_v46, 0.0 }
 0x8f6   :  { %2046 = vadd.xlane.f32.xlu2 %v2045_v49  ;;  %v2038_v47 = vpop.xlane.xlu0 %2037 }
 0x8f7   :  { %v2040_v48 = vmul.f32 %v2038_v47, %v5011_v9 }
 0x8f9   :  { %v2042_v50 = vsub.f32 %v2030_v40, %v2040_v48 }
 0x8fb   :  { %v2044_v51 = vmul.f32 %v2042_v50, %v2042_v50 }
 0x8fd   :  { %v2048_v52 = vsel %vm103_vm1, %v2044_v51, 0.0 }
 0x8fe   :  { %2049 = vadd.xlane.f32.xlu0 %v2048_v52 }
 0x969   :  { %v2047_v11 = vpop.xlane.xlu2 %2046 }
 0x96a   :  { %v2051_v54 = vmul.f32 %v2047_v11, %v5011_v9 }
 0x96c   :  { %v2053_v57 = vadd.f32 1e-05, %v2051_v54 }
 0x96e   :  { %4661 = vrsqrt.f32 %v2053_v57  ;;  %vm2061_vm2 = vweird.f32 %v2053_v57 }
 0x971   :  { %v2050_v42 = vpop.xlane.xlu0 %2049 }
 0x972   :  { %v2052_v59 = vmul.f32 %v2050_v42, %v5011_v9 }
 0x974   :  { %v4662_v60 = vpop.eup %4661  ;;  %v2054_v61 = vadd.f32 1e-05, %v2052_v59 }
 0x975   :  { %v2056_v62 = vmul.f32 %v4662_v60, %v2053_v57  ;;  %vm2062_vm15 = vweird.f32 %v4662_v60 }
 0x976   :  { %4663 = vrsqrt.f32 %v2054_v61  ;;  %vm2063_vm3 = vmor %vm2061_vm2, %vm2062_vm15  ;;  %vm2071_vm5 = vweird.f32 %v2054_v61 }
 0x977   :  { %v2057_v63 = vmul.f32 %v4662_v60, %v2056_v62 }
 0x979   :  { %v2058_v1 = vmul.f32 0.5, %v2057_v63 }
 0x97b   :  { %v2059_v2 = vsub.f32 1.5, %v2058_v1 }
 0x97c   :  { %v4664_v3 = vpop.eup %4663 }
 0x97d   :  { %v2060_v4 = vmul.f32 %v4662_v60, %v2059_v2  ;;  %v2066_v5 = vmul.f32 %v4664_v3, %v2054_v61  ;;  %vm2072_vm4 = vweird.f32 %v4664_v3 }
 0x97e   :  { %vm2073_vm8 = vmor %vm2071_vm5, %vm2072_vm4 }
 0x97f   :  { %v2064_v7 = vsel %vm2063_vm3, %v4662_v60, %v2060_v4  ;;  %v2067_v8 = vmul.f32 %v4664_v3, %v2066_v5 }
 0x980   :  { %v2075_v10 = vmul.f32 %v2064_v7, %v2041_v35 }
 0x981   :  { %v2068_v58 = vmul.f32 0.5, %v2067_v8 }
 0x982   :  { %v2080_v44 = vmul.f32 %v4613_v6, %v2075_v10 }
 0x983   :  { %v2069_v0 = vsub.f32 1.5, %v2068_v58 }
 0x984   :  { %v6173_v20 = vadd.f32 %v4614_v15, %v2080_v44 }
 0x985   :  { %v2070_v18 = vmul.f32 %v4664_v3, %v2069_v0 }
 0x986   :  { %4192 = vmatmul.msk.f32.vlgmr.msra.gmra.mxu2 %vm103_vm1, %v6173_v20 }
 0x987   :  { %v2074_v19 = vsel %vm2073_vm8, %v4664_v3, %v2070_v18 }
 0x988   :  { %v2076_v21 = vmul.f32 %v2074_v19, %v2042_v50 }
 0x98a   :  { %v2081_v22 = vmul.f32 %v4613_v6, %v2076_v21 }
 0x98c   :  { %v6177_v13 = vadd.f32 %v4614_v15, %v2081_v22 }
 0x98e   :  { %4193 = vmatmul.msk.f32.gmra.mxu2 %vm103_vm1, %v6177_v13 }
 0xa09   :  { %v2120_v25 = vpop.f32.mrf.mxu2 }
 0xa0a   :  { %v6184_v26 = vadd.f32 %v4615_v23, %v2120_v25 }
 0xa0c   :  { %2286 = vrot.lane.b32.xlu2 %v6184_v26, %s4705_s2  ;;  %2129 = vrot.lane.b32.xlu1 %v6184_v26, %s4706_s29  ;;  %v2126_v12 = vmul.f32 0.35355338, %v6184_v26 }
 0xa0e   :  { %2284 = vrot.lane.b32.xlu0 %v2126_v12, %s4708_s30 }
 0xa11   :  { %v2123_v27 = vpop.f32.mrf.mxu2 }
 0xa12   :  { %v6192_v28 = vadd.f32 %v4615_v23, %v2123_v27 }
 0xa14   :  { %2442 = vrot.lane.b32.xlu2 %v6184_v26, %s4709_s18  ;;  %2314 = vrot.lane.b32.xlu1 %v6192_v28, %s4705_s2  ;;  %v2127_v29 = vmul.f32 0.35355338, %v6192_v28  ;;  %s7588_s2 = smov 48  }
 0xa16   :  { %2157 = vrot.lane.b32.xlu0 %v6192_v28, %s4706_s29  ;;  %s7589_s29 = smov 56  }
 0xa1c   :  { %2470 = vrot.lane.b32.xlu2 %v6192_v28, %s4709_s18  ;;  %2440 = vrot.lane.b32.xlu1 %v2126_v12, %s4710_s19  ;;  %s7591_s18 = smov 40  }
 0xa1e   :  { %2312 = vrot.lane.b32.xlu0 %v2127_v29, %s4708_s30  ;;  %s7590_s30 = smov 64  }
 0xa24   :  { %2596 = vrot.lane.b32.xlu2 %v2126_v12, %s4712_s20  ;;  %2468 = vrot.lane.b32.xlu1 %v2127_v29, %s4710_s19  ;;  %s7594_s19 = smov 8  }
 0xa26   :  { %2598 = vrot.lane.b32.xlu0 %v6184_v26, %s7587_s4 }
 0xa2c   :  { %2624 = vrot.lane.b32.xlu1 %v2127_v29, %s4712_s20  ;;  %s7595_s20 = smov 16  }
 0xa2e   :  { %2626 = vrot.lane.b32.xlu0 %v6192_v28, %s7587_s4 }
 0xa66   :  { %v2287_v30 = vpop.permute.xlu2 %2286 }
 0xa67   :  { %4200 = vmatpush.xpose.msk.msrb.mxu0 %vm65_vm0, %v2287_v30 }
 0xa6e   :  { %v2443_v31 = vpop.permute.xlu2 %2442 }
 0xa6f   :  { %4206 = vmatpush.xpose.msk.msra.mxu0 %vm65_vm0, %v2443_v31 }
 0xa76   :  { %v2471_v34 = vpop.permute.xlu2 %2470 }
 0xa7e   :  { %v2130_v32 = vpop.permute.xlu1 %2129  ;;  %v2597_v39 = vpop.permute.xlu2 %2596 }
 0xa7f   :  { %4194 = vmatpush.xpose.msk.msra.mxu3 %vm65_vm0, %v2130_v32  ;;  %v4602_v32 = vpack.i.bf16 %v6192_v28, %v6184_v26 }
 0xa80   :  { %v2285_v14 = vpop.permute.xlu0 %2284 }
 0xa81   :  { %4201 = vmatmul.msk.f32.vlgmr.msrb.gmra.mxu0 %vm65_vm0, %v2285_v14 }
 0xa82   :  { %4195 = vmatmul.msk.f32.vlgmr.msra.gmra.mxu3 %vm65_vm0, %v2126_v12 }
 0xa86   :  { %v2315_v33 = vpop.permute.xlu1 %2314 }
 0xa87   :  { %4202 = vmatpush.xpose.msk.msrb.mxu2 %vm65_vm0, %v2315_v33 }
 0xa88   :  { %v2158_v36 = vpop.permute.xlu0 %2157 }
 0xa89   :  { %4196 = vmatpush.xpose.msk.msrb.mxu1 %vm65_vm0, %v2158_v36 }
 0xa8b   :  { %4208 = vmatpush.xpose.msk.msra.mxu2 %vm65_vm0, %v2471_v34 }
 0xa8c   :  { %4197 = vmatmul.msk.f32.vlgmr.msrb.gmra.mxu1 %vm65_vm0, %v2127_v29 }
 0xa8e   :  { %v2441_v16 = vpop.permute.xlu1 %2440 }
 0xa8f   :  { %4207 = vmatmul.msk.f32.vlgmr.msra.gmra.mxu0 %vm65_vm0, %v2441_v16 }
 0xa90   :  { %v2313_v24 = vpop.permute.xlu0 %2312 }
 0xa91   :  { %4203 = vmatmul.msk.f32.vlgmr.msrb.gmra.mxu2 %vm65_vm0, %v2313_v24 }
 0xa96   :  { %v2469_v37 = vpop.permute.xlu1 %2468 }
 0xa98   :  { %v2599_v38 = vpop.permute.xlu0 %2598 }
 0xa99   :  { %4209 = vmatmul.msk.f32.vlgmr.msra.gmra.mxu2 %vm65_vm0, %v2469_v37  ;;  %4212 = vmatpush.xpose.msk.msrb.mxu0 %vm65_vm0, %v2599_v38 }
 0xa9c   :  { %4213 = vmatmul.msk.f32.vlgmr.msrb.gmra.mxu0 %vm65_vm0, %v2597_v39 }
 0xa9e   :  { %v2625_v41 = vpop.permute.xlu1 %2624 }
 0xaa0   :  { %v2627_v40 = vpop.permute.xlu0 %2626 }
 0xaa1   :  { %4214 = vmatpush.xpose.msk.msrb.mxu2 %vm65_vm0, %v2627_v40 }
 0xaa4   :  { %4215 = vmatmul.msk.f32.vlgmr.msrb.gmra.mxu2 %vm65_vm0, %v2625_v41 }
 0xafe   :  { %v2309_v43 = vpop.f32.mrf.mxu0 }
 0xaff   :  { %v2340_v45 = vsel %vm65_vm0, %v2309_v43, -inf }
 0xb00   :  { %2341 = vmax.xlane.f32.xlu0 %v2340_v45 }
 0xb05   :  { %v2153_v35 = vpop.f32.mrf.mxu3 }
 0xb06   :  { %v2184_v46 = vsel %vm65_vm0, %v2153_v35, -inf }
 0xb07   :  { %2185 = vmax.xlane.f32.xlu2 %v2184_v46 }
 0xb09   :  { %v2181_v49 = vpop.f32.mrf.mxu1 }
 0xb0a   :  { %v2187_v47 = vsel %vm65_vm0, %v2181_v49, -inf }
 0xb0b   :  { %2188 = vmax.xlane.f32.xlu1 %v2187_v47 }
 0xb0c   :  { %v2465_v48 = vpop.f32.mrf.mxu0 }
 0xb0d   :  { %v2496_v50 = vsel %vm65_vm0, %v2465_v48, -inf }
 0xb0f   :  { %2497 = vmax.xlane.f32.xlu2 %v2496_v50 }
 0xb14   :  { %v2337_v51 = vpop.f32.mrf.mxu2 }
 0xb15   :  { %v2343_v52 = vsel %vm65_vm0, %v2337_v51, -inf }
 0xb17   :  { %2344 = vmax.xlane.f32.xlu2 %v2343_v52 }
 0xb19   :  { %v2621_v17 = vpop.f32.mrf.mxu0 }
 0xb1a   :  { %v2652_v53 = vsel %vm65_vm0, %v2621_v17, -inf }
 0xb1b   :  { %2653 = vmax.xlane.f32.xlu0 %v2652_v53 }
 0xb1c   :  { %v2493_v55 = vpop.f32.mrf.mxu2 }
 0xb1d   :  { %v2499_v56 = vsel %vm65_vm0, %v2493_v55, -inf }
 0xb1e   :  { %2500 = vmax.xlane.f32.xlu1 %v2499_v56 }
 0xb27   :  { %v2649_v11 = vpop.f32.mrf.mxu2 }
 0xb28   :  { %v2655_v54 = vsel %vm65_vm0, %v2649_v11, -inf }
 0xb29   :  { %2656 = vmax.xlane.f32.xlu2 %v2655_v54 }
 0xb2f   :  { %2544 = vrot.lane.b32.xlu0 %v6184_v26, %s7588_s2 }
 0xb41   :  { %2388 = vrot.lane.b32.xlu2 %v6184_v26, %s7589_s29 }
 0xb73   :  { %v2342_v57 = vpop.xlane.xlu0 %2341 }
 0xb74   :  { %v2346_v42 = vsub.f32 %v2309_v43, %v2342_v57 }
 0xb76   :  { %v2348_v59 = vmul.f32 1.442695, %v2346_v42 }
 0xb78   :  { %4665 = vpow2.f32 %v2348_v59 }
 0xb7a   :  { %v2186_v60 = vpop.xlane.xlu2 %2185 }
 0xb7b   :  { %v2190_v61 = vsub.f32 %v2153_v35, %v2186_v60 }
 0xb7d   :  { %v2192_v62 = vmul.f32 1.442695, %v2190_v61 }
 0xb7e   :  { %v6240_v63 = vpop.eup %4665  ;;  %v2189_v1 = vpop.xlane.xlu1 %2188 }
 0xb7f   :  { %4667 = vpow2.f32 %v2192_v62  ;;  %v2191_v2 = vsub.f32 %v2181_v49, %v2189_v1  ;;  %v2352_v3 = vsel %vm65_vm0, %v6240_v63, 0.0 }
 0xb80   :  { %2353 = vadd.xlane.f32.xlu1 %v2352_v3 }
 0xb81   :  { %v2194_v4 = vmul.f32 1.442695, %v2191_v2 }
 0xb82   :  { %v2498_v5 = vpop.xlane.xlu2 %2497 }
 0xb83   :  { %4669 = vpow2.f32 %v2194_v4  ;;  %v2502_v6 = vsub.f32 %v2465_v48, %v2498_v5 }
 0xb85   :  { %v6244_v7 = vpop.eup %4667  ;;  %v2504_v8 = vmul.f32 1.442695, %v2502_v6 }
 0xb86   :  { %v2196_v10 = vsel %vm65_vm0, %v6244_v7, 0.0 }
 0xb87   :  { %4671 = vpow2.f32 %v2504_v8  ;;  %2197 = vadd.xlane.f32.xlu0 %v2196_v10 }
 0xb89   :  { %v6248_v15 = vpop.eup %4669 }
 0xb8a   :  { %v2345_v58 = vpop.xlane.xlu2 %2344  ;;  %v2199_v44 = vsel %vm65_vm0, %v6248_v15, 0.0 }
 0xb8b   :  { %v2347_v0 = vsub.f32 %v2337_v51, %v2345_v58  ;;  %2200 = vadd.xlane.f32.xlu2 %v2199_v44 }
 0xb8d   :  { %v6252_v18 = vpop.eup %4671  ;;  %v2350_v19 = vmul.f32 1.442695, %v2347_v0 }
 0xb8e   :  { %v2654_v21 = vpop.xlane.xlu0 %2653  ;;  %v2508_v22 = vsel %vm65_vm0, %v6252_v18, 0.0 }
 0xb8f   :  { %4673 = vpow2.f32 %v2350_v19  ;;  %v2658_v23 = vsub.f32 %v2621_v17, %v2654_v21  ;;  %2509 = vadd.xlane.f32.xlu0 %v2508_v22 }
 0xb91   :  { %v2660_v25 = vmul.f32 1.442695, %v2658_v23  ;;  %v2501_v12 = vpop.xlane.xlu1 %2500 }
 0xb92   :  { %v2503_v27 = vsub.f32 %v2493_v55, %v2501_v12 }
 0xb93   :  { %4675 = vpow2.f32 %v2660_v25 }
 0xb94   :  { %v2506_v30 = vmul.f32 1.442695, %v2503_v27 }
 0xb95   :  { %v6256_v29 = vpop.eup %4673 }
 0xb96   :  { %v2355_v31 = vsel %vm65_vm0, %v6256_v29, 0.0  ;;  %4677 = vpow2.f32 %v2506_v30 }
 0xb97   :  { %2356 = vadd.xlane.f32.xlu2 %v2355_v31 }
 0xb99   :  { %v6262_v14 = vpop.eup %4675  ;;  %4603 = vrot.lane.b32.xlu1 %v4602_v32, %s7590_s30 }
 0xb9a   :  { %v2664_v33 = vsel %vm65_vm0, %v6262_v14, 0.0 }
 0xb9b   :  { %2665 = vadd.xlane.f32.xlu0 %v2664_v33 }
 0xb9c   :  { %v6267_v34 = vpop.eup %4677  ;;  %v2657_v16 = vpop.xlane.xlu2 %2656 }
 0xb9d   :  { %v2511_v36 = vsel %vm65_vm0, %v6267_v34, 0.0  ;;  %v2659_v24 = vsub.f32 %v2649_v11, %v2657_v16 }
 0xb9f   :  { %v2662_v37 = vmul.f32 1.442695, %v2659_v24 }
 0xba1   :  { %4679 = vpow2.f32 %v2662_v37  ;;  %v6283_v40 = vpop.permute.xlu0 %2544 }
 0xba3   :  { %2512 = vadd.xlane.f32.xlu0 %v2511_v36 }
 0xba4   :  { %v6287_v43 = vpop.permute.xlu2 %2388 }
 0xba7   :  { %v6277_v38 = vpop.eup %4679 }
 0xba8   :  { %v2667_v39 = vsel %vm65_vm0, %v6277_v38, 0.0 }
 0xbaf   :  { %2414 = vrot.lane.b32.xlu2 %v6192_v28, %s7589_s29 }
 0xbb7   :  { %2570 = vrot.lane.b32.xlu2 %v6192_v28, %s7588_s2  ;;  %2700 = vrot.lane.b32.xlu0 %v6184_v26, %s7591_s18 }
 0xbbf   :  { %2726 = vrot.lane.b32.xlu0 %v6192_v28, %s7591_s18 }
 0xbc3   :  { %2668 = vadd.xlane.f32.xlu1 %v2667_v39 }
 0xbf3   :  { %v6285_v41 = vpop.xlane.xlu1 %2353 }
 0xbf4   :  { %4681 = vrcp.f32 %v6285_v41  ;;  %vm2363_vm10 = vweird.f32 %v6285_v41  ;;  %v2369_v11 = vand.u32 2147483648, %v6285_v41  ;;  %v2367_v44 = vand.u32 2147483647, %v6285_v41 }
 0xbf6   :  { %vm2368_vm8 = vcmp.eq.f32.partialorder %v2367_v44, 8.507059e+37 }
 0xbfa   :  { %v2198_v45 = vpop.xlane.xlu0 %2197  ;;  %v6290_v26 = vpop.eup %4681 }
 0xbfb   :  { %4683 = vrcp.f32 %v2198_v45  ;;  %v2359_v28 = vmul.f32 %v6290_v26, %v6285_v41  ;;  %v2211_v52 = vand.u32 2147483647, %v2198_v45  ;;  %v2213_v17 = vand.u32 2147483648, %v2198_v45 }
 0xbfc   :  { %vm2207_vm11 = vweird.f32 %v2198_v45  ;;  %vm2364_vm15 = vweird.f32 %v6290_v26 }
 0xbfd   :  { %v2360_v48 = vsub.f32 1.0, %v2359_v28  ;;  %vm2212_vm13 = vcmp.eq.f32.partialorder %v2211_v52, 8.507059e+37  ;;  %v2214_v59 = vor.u32 1.1754944e-38, %v2213_v17  ;;  %vm6313_vm4 = vmor %vm2363_vm10, %vm2364_vm15 }
 0xbfe   :  { %v2201_v35 = vpop.xlane.xlu2 %2200 }
 0xbff   :  { %4685 = vrcp.f32 %v2201_v35  ;;  %v2361_v56 = vmul.f32 %v6290_v26, %v2360_v48  ;;  %v2226_v60 = vand.u32 2147483647, %v2201_v35  ;;  %v2228_v61 = vand.u32 2147483648, %v2201_v35 }
 0xc00   :  { %vm2222_vm2 = vweird.f32 %v2201_v35 }
 0xc01   :  { %v4684_v46 = vpop.eup %4683  ;;  %v2362_v4 = vadd.f32 %v6290_v26, %v2361_v56  ;;  %v2229_v0 = vor.u32 1.1754944e-38, %v2228_v61  ;;  %vm2227_vm5 = vcmp.eq.f32.partialorder %v2226_v60, 8.507059e+37 }
 0xc02   :  { %v2203_v49 = vmul.f32 %v4684_v46, %v2198_v45  ;;  %v6294_v47 = vpop.xlane.xlu0 %2509  ;;  %vm2208_vm9 = vweird.f32 %v4684_v46 }
 0xc03   :  { %4687 = vrcp.f32 %v6294_v47  ;;  %vm2209_vm12 = vmor %vm2207_vm11, %vm2208_vm9  ;;  %v2366_v12 = vsel %vm6313_vm4, %v6290_v26, %v2362_v4  ;;  %vm2519_vm9 = vweird.f32 %v6294_v47  ;;  %v2523_v41 = vand.u32 2147483647, %v6294_v47 }
 0xc04   :  { %v2204_v50 = vsub.f32 1.0, %v2203_v49 }
 0xc05   :  { %v4686_v51 = vpop.eup %4685  ;;  %vm2524_vm15 = vcmp.eq.f32.partialorder %v2523_v41, 8.507059e+37  ;;  %v4219_v41 = vld [vmem:[%s7552_s5 + $0x28] sm:$0xff] }
 0xc06   :  { %v2205_v53 = vmul.f32 %v4684_v46, %v2204_v50  ;;  %v2218_v55 = vmul.f32 %v4686_v51, %v2201_v35  ;;  %vm2223_vm14 = vweird.f32 %v4686_v51 }
 0xc07   :  { %vm2224_vm3 = vmor %vm2222_vm2, %vm2223_vm14 }
 0xc08   :  { %v2206_v54 = vadd.f32 %v4684_v46, %v2205_v53  ;;  %v2219_v57 = vsub.f32 1.0, %v2218_v55 }
 0xc09   :  { %v6300_v42 = vpop.eup %4687 }
 0xc0a   :  { %v2210_v62 = vsel %vm2209_vm12, %v4684_v46, %v2206_v54  ;;  %v2220_v1 = vmul.f32 %v4686_v51, %v2219_v57  ;;  %v2515_v2 = vmul.f32 %v6300_v42, %v6294_v47  ;;  %v6304_v3 = vpop.xlane.xlu2 %2356  ;;  %vm2520_vm10 = vweird.f32 %v6300_v42 }
 0xc0b   :  { %v2215_v5 = vsel %vm2212_vm13, %v2214_v59, %v2210_v62  ;;  %4689 = vrcp.f32 %v6304_v3  ;;  %v4604_v6 = vpop.permute.xlu1 %4603  ;;  %v2382_v26 = vand.u32 2147483647, %v6304_v3  ;;  %vm2521_vm12 = vmor %vm2519_vm9, %vm2520_vm10  ;;  %vm2378_vm13 = vweird.f32 %v6304_v3 }
 0xc0c   :  { %v2221_v8 = vadd.f32 %v4686_v51, %v2220_v1  ;;  %v2516_v10 = vsub.f32 1.0, %v2515_v2  ;;  %v4606_v58 = vunpack.i.h.bf16 %v4604_v6  ;;  %v4605_v19 = vunpack.i.l.bf16 %v4604_v6 }
 0xc0d   :  { %v2216_v21 = vmul.f32 %v6244_v7, %v2215_v5  ;;  %v2370_v7 = vor.u32 1.1754944e-38, %v2369_v11  ;;  %vm2383_vm2 = vcmp.eq.f32.partialorder %v2382_v26, 8.507059e+37 }
 0xc0e   :  { %v2225_v23 = vsel %vm2224_vm3, %v4686_v51, %v2221_v8  ;;  %2279 = vmatpush.msra.mxu1 %v4606_v58  ;;  %v6317_v25 = vpop.xlane.xlu0 %2665  ;;  %2253 = vmatpush.msrb.mxu3 %v4605_v19  ;;  %v2517_v30 = vmul.f32 %v6300_v42, %v2516_v10 }
 0xc0f   :  { %v2230_v27 = vsel %vm2227_vm5, %v2229_v0, %v2225_v23  ;;  %4691 = vrcp.f32 %v6317_v25  ;;  %4198 = vmatmul.msk.f32.vlgmr.msrb.gmra.mxu3 %vm65_vm0, %v2216_v21  ;;  %v2371_v33 = vsel %vm2368_vm8, %v2370_v7, %v2366_v12  ;;  %vm2675_vm4 = vweird.f32 %v6317_v25 }
 0xc10   :  { %v2231_v31 = vmul.f32 %v6248_v15, %v2230_v27  ;;  %2409 = vmatpush.msra.mxu3 %v6287_v43  ;;  %v2518_v24 = vadd.f32 %v6300_v42, %v2517_v30  ;;  %v2372_v39 = vmul.f32 %v6240_v63, %v2371_v33  ;;  %v2525_v43 = vand.u32 2147483648, %v6294_v47 }
 0xc11   :  { %v4690_v32 = vpop.eup %4689  ;;  %v2679_v60 = vand.u32 2147483647, %v6317_v25 }
 0xc12   :  { %v2374_v36 = vmul.f32 %v4690_v32, %v6304_v3  ;;  %2565 = vmatpush.msrb.mxu3 %v6283_v40  ;;  %v2415_v16 = vpop.permute.xlu2 %2414  ;;  %4199 = vmatmul.msk.f32.vlgmr.msra.gmra.mxu1 %vm65_vm0, %v2231_v31  ;;  %v2384_v40 = vand.u32 2147483648, %v6304_v3  ;;  %vm2379_vm11 = vweird.f32 %v4690_v32  ;;  %v2522_v46 = vsel %vm2521_vm12, %v6300_v42, %v2518_v24 }
 0xc13   :  { %2435 = vmatpush.msrb.mxu1 %v2415_v16  ;;  %v2526_v47 = vor.u32 1.1754944e-38, %v2525_v43  ;;  %vm2380_vm14 = vmor %vm2378_vm13, %vm2379_vm11  ;;  %v2681_v42 = vand.u32 2147483648, %v6317_v25  ;;  %vm2680_vm10 = vcmp.eq.f32.partialorder %v2679_v60, 8.507059e+37  ;;  %v4218_v43 = vld [vmem:[%s7552_s5 + $0x20] sm:$0xff] }
 0xc14   :  { %v2375_v15 = vsub.f32 1.0, %v2374_v36  ;;  %v2385_v48 = vor.u32 1.1754944e-38, %v2384_v40 }
 0xc15   :  { %v4692_v37 = vpop.eup %4691  ;;  %v2527_v52 = vsel %vm2524_vm15, %v2526_v47, %v2522_v46  ;;  %v2682_v1 = vor.u32 1.1754944e-38, %v2681_v42 }
 0xc16   :  { %v2376_v45 = vmul.f32 %v4690_v32, %v2375_v15  ;;  %v2671_v35 = vmul.f32 %v4692_v37, %v6317_v25  ;;  %v2513_v28 = vpop.xlane.xlu0 %2512  ;;  %v2528_v11 = vmul.f32 %v6252_v18, %v2527_v52  ;;  %vm2676_vm3 = vweird.f32 %v4692_v37  ;;  %v4616_v52 = vld [vmem:[%s7553_s6 + $0x1] ss:$0 sm:$0xff] }
 0xc17   :  { %4693 = vrcp.f32 %v2513_v28  ;;  %4204 = vmatmul.msk.f32.vlgmr.msra.gmra.mxu3 %vm65_vm0, %v2372_v39  ;;  %v2540_v61 = vand.u32 2147483648, %v2513_v28  ;;  %vm2677_vm5 = vmor %vm2675_vm4, %vm2676_vm3  ;;  %v2538_v62 = vand.u32 2147483647, %v2513_v28  ;;  %vm2534_vm9 = vweird.f32 %v2513_v28  ;;  %v4220_v39 = vld [vmem:[%s7552_s5 + $0x30] sm:$0xff] }
 0xc18   :  { %v2377_v49 = vadd.f32 %v4690_v32, %v2376_v45  ;;  %v2672_v63 = vsub.f32 1.0, %v2671_v35 }
 0xc19   :  { %v2541_v3 = vor.u32 1.1754944e-38, %v2540_v61  ;;  %vm2539_vm12 = vcmp.eq.f32.partialorder %v2538_v62, 8.507059e+37 }
 0xc1a   :  { %v2381_v50 = vsel %vm2380_vm14, %v4690_v32, %v2377_v49  ;;  %v2571_v51 = vpop.permute.xlu2 %2570  ;;  %v2673_v53 = vmul.f32 %v4692_v37, %v2672_v63 }
 0xc1b   :  { %v2386_v17 = vsel %vm2383_vm2, %v2385_v48, %v2381_v50  ;;  %2591 = vmatpush.msra.mxu1 %v2571_v51 }
 0xc1c   :  { %v2387_v55 = vmul.f32 %v6256_v29, %v2386_v17  ;;  %v2674_v57 = vadd.f32 %v4692_v37, %v2673_v53 }
 0xc1d   :  { %v4694_v56 = vpop.eup %4693 }
 0xc1e   :  { %v2530_v54 = vmul.f32 %v4694_v56, %v2513_v28  ;;  %4205 = vmatmul.msk.f32.vlgmr.msrb.gmra.mxu1 %vm65_vm0, %v2387_v55  ;;  %vm2535_vm8 = vweird.f32 %v4694_v56  ;;  %v2678_v18 = vsel %vm2677_vm5, %v4692_v37, %v2674_v57  ;;  %v4221_v37 = vld [vmem:[%s7552_s5 + $0x38] sm:$0xff] }
 0xc1f   :  { %4210 = vmatmul.msk.f32.vlgmr.msrb.gmra.mxu3 %vm65_vm0, %v2528_v11  ;;  %vm2536_vm11 = vmor %vm2534_vm9, %vm2535_vm8  ;;  %v2683_v4 = vsel %vm2680_vm10, %v2682_v1, %v2678_v18  ;;  %2805 = vmatpush.msra.mxu0 %v4221_v37  ;;  %v4266_v37 = vld [vmem:[%s7556_s9 + $0x338] sm:$0xff] }
 0xc20   :  { %v2531_v59 = vsub.f32 1.0, %v2530_v54  ;;  %v2684_v10 = vmul.f32 %v6262_v14, %v2683_v4  ;;  %v4276_v4 = vld [vmem:[%s7556_s9 + $0x388] sm:$0xff] }
 0xc21   :  { %2806 = vmatpush.msra.mxu0 %v4220_v39  ;;  %v4247_v39 = vld [vmem:[%s7556_s9 + $0x2a0] sm:$0xff] }
 0xc22   :  { %v2532_v29 = vmul.f32 %v4694_v56, %v2531_v59 }
 0xc23   :  { %2807 = vmatpush.msra.mxu0 %v4219_v41 }
 0xc24   :  { %v2533_v2 = vadd.f32 %v4694_v56, %v2532_v29 }
 0xc25   :  { %2808 = vmatpush.msra.mxu0 %v4218_v43 }
 0xc26   :  { %v2537_v5 = vsel %vm2536_vm11, %v4694_v56, %v2533_v2 }
 0xc27   :  { %v2542_v6 = vsel %vm2539_vm12, %v2541_v3, %v2537_v5  ;;  %v4275_v3 = vld [vmem:[%s7556_s9 + $0x380] sm:$0xff]  ;;  %v4277_v5 = vld [vmem:[%s7556_s9 + $0x390] sm:$0xff] }
 0xc28   :  { %v2543_v8 = vmul.f32 %v6267_v34, %v2542_v6  ;;  %3003 = vmatpush.msra.mxu2 %v4275_v3  ;;  %v4278_v6 = vld [vmem:[%s7556_s9 + $0x398] sm:$0xff]  ;;  %v4269_v3 = vld [vmem:[%s7556_s9 + $0x350] sm:$0xff] }
 0xc29   :  { %v2701_v58 = vpop.permute.xlu0 %2700  ;;  %3072 = vmatpush.msrb.mxu0 %v4278_v6  ;;  %v4252_v6 = vld [vmem:[%s7556_s9 + $0x2c8] sm:$0xff] }
 0xc2a   :  { %4211 = vmatmul.msk.f32.vlgmr.msra.gmra.mxu1 %vm65_vm0, %v2543_v8  ;;  %2721 = vmatpush.msra.mxu3 %v2701_v58  ;;  %v4259_v8 = vld [vmem:[%s7556_s9 + $0x300] sm:$0xff]  ;;  %v4261_v58 = vld [vmem:[%s7556_s9 + $0x310] sm:$0xff] }
 0xc2b   :  { %4216 = vmatmul.msk.f32.vlgmr.msra.gmra.mxu3 %vm65_vm0, %v2684_v10  ;;  %v4260_v10 = vld [vmem:[%s7556_s9 + $0x308] sm:$0xff]  ;;  %3004 = vmatpush.msra.mxu2 %v4259_v8 }
 0xc2c   :  { %3026 = vmatpush.msrb.mxu3 %v4276_v4  ;;  %v4270_v4 = vld [vmem:[%s7556_s9 + $0x358] sm:$0xff] }
 0xc2e   :  { %3027 = vmatpush.msrb.mxu3 %v4260_v10  ;;  %v4253_v10 = vld [vmem:[%s7556_s9 + $0x2d0] sm:$0xff] }
 0xc31   :  { %v2727_v44 = vpop.permute.xlu0 %2726 }
 0xc32   :  { %2747 = vmatpush.msrb.mxu1 %v2727_v44  ;;  %v4262_v44 = vld [vmem:[%s7556_s9 + $0x318] sm:$0xff] }
 0xc33   :  { %3073 = vmatpush.msrb.mxu0 %v4262_v44 }
 0xc34   :  { %3049 = vmatpush.msra.mxu1 %v4277_v5  ;;  %v4251_v5 = vld [vmem:[%s7556_s9 + $0x2c0] sm:$0xff] }
 0xc36   :  { %v2669_v0 = vpop.xlane.xlu1 %2668  ;;  %3050 = vmatpush.msra.mxu1 %v4261_v58  ;;  %v4254_v58 = vld [vmem:[%s7556_s9 + $0x2d8] sm:$0xff] }
 0xc37   :  { %4695 = vrcp.f32 %v2669_v0  ;;  %v2696_v23 = vand.u32 2147483648, %v2669_v0  ;;  %v2694_v12 = vand.u32 2147483647, %v2669_v0  ;;  %vm2690_vm14 = vweird.f32 %v2669_v0 }
 0xc39   :  { %v2697_v14 = vor.u32 1.1754944e-38, %v2696_v23  ;;  %vm2695_vm2 = vcmp.eq.f32.partialorder %v2694_v12, 8.507059e+37  ;;  %v4227_v23 = vld [vmem:[%s7556_s9 + $0x200] sm:$0xff]  ;;  %v4229_v12 = vld [vmem:[%s7556_s9 + $0x210] sm:$0xff] }
 0xc3d   :  { %v4696_v19 = vpop.eup %4695 }
 0xc3e   :  { %v2686_v21 = vmul.f32 %v4696_v19, %v2669_v0  ;;  %vm2691_vm13 = vweird.f32 %v4696_v19  ;;  %v4243_v0 = vld [vmem:[%s7556_s9 + $0x280] sm:$0xff] }
 0xc3f   :  { %vm2692_vm15 = vmor %vm2690_vm14, %vm2691_vm13  ;;  %3005 = vmatpush.msra.mxu2 %v4243_v0  ;;  %v4235_v0 = vld [vmem:[%s7556_s9 + $0x240] sm:$0xff]  ;;  %vm4118_vm14 = vcmask 7168  }
 0xc40   :  { %v2687_v22 = vsub.f32 1.0, %v2686_v21  ;;  %v4245_v21 = vld [vmem:[%s7556_s9 + $0x290] sm:$0xff] }
 0xc41   :  { %3051 = vmatpush.msra.mxu1 %v4245_v21  ;;  %3006 = vmatpush.msra.mxu2 %v4227_v23  ;;  %v4237_v21 = vld [vmem:[%s7556_s9 + $0x250] sm:$0xff] }
 0xc42   :  { %v2688_v25 = vmul.f32 %v4696_v19, %v2687_v22  ;;  %v4246_v22 = vld [vmem:[%s7556_s9 + $0x298] sm:$0xff] }
 0xc43   :  { %3074 = vmatpush.msrb.mxu0 %v4246_v22  ;;  %3052 = vmatpush.msra.mxu1 %v4229_v12  ;;  %v4288_v12 = vld [vmem:[%s7556_s9 + $0x3e8] sm:$0xff] }
 0xc44   :  { %v2689_v34 = vadd.f32 %v4696_v19, %v2688_v25  ;;  %v4228_v25 = vld [vmem:[%s7556_s9 + $0x208] sm:$0xff] }
 0xc46   :  { %v2693_v27 = vsel %vm2692_vm15, %v4696_v19, %v2689_v34  ;;  %v4244_v19 = vld [vmem:[%s7556_s9 + $0x288] sm:$0xff]  ;;  %v4230_v34 = vld [vmem:[%s7556_s9 + $0x218] sm:$0xff] }
 0xc47   :  { %v2698_v7 = vsel %vm2695_vm2, %v2697_v14, %v2693_v27  ;;  %3028 = vmatpush.msrb.mxu3 %v4244_v19  ;;  %3075 = vmatpush.msrb.mxu0 %v4230_v34  ;;  %v4236_v19 = vld [vmem:[%s7556_s9 + $0x248] sm:$0xff]  ;;  %v4289_v34 = vld [vmem:[%s7556_s9 + $0x3f0] sm:$0xff] }
 0xc48   :  { %v2699_v30 = vmul.f32 %v6277_v38, %v2698_v7 }
 0xc49   :  { %3029 = vmatpush.msrb.mxu3 %v4228_v25  ;;  %v4287_v25 = vld [vmem:[%s7556_s9 + $0x3e0] sm:$0xff] }
 0xc4a   :  { %4217 = vmatmul.msk.f32.vlgmr.msrb.gmra.mxu1 %vm65_vm0, %v2699_v30  ;;  %v4279_v30 = vld [vmem:[%s7556_s9 + $0x3a0] sm:$0xff] }
 0xc4b   :  { %3095 = vmatpush.msrb.mxu2 %v4279_v30  ;;  %v4273_v30 = vld [vmem:[%s7556_s9 + $0x370] sm:$0xff] }
 0xc8f   :  { %v2281_v31 = vpop.f32.mrf.mxu1 }
 0xc92   :  { %v2255_v32 = vpop.f32.mrf.mxu3 }
 0xc9a   :  { %v2411_v33 = vpop.f32.mrf.mxu3 }
 0xc9b   :  { %v2437_v36 = vpop.f32.mrf.mxu1  ;;  %2754 = vrot.lane.b32.xlu2 %v2411_v33, %s7594_s19  ;;  %v4282_v33 = vld [vmem:[%s7556_s9 + $0x3b8] sm:$0xff] }
 0xc9c   :  { %2756 = vrot.lane.b32.xlu1 %v2437_v36, %s7594_s19  ;;  %v4263_v36 = vld [vmem:[%s7556_s9 + $0x320] sm:$0xff] }
 0xc9d   :  { %3096 = vmatpush.msrb.mxu2 %v4263_v36  ;;  %v4257_v36 = vld [vmem:[%s7556_s9 + $0x2f0] sm:$0xff] }
 0xc9f   :  { %3097 = vmatpush.msrb.mxu2 %v4247_v39  ;;  %v4372_v39 = vld [vmem:[%s7557_s11 + $0x978] sm:$0xff] }
 0xca2   :  { %v2567_v16 = vpop.f32.mrf.mxu3 }
 0xca3   :  { %2762 = vrot.lane.b32.xlu0 %v2567_v16, %s7595_s20  ;;  %v4264_v16 = vld [vmem:[%s7556_s9 + $0x328] sm:$0xff] }
 0xca7   :  { %v2593_v24 = vpop.f32.mrf.mxu1 }
 0xcab   :  { %2764 = vrot.lane.b32.xlu0 %v2593_v24, %s7595_s20 }
 0xcae   :  { %v2723_v15 = vpop.f32.mrf.mxu3 }
 0xcaf   :  { %2770 = vrot.lane.b32.xlu2 %v2723_v15, %s7596_s1 }
 0xcc7   :  { %v2749_v38 = vpop.f32.mrf.mxu1 }
 0xcc8   :  { %2772 = vrot.lane.b32.xlu2 %v2749_v38, %s7596_s1  ;;  %v4265_v38 = vld [vmem:[%s7556_s9 + $0x330] sm:$0xff] }
 0xcf5   :  { %v2755_v40 = vpop.permute.xlu2 %2754 }
 0xcf6   :  { %v2776_v45 = vsel %vm65_vm0, %v2255_v32, %v2755_v40  ;;  %v4281_v32 = vld [vmem:[%s7556_s9 + $0x3b0] sm:$0xff]  ;;  %v4248_v40 = vld [vmem:[%s7556_s9 + $0x2a8] sm:$0xff] }
 0xcf7   :  { %3141 = vmatpush.msrb.mxu1 %v4281_v32  ;;  %v4255_v32 = vld [vmem:[%s7556_s9 + $0x2e0] sm:$0xff] }
 0xcf9   :  { %3142 = vmatpush.msrb.mxu1 %v4265_v38  ;;  %v4241_v38 = vld [vmem:[%s7556_s9 + $0x270] sm:$0xff] }
 0xd09   :  { %v2771_v35 = vpop.permute.xlu2 %2770 }
 0xd0e   :  { %v2757_v49 = vpop.permute.xlu1 %2756 }
 0xd0f   :  { %v2777_v47 = vsel %vm65_vm0, %v2281_v31, %v2757_v49  ;;  %v4280_v31 = vld [vmem:[%s7556_s9 + $0x3a8] sm:$0xff] }
 0xd10   :  { %3118 = vmatpush.msra.mxu3 %v4280_v31  ;;  %v4274_v31 = vld [vmem:[%s7556_s9 + $0x378] sm:$0xff] }
 0xd12   :  { %3119 = vmatpush.msra.mxu3 %v4264_v16  ;;  %v4258_v16 = vld [vmem:[%s7556_s9 + $0x2f8] sm:$0xff] }
 0xd14   :  { %3120 = vmatpush.msra.mxu3 %v4248_v40  ;;  %v4356_v40 = vld [vmem:[%s7557_s11 + $0x8f8] sm:$0xff] }
 0xd15   :  { %v2763_v26 = vpop.permute.xlu0 %2762 }
 0xd16   :  { %v2778_v28 = vsel %vm785_vm6, %v2776_v45, %v2763_v26  ;;  %v4249_v45 = vld [vmem:[%s7556_s9 + $0x2b0] sm:$0xff]  ;;  %v4250_v26 = vld [vmem:[%s7556_s9 + $0x2b8] sm:$0xff] }
 0xd17   :  { %v2780_v46 = vsel %vm788_vm7, %v2778_v28, %v2771_v35  ;;  %v4231_v35 = vld [vmem:[%s7556_s9 + $0x220] sm:$0xff]  ;;  %v4232_v28 = vld [vmem:[%s7556_s9 + $0x228] sm:$0xff]  ;;  %3143 = vmatpush.msrb.mxu1 %v4249_v45  ;;  %v4371_v45 = vld [vmem:[%s7557_s11 + $0x970] sm:$0xff] }
 0xd18   :  { %4222 = vmatmul.msk.f32.vlgmr.msra.gmra.mxu0 %vm103_vm1, %v2780_v46  ;;  %3098 = vmatpush.msrb.mxu2 %v4231_v35  ;;  %v4339_v35 = vld [vmem:[%s7557_s11 + $0x870] sm:$0xff] }
 0xd19   :  { %3164 = vmatpush.msra.mxu0 %v4282_v33  ;;  %3121 = vmatpush.msra.mxu3 %v4232_v28  ;;  %v4256_v33 = vld [vmem:[%s7556_s9 + $0x2e8] sm:$0xff]  ;;  %v4355_v28 = vld [vmem:[%s7557_s11 + $0x8f0] sm:$0xff] }
 0xd1b   :  { %3165 = vmatpush.msra.mxu0 %v4266_v37  ;;  %v4242_v37 = vld [vmem:[%s7556_s9 + $0x278] sm:$0xff] }
 0xd1d   :  { %v2765_v63 = vpop.permute.xlu0 %2764  ;;  %3166 = vmatpush.msra.mxu0 %v4250_v26  ;;  %v4387_v26 = vld [vmem:[%s7557_s11 + $0x9f0] sm:$0xff] }
 0xd1e   :  { %v2779_v48 = vsel %vm785_vm6, %v2777_v47, %v2765_v63  ;;  %v4233_v63 = vld [vmem:[%s7556_s9 + $0x230] sm:$0xff]  ;;  %v4234_v47 = vld [vmem:[%s7556_s9 + $0x238] sm:$0xff] }
 0xd1f   :  { %3144 = vmatpush.msrb.mxu1 %v4233_v63  ;;  %3167 = vmatpush.msra.mxu0 %v4234_v47  ;;  %v4338_v63 = vld [vmem:[%s7557_s11 + $0x868] sm:$0xff] }
 0xd20   :  { %v4354_v47 = vld [vmem:[%s7557_s11 + $0x8e8] sm:$0xff] }
 0xd22   :  { %v2773_v50 = vpop.permute.xlu2 %2772 }
 0xd23   :  { %v2781_v51 = vsel %vm788_vm7, %v2779_v48, %v2773_v50 }
 0xd24   :  { %4223 = vmatmul.msk.f32.gmra.mxu0 %vm103_vm1, %v2781_v51 }
 0xd95   :  { %v2810_v17 = vpop.f32.mrf.mxu0 }
 0xd96   :  { %v2816_v53 = vadd.f32 %v2810_v17, %v6173_v20 }
 0xd98   :  { %v2823_v55 = vadd.f32 %v4616_v52, %v2816_v53 }
 0xd9a   :  { %v2829_v56 = vsel %vm103_vm1, %v2823_v55, 0.0 }
 0xd9b   :  { %2830 = vadd.xlane.f32.xlu0 %v2829_v56 }
 0xda1   :  { %v2813_v11 = vpop.f32.mrf.mxu0 }
 0xda2   :  { %v2817_v54 = vadd.f32 %v2813_v11, %v6177_v13 }
 0xda4   :  { %v2824_v57 = vadd.f32 %v4616_v52, %v2817_v54  ;;  %v4617_v52 = vld [vmem:[%s7554_s7 + $0x1] ss:$0 sm:$0xff] }
 0xda6   :  { %v2832_v42 = vsel %vm103_vm1, %v2824_v57, 0.0 }
 0xda7   :  { %2833 = vadd.xlane.f32.xlu2 %v2832_v42 }
 0xe0e   :  { %v2831_v59 = vpop.xlane.xlu0 %2830 }
 0xe0f   :  { %v2835_v60 = vmul.f32 %v2831_v59, %v5011_v9 }
 0xe11   :  { %v6389_v61 = vsub.f32 %v2823_v55, %v2835_v60  ;;  %v4618_v55 = vld [vmem:[%s7555_s8 + $0x1] ss:$0 sm:$0xff] }
 0xe12   :  { %v4283_v60 = vld [vmem:[%s7556_s9 + $0x3c0] sm:$0xff] }
 0xe13   :  { %v2839_v29 = vmul.f32 %v6389_v61, %v6389_v61 }
 0xe15   :  { %v2841_v20 = vsel %vm103_vm1, %v2839_v29, 0.0  ;;  %v4284_v29 = vld [vmem:[%s7556_s9 + $0x3c8] sm:$0xff] }
 0xe16   :  { %2842 = vadd.xlane.f32.xlu1 %v2841_v20 }
 0xe1a   :  { %v2834_v62 = vpop.xlane.xlu2 %2833 }
 0xe1b   :  { %v2836_v18 = vmul.f32 %v2834_v62, %v5011_v9  ;;  %v4286_v62 = vld [vmem:[%s7556_s9 + $0x3d8] sm:$0xff] }
 0xe1d   :  { %v6395_v1 = vsub.f32 %v2824_v57, %v2836_v18  ;;  %v4267_v18 = vld [vmem:[%s7556_s9 + $0x340] sm:$0xff] }
 0xe1f   :  { %v2840_v13 = vmul.f32 %v6395_v1, %v6395_v1 }
 0xe21   :  { %v2844_v2 = vsel %vm103_vm1, %v2840_v13, 0.0  ;;  %v4268_v13 = vld [vmem:[%s7556_s9 + $0x348] sm:$0xff] }
 0xe22   :  { %2845 = vadd.xlane.f32.xlu0 %v2844_v2 }
 0xe89   :  { %v2843_v14 = vpop.xlane.xlu1 %2842 }
 0xe8a   :  { %v2847_v27 = vmul.f32 %v2843_v14, %v5011_v9  ;;  %v4290_v14 = vld [vmem:[%s7556_s9 + $0x3f8] sm:$0xff] }
 0xe8c   :  { %v2849_v7 = vadd.f32 1e-05, %v2847_v27  ;;  %v4271_v27 = vld [vmem:[%s7556_s9 + $0x360] sm:$0xff] }
 0xe8e   :  { %4697 = vrsqrt.f32 %v2849_v7  ;;  %vm2857_vm6 = vweird.f32 %v2849_v7 }
 0xe94   :  { %v4698_v24 = vpop.eup %4697 }
 0xe95   :  { %v2846_v15 = vpop.xlane.xlu0 %2845  ;;  %v2852_v41 = vmul.f32 %v4698_v24, %v2849_v7  ;;  %vm2858_vm0 = vweird.f32 %v4698_v24  ;;  %v4272_v7 = vld [vmem:[%s7556_s9 + $0x368] sm:$0xff] }
 0xe96   :  { %v2848_v43 = vmul.f32 %v2846_v15, %v5011_v9  ;;  %vm2859_vm7 = vmor %vm2857_vm6, %vm2858_vm0  ;;  %v4240_v15 = vld [vmem:[%s7556_s9 + $0x268] sm:$0xff] }
 0xe97   :  { %v2853_v46 = vmul.f32 %v4698_v24, %v2852_v41  ;;  %v4388_v41 = vld [vmem:[%s7557_s11 + $0x9f8] sm:$0xff] }
 0xe98   :  { %v2850_v49 = vadd.f32 1e-05, %v2848_v43  ;;  %v4340_v43 = vld [vmem:[%s7557_s11 + $0x878] sm:$0xff] }
 0xe99   :  { %v2854_v48 = vmul.f32 0.5, %v2853_v46  ;;  %v4370_v46 = vld [vmem:[%s7557_s11 + $0x968] sm:$0xff] }
 0xe9a   :  { %4699 = vrsqrt.f32 %v2850_v49  ;;  %vm2867_vm4 = vweird.f32 %v2850_v49 }
 0xe9b   :  { %v2855_v50 = vsub.f32 1.5, %v2854_v48  ;;  %v4369_v48 = vld [vmem:[%s7557_s11 + $0x960] sm:$0xff] }
 0xe9d   :  { %v2856_v51 = vmul.f32 %v4698_v24, %v2855_v50  ;;  %v4385_v50 = vld [vmem:[%s7557_s11 + $0x9e0] sm:$0xff] }
 0xe9f   :  { %v2860_v53 = vsel %vm2859_vm7, %v4698_v24, %v2856_v51  ;;  %v4239_v24 = vld [vmem:[%s7556_s9 + $0x260] sm:$0xff] }
 0xea0   :  { %v4700_v17 = vpop.eup %4699  ;;  %v2871_v56 = vmul.f32 %v2860_v53, %v6389_v61  ;;  %v4285_v61 = vld [vmem:[%s7556_s9 + $0x3d0] sm:$0xff]  ;;  %v4337_v51 = vld [vmem:[%s7557_s11 + $0x860] sm:$0xff]  ;;  %v4384_v53 = vld [vmem:[%s7557_s11 + $0x9d8] sm:$0xff] }
 0xea1   :  { %v2862_v11 = vmul.f32 %v4700_v17, %v2850_v49  ;;  %vm2868_vm3 = vweird.f32 %v4700_v17  ;;  %v4386_v49 = vld [vmem:[%s7557_s11 + $0x9e8] sm:$0xff] }
 0xea2   :  { %v2876_v54 = vmul.f32 %v4617_v52, %v2871_v56  ;;  %vm2869_vm5 = vmor %vm2867_vm4, %vm2868_vm3  ;;  %v4352_v56 = vld [vmem:[%s7557_s11 + $0x8d8] sm:$0xff] }
 0xea3   :  { %v2863_v57 = vmul.f32 %v4700_v17, %v2862_v11  ;;  %v4367_v11 = vld [vmem:[%s7557_s11 + $0x950] sm:$0xff] }
 0xea4   :  { %v6505_v42 = vadd.f32 %v4618_v55, %v2876_v54  ;;  %v4383_v54 = vld [vmem:[%s7557_s11 + $0x9d0] sm:$0xff] }
 0xea5   :  { %v2864_v59 = vmul.f32 0.5, %v2863_v57  ;;  %v4335_v57 = vld [vmem:[%s7557_s11 + $0x850] sm:$0xff] }
 0xea6   :  { %4293 = vmatmul.msk.f32.vlgmr.msra.gmra.mxu2 %vm103_vm1, %v6505_v42  ;;  %4295 = vmatmul.msk.f32.vlgmr.msrb.gmra.mxu3 %vm103_vm1, %v6505_v42 }
 0xea7   :  { %v2865_v20 = vsub.f32 1.5, %v2864_v59  ;;  %4297 = vmatmul.msk.f32.vlgmr.msra.gmra.mxu1 %vm103_vm1, %v6505_v42  ;;  %4299 = vmatmul.msk.f32.vlgmr.msrb.gmra.mxu0 %vm103_vm1, %v6505_v42  ;;  %v4351_v59 = vld [vmem:[%s7557_s11 + $0x8d0] sm:$0xff] }
 0xea8   :  { %3187 = vmatpush.msra.mxu2 %v4283_v60  ;;  %3210 = vmatpush.msrb.mxu3 %v4284_v29  ;;  %v4366_v60 = vld [vmem:[%s7557_s11 + $0x948] sm:$0xff] }
 0xea9   :  { %v2866_v2 = vmul.f32 %v4700_v17, %v2865_v20  ;;  %3233 = vmatpush.msra.mxu1 %v4285_v61  ;;  %3256 = vmatpush.msrb.mxu0 %v4286_v62  ;;  %v4382_v29 = vld [vmem:[%s7557_s11 + $0x9c8] sm:$0xff]  ;;  %v4365_v62 = vld [vmem:[%s7557_s11 + $0x940] sm:$0xff] }
 0xeaa   :  { %3188 = vmatpush.msra.mxu2 %v4267_v18  ;;  %3211 = vmatpush.msrb.mxu3 %v4268_v13  ;;  %v4334_v20 = vld [vmem:[%s7557_s11 + $0x848] sm:$0xff]  ;;  %v4381_v18 = vld [vmem:[%s7557_s11 + $0x9c0] sm:$0xff] }
 0xeab   :  { %v2870_v8 = vsel %vm2869_vm5, %v4700_v17, %v2866_v2  ;;  %3234 = vmatpush.msra.mxu1 %v4269_v3  ;;  %3257 = vmatpush.msrb.mxu0 %v4270_v4  ;;  %v4368_v17 = vld [vmem:[%s7557_s11 + $0x958] sm:$0xff]  ;;  %v4350_v61 = vld [vmem:[%s7557_s11 + $0x8c8] sm:$0xff]  ;;  %v4333_v13 = vld [vmem:[%s7557_s11 + $0x840] sm:$0xff] }
 0xeac   :  { %v2872_v44 = vmul.f32 %v2870_v8, %v6395_v1  ;;  %3189 = vmatpush.msra.mxu2 %v4251_v5  ;;  %3212 = vmatpush.msrb.mxu3 %v4252_v6  ;;  %v4238_v1 = vld [vmem:[%s7556_s9 + $0x258] sm:$0xff]  ;;  %v4349_v2 = vld [vmem:[%s7557_s11 + $0x8c0] sm:$0xff]  ;;  %v4363_v8 = vld [vmem:[%s7557_s11 + $0x930] sm:$0xff] }
 0xead   :  { %3235 = vmatpush.msra.mxu1 %v4253_v10  ;;  %3258 = vmatpush.msrb.mxu0 %v4254_v58  ;;  %v4364_v3 = vld [vmem:[%s7557_s11 + $0x938] sm:$0xff]  ;;  %v4379_v10 = vld [vmem:[%s7557_s11 + $0x9b0] sm:$0xff] }
 0xeae   :  { %v2877_v22 = vmul.f32 %v4617_v52, %v2872_v44  ;;  %3190 = vmatpush.msra.mxu2 %v4235_v0  ;;  %3213 = vmatpush.msrb.mxu3 %v4236_v19  ;;  %v4353_v52 = vld [vmem:[%s7557_s11 + $0x8e0] sm:$0xff]  ;;  %v4380_v4 = vld [vmem:[%s7557_s11 + $0x9b8] sm:$0xff]  ;;  %v4331_v58 = vld [vmem:[%s7557_s11 + $0x830] sm:$0xff] }
 0xeaf   :  { %3236 = vmatpush.msra.mxu1 %v4237_v21  ;;  %3259 = vmatpush.msrb.mxu0 %v4238_v1  ;;  %v4332_v5 = vld [vmem:[%s7557_s11 + $0x838] sm:$0xff]  ;;  %v4347_v44 = vld [vmem:[%s7557_s11 + $0x8b0] sm:$0xff]  ;;  %v4362_v0 = vld [vmem:[%s7557_s11 + $0x928] sm:$0xff] }
 0xeb0   :  { %v6565_v23 = vadd.f32 %v4618_v55, %v2877_v22  ;;  %v4336_v55 = vld [vmem:[%s7557_s11 + $0x858] sm:$0xff]  ;;  %v4378_v19 = vld [vmem:[%s7557_s11 + $0x9a8] sm:$0xff]  ;;  %v4361_v22 = vld [vmem:[%s7557_s11 + $0x920] sm:$0xff] }
 0xeb1   :  { %v4348_v6 = vld [vmem:[%s7557_s11 + $0x8b8] sm:$0xff]  ;;  %v4330_v21 = vld [vmem:[%s7557_s11 + $0x828] sm:$0xff] }
 0xeb2   :  { %4294 = vmatmul.msk.f32.gmra.mxu2 %vm103_vm1, %v6565_v23  ;;  %4296 = vmatmul.msk.f32.gmra.mxu3 %vm103_vm1, %v6565_v23  ;;  %v4346_v1 = vld [vmem:[%s7557_s11 + $0x8a8] sm:$0xff] }
 0xeb3   :  { %4298 = vmatmul.msk.f32.gmra.mxu1 %vm103_vm1, %v6565_v23  ;;  %4300 = vmatmul.msk.f32.gmra.mxu0 %vm103_vm1, %v6565_v23 }
 0xeba   :  { %4301 = vmatmul.msk.f32.vlgmr.msrb.gmra.mxu2 %vm103_vm1, %v6505_v42  ;;  %4303 = vmatmul.msk.f32.vlgmr.msra.gmra.mxu3 %vm103_vm1, %v6505_v42 }
 0xebb   :  { %4305 = vmatmul.msk.f32.vlgmr.msrb.gmra.mxu1 %vm103_vm1, %v6505_v42  ;;  %4307 = vmatmul.msk.f32.vlgmr.msra.gmra.mxu0 %vm103_vm1, %v6505_v42 }
 0xebc   :  { %3279 = vmatpush.msrb.mxu2 %v4287_v25  ;;  %3302 = vmatpush.msra.mxu3 %v4288_v12  ;;  %v4377_v25 = vld [vmem:[%s7557_s11 + $0x9a0] sm:$0xff] }
 0xebd   :  { %3325 = vmatpush.msrb.mxu1 %v4289_v34  ;;  %3348 = vmatpush.msra.mxu0 %v4290_v14  ;;  %v4329_v12 = vld [vmem:[%s7557_s11 + $0x820] sm:$0xff]  ;;  %v4360_v14 = vld [vmem:[%s7557_s11 + $0x918] sm:$0xff] }
 0xebe   :  { %3280 = vmatpush.msrb.mxu2 %v4271_v27  ;;  %3303 = vmatpush.msra.mxu3 %v4272_v7  ;;  %v4345_v34 = vld [vmem:[%s7557_s11 + $0x8a0] sm:$0xff]  ;;  %v4376_v27 = vld [vmem:[%s7557_s11 + $0x998] sm:$0xff] }
 0xebf   :  { %3326 = vmatpush.msrb.mxu1 %v4273_v30  ;;  %3349 = vmatpush.msra.mxu0 %v4274_v31  ;;  %v4328_v7 = vld [vmem:[%s7557_s11 + $0x818] sm:$0xff]  ;;  %v4359_v31 = vld [vmem:[%s7557_s11 + $0x910] sm:$0xff] }
 0xec0   :  { %3281 = vmatpush.msrb.mxu2 %v4255_v32  ;;  %3304 = vmatpush.msra.mxu3 %v4256_v33  ;;  %v4344_v30 = vld [vmem:[%s7557_s11 + $0x898] sm:$0xff]  ;;  %v4375_v32 = vld [vmem:[%s7557_s11 + $0x990] sm:$0xff] }
 0xec1   :  { %3327 = vmatpush.msrb.mxu1 %v4257_v36  ;;  %3350 = vmatpush.msra.mxu0 %v4258_v16  ;;  %v4327_v33 = vld [vmem:[%s7557_s11 + $0x810] sm:$0xff]  ;;  %v4358_v16 = vld [vmem:[%s7557_s11 + $0x908] sm:$0xff] }
 0xec2   :  { %4302 = vmatmul.msk.f32.gmra.mxu2 %vm103_vm1, %v6565_v23  ;;  %4304 = vmatmul.msk.f32.gmra.mxu3 %vm103_vm1, %v6565_v23  ;;  %v4343_v36 = vld [vmem:[%s7557_s11 + $0x890] sm:$0xff] }
 0xec3   :  { %4306 = vmatmul.msk.f32.gmra.mxu1 %vm103_vm1, %v6565_v23  ;;  %4308 = vmatmul.msk.f32.gmra.mxu0 %vm103_vm1, %v6565_v23 }
 0xec4   :  { %3282 = vmatpush.msrb.mxu2 %v4239_v24  ;;  %3305 = vmatpush.msra.mxu3 %v4240_v15  ;;  %v4374_v24 = vld [vmem:[%s7557_s11 + $0x988] sm:$0xff] }
 0xec5   :  { %3328 = vmatpush.msrb.mxu1 %v4241_v38  ;;  %3351 = vmatpush.msra.mxu0 %v4242_v37  ;;  %v4326_v15 = vld [vmem:[%s7557_s11 + $0x808] sm:$0xff]  ;;  %v4357_v37 = vld [vmem:[%s7557_s11 + $0x900] sm:$0xff] }
 0xec6   :  { %v4342_v38 = vld [vmem:[%s7557_s11 + $0x888] sm:$0xff] }
 0xeca   :  { %4309 = vmatmul.msk.f32.vlgmr.msra.gmra.mxu2 %vm103_vm1, %v6505_v42  ;;  %4311 = vmatmul.msk.f32.vlgmr.msrb.gmra.mxu3 %vm103_vm1, %v6505_v42 }
 0xecb   :  { %4313 = vmatmul.msk.f32.vlgmr.msra.gmra.mxu1 %vm103_vm1, %v6505_v42  ;;  %4315 = vmatmul.msk.f32.vlgmr.msrb.gmra.mxu0 %vm103_vm1, %v6505_v42 }
 0xecc   :  { %3699 = vmatpush.msra.mxu1 %v4372_v39  ;;  %3722 = vmatpush.msrb.mxu0 %v4388_v41  ;;  %v4373_v39 = vld [vmem:[%s7557_s11 + $0x980] sm:$0xff]  ;;  %v4436_v41 = vld [vmem:[%s7557_s11 + $0xb78] sm:$0xff] }
 0xecd   :  { %3653 = vmatpush.msra.mxu2 %v4340_v43  ;;  %3676 = vmatpush.msrb.mxu3 %v4356_v40  ;;  %v4452_v43 = vld [vmem:[%s7557_s11 + $0xbf8] sm:$0xff]  ;;  %v4325_v40 = vld [vmem:[%s7557_s11 + $0x800] sm:$0xff] }
 0xece   :  { %3700 = vmatpush.msra.mxu1 %v4371_v45  ;;  %3723 = vmatpush.msrb.mxu0 %v4387_v26  ;;  %v4341_v45 = vld [vmem:[%s7557_s11 + $0x880] sm:$0xff]  ;;  %v4435_v26 = vld [vmem:[%s7557_s11 + $0xb70] sm:$0xff] }
 0xecf   :  { %3654 = vmatpush.msra.mxu2 %v4339_v35  ;;  %3677 = vmatpush.msrb.mxu3 %v4355_v28  ;;  %v4451_v35 = vld [vmem:[%s7557_s11 + $0xbf0] sm:$0xff]  ;;  %v4404_v28 = vld [vmem:[%s7557_s11 + $0xa78] sm:$0xff] }
 0xed0   :  { %3701 = vmatpush.msra.mxu1 %v4370_v46  ;;  %3724 = vmatpush.msrb.mxu0 %v4386_v49  ;;  %v4420_v46 = vld [vmem:[%s7557_s11 + $0xaf8] sm:$0xff]  ;;  %v4434_v49 = vld [vmem:[%s7557_s11 + $0xb68] sm:$0xff] }
 0xed1   :  { %3655 = vmatpush.msra.mxu2 %v4338_v63  ;;  %3678 = vmatpush.msrb.mxu3 %v4354_v47  ;;  %v4450_v63 = vld [vmem:[%s7557_s11 + $0xbe8] sm:$0xff]  ;;  %v4403_v47 = vld [vmem:[%s7557_s11 + $0xa70] sm:$0xff] }
 0xed2   :  { %4310 = vmatmul.msk.f32.gmra.mxu2 %vm103_vm1, %v6565_v23  ;;  %4312 = vmatmul.msk.f32.gmra.mxu3 %vm103_vm1, %v6565_v23 }
 0xed3   :  { %4314 = vmatmul.msk.f32.gmra.mxu1 %vm103_vm1, %v6565_v23  ;;  %4316 = vmatmul.msk.f32.gmra.mxu0 %vm103_vm1, %v6565_v23 }
 0xed4   :  { %3702 = vmatpush.msra.mxu1 %v4369_v48  ;;  %3725 = vmatpush.msrb.mxu0 %v4385_v50  ;;  %v4419_v48 = vld [vmem:[%s7557_s11 + $0xaf0] sm:$0xff]  ;;  %v4433_v50 = vld [vmem:[%s7557_s11 + $0xb60] sm:$0xff] }
 0xed5   :  { %3656 = vmatpush.msra.mxu2 %v4337_v51  ;;  %3679 = vmatpush.msrb.mxu3 %v4353_v52  ;;  %v4449_v51 = vld [vmem:[%s7557_s11 + $0xbe0] sm:$0xff]  ;;  %v4402_v52 = vld [vmem:[%s7557_s11 + $0xa68] sm:$0xff] }
 0xed6   :  { %3703 = vmatpush.msra.mxu1 %v4368_v17  ;;  %3726 = vmatpush.msrb.mxu0 %v4384_v53  ;;  %v4418_v17 = vld [vmem:[%s7557_s11 + $0xae8] sm:$0xff]  ;;  %v4432_v53 = vld [vmem:[%s7557_s11 + $0xb58] sm:$0xff] }
 0xed7   :  { %3657 = vmatpush.msra.mxu2 %v4336_v55  ;;  %3680 = vmatpush.msrb.mxu3 %v4352_v56  ;;  %v4448_v55 = vld [vmem:[%s7557_s11 + $0xbd8] sm:$0xff]  ;;  %v4401_v56 = vld [vmem:[%s7557_s11 + $0xa60] sm:$0xff] }
 0xed8   :  { %3704 = vmatpush.msra.mxu1 %v4367_v11  ;;  %3727 = vmatpush.msrb.mxu0 %v4383_v54  ;;  %v4417_v11 = vld [vmem:[%s7557_s11 + $0xae0] sm:$0xff]  ;;  %v4431_v54 = vld [vmem:[%s7557_s11 + $0xb50] sm:$0xff] }
 0xed9   :  { %3658 = vmatpush.msra.mxu2 %v4335_v57  ;;  %3681 = vmatpush.msrb.mxu3 %v4351_v59  ;;  %v4447_v57 = vld [vmem:[%s7557_s11 + $0xbd0] sm:$0xff]  ;;  %v4400_v59 = vld [vmem:[%s7557_s11 + $0xa58] sm:$0xff] }
 0xeda   :  { %4317 = vmatmul.msk.f32.vlgmr.msrb.gmra.mxu2 %vm103_vm1, %v6505_v42  ;;  %4319 = vmatmul.msk.f32.vlgmr.msra.gmra.mxu3 %vm103_vm1, %v6505_v42 }
 0xedb   :  { %4321 = vmatmul.msk.f32.vlgmr.msrb.gmra.mxu1 %vm103_vm1, %v6505_v42  ;;  %4323 = vmatmul.msk.f32.vlgmr.msra.gmra.mxu0 %vm103_vm1, %v6505_v42 }
 0xedc   :  { %3705 = vmatpush.msra.mxu1 %v4366_v60  ;;  %3728 = vmatpush.msrb.mxu0 %v4382_v29  ;;  %v4416_v60 = vld [vmem:[%s7557_s11 + $0xad8] sm:$0xff]  ;;  %v4430_v29 = vld [vmem:[%s7557_s11 + $0xb48] sm:$0xff] }
 0xedd   :  { %3659 = vmatpush.msra.mxu2 %v4334_v20  ;;  %3682 = vmatpush.msrb.mxu3 %v4350_v61  ;;  %v4446_v20 = vld [vmem:[%s7557_s11 + $0xbc8] sm:$0xff]  ;;  %v4399_v61 = vld [vmem:[%s7557_s11 + $0xa50] sm:$0xff] }
 0xede   :  { %3706 = vmatpush.msra.mxu1 %v4365_v62  ;;  %3729 = vmatpush.msrb.mxu0 %v4381_v18  ;;  %v4415_v62 = vld [vmem:[%s7557_s11 + $0xad0] sm:$0xff]  ;;  %v4429_v18 = vld [vmem:[%s7557_s11 + $0xb40] sm:$0xff] }
 0xedf   :  { %3660 = vmatpush.msra.mxu2 %v4333_v13  ;;  %3683 = vmatpush.msrb.mxu3 %v4349_v2  ;;  %v4445_v13 = vld [vmem:[%s7557_s11 + $0xbc0] sm:$0xff]  ;;  %v4398_v2 = vld [vmem:[%s7557_s11 + $0xa48] sm:$0xff] }
 0xee0   :  { %3707 = vmatpush.msra.mxu1 %v4364_v3  ;;  %3730 = vmatpush.msrb.mxu0 %v4380_v4  ;;  %v4414_v3 = vld [vmem:[%s7557_s11 + $0xac8] sm:$0xff]  ;;  %v4428_v4 = vld [vmem:[%s7557_s11 + $0xb38] sm:$0xff] }
 0xee1   :  { %3661 = vmatpush.msra.mxu2 %v4332_v5  ;;  %3684 = vmatpush.msrb.mxu3 %v4348_v6  ;;  %v4444_v5 = vld [vmem:[%s7557_s11 + $0xbb8] sm:$0xff]  ;;  %v4397_v6 = vld [vmem:[%s7557_s11 + $0xa40] sm:$0xff] }
 0xee2   :  { %4318 = vmatmul.msk.f32.gmra.mxu2 %vm103_vm1, %v6565_v23  ;;  %4320 = vmatmul.msk.f32.gmra.mxu3 %vm103_vm1, %v6565_v23 }
 0xee3   :  { %4322 = vmatmul.msk.f32.gmra.mxu1 %vm103_vm1, %v6565_v23  ;;  %4324 = vmatmul.msk.f32.gmra.mxu0 %vm103_vm1, %v6565_v23 }
 0xee4   :  { %3708 = vmatpush.msra.mxu1 %v4363_v8  ;;  %3731 = vmatpush.msrb.mxu0 %v4379_v10  ;;  %v4413_v8 = vld [vmem:[%s7557_s11 + $0xac0] sm:$0xff]  ;;  %v4427_v10 = vld [vmem:[%s7557_s11 + $0xb30] sm:$0xff] }
 0xee5   :  { %3662 = vmatpush.msra.mxu2 %v4331_v58  ;;  %3685 = vmatpush.msrb.mxu3 %v4347_v44  ;;  %v4443_v58 = vld [vmem:[%s7557_s11 + $0xbb0] sm:$0xff]  ;;  %v4396_v44 = vld [vmem:[%s7557_s11 + $0xa38] sm:$0xff] }
 0xee6   :  { %3709 = vmatpush.msra.mxu1 %v4362_v0  ;;  %3732 = vmatpush.msrb.mxu0 %v4378_v19  ;;  %v4412_v0 = vld [vmem:[%s7557_s11 + $0xab8] sm:$0xff]  ;;  %v4426_v19 = vld [vmem:[%s7557_s11 + $0xb28] sm:$0xff] }
 0xee7   :  { %3663 = vmatpush.msra.mxu2 %v4330_v21  ;;  %3686 = vmatpush.msrb.mxu3 %v4346_v1  ;;  %v4442_v21 = vld [vmem:[%s7557_s11 + $0xba8] sm:$0xff]  ;;  %v4395_v1 = vld [vmem:[%s7557_s11 + $0xa30] sm:$0xff] }
 0xee8   :  { %3710 = vmatpush.msra.mxu1 %v4361_v22  ;;  %3733 = vmatpush.msrb.mxu0 %v4377_v25  ;;  %v4411_v22 = vld [vmem:[%s7557_s11 + $0xab0] sm:$0xff]  ;;  %v4425_v25 = vld [vmem:[%s7557_s11 + $0xb20] sm:$0xff] }
 0xee9   :  { %3664 = vmatpush.msra.mxu2 %v4329_v12  ;;  %3687 = vmatpush.msrb.mxu3 %v4345_v34  ;;  %v4441_v12 = vld [vmem:[%s7557_s11 + $0xba0] sm:$0xff]  ;;  %v4394_v34 = vld [vmem:[%s7557_s11 + $0xa28] sm:$0xff] }
 0xeea   :  { %3711 = vmatpush.msra.mxu1 %v4360_v14  ;;  %3734 = vmatpush.msrb.mxu0 %v4376_v27  ;;  %v4410_v14 = vld [vmem:[%s7557_s11 + $0xaa8] sm:$0xff]  ;;  %v4424_v27 = vld [vmem:[%s7557_s11 + $0xb18] sm:$0xff] }
 0xeeb   :  { %3665 = vmatpush.msra.mxu2 %v4328_v7  ;;  %3688 = vmatpush.msrb.mxu3 %v4344_v30  ;;  %v4440_v7 = vld [vmem:[%s7557_s11 + $0xb98] sm:$0xff]  ;;  %v4393_v30 = vld [vmem:[%s7557_s11 + $0xa20] sm:$0xff] }
 0xeec   :  { %3712 = vmatpush.msra.mxu1 %v4359_v31  ;;  %3735 = vmatpush.msrb.mxu0 %v4375_v32  ;;  %v4409_v31 = vld [vmem:[%s7557_s11 + $0xaa0] sm:$0xff]  ;;  %v4423_v32 = vld [vmem:[%s7557_s11 + $0xb10] sm:$0xff] }
 0xeed   :  { %3666 = vmatpush.msra.mxu2 %v4327_v33  ;;  %3689 = vmatpush.msrb.mxu3 %v4343_v36  ;;  %v4439_v33 = vld [vmem:[%s7557_s11 + $0xb90] sm:$0xff]  ;;  %v4392_v36 = vld [vmem:[%s7557_s11 + $0xa18] sm:$0xff] }
 0xeee   :  { %3713 = vmatpush.msra.mxu1 %v4358_v16  ;;  %3736 = vmatpush.msrb.mxu0 %v4374_v24  ;;  %v4408_v16 = vld [vmem:[%s7557_s11 + $0xa98] sm:$0xff]  ;;  %v4422_v24 = vld [vmem:[%s7557_s11 + $0xb08] sm:$0xff] }
 0xeef   :  { %3667 = vmatpush.msra.mxu2 %v4326_v15  ;;  %3690 = vmatpush.msrb.mxu3 %v4342_v38  ;;  %v4438_v15 = vld [vmem:[%s7557_s11 + $0xb88] sm:$0xff]  ;;  %v4391_v38 = vld [vmem:[%s7557_s11 + $0xa10] sm:$0xff] }
 0xef0   :  { %3714 = vmatpush.msra.mxu1 %v4357_v37  ;;  %3737 = vmatpush.msrb.mxu0 %v4373_v39  ;;  %v4407_v37 = vld [vmem:[%s7557_s11 + $0xa90] sm:$0xff]  ;;  %v4421_v39 = vld [vmem:[%s7557_s11 + $0xb00] sm:$0xff] }
 0xef1   :  { %3668 = vmatpush.msra.mxu2 %v4325_v40  ;;  %3691 = vmatpush.msrb.mxu3 %v4341_v45  ;;  %v4406_v40 = vld [vmem:[%s7557_s11 + $0xa88] sm:$0xff]  ;;  %v4389_v45 = vld [vmem:[%s7557_s11 + $0xa00] sm:$0xff] }
 0xef2   :  { %3791 = vmatpush.msrb.mxu1 %v4436_v41  ;;  %3814 = vmatpush.msra.mxu0 %v4452_v43  ;;  %v4437_v41 = vld [vmem:[%s7557_s11 + $0xb80] sm:$0xff]  ;;  %v4390_v43 = vld [vmem:[%s7557_s11 + $0xa08] sm:$0xff] }
 0xef3   :  { %3745 = vmatpush.msrb.mxu2 %v4404_v28  ;;  %3768 = vmatpush.msra.mxu3 %v4420_v46 }
 0xef4   :  { %3792 = vmatpush.msrb.mxu1 %v4435_v26  ;;  %3815 = vmatpush.msra.mxu0 %v4451_v35  ;;  %v4405_v26 = vld [vmem:[%s7557_s11 + $0xa80] sm:$0xff]  ;;  %v7058_v35 = vld [vmem:[%s7558_s10 + $0x10] sm:$0xff] }
 0xef5   :  { %3746 = vmatpush.msrb.mxu2 %v4403_v47  ;;  %3769 = vmatpush.msra.mxu3 %v4419_v48  ;;  %v2955_v28 = vperm.slane %v7058_v35, 2  ;;  %v2956_v46 = vperm.slane %v7058_v35, 3 }
 0xef6   :  { %3793 = vmatpush.msrb.mxu1 %v4434_v49  ;;  %3816 = vmatpush.msra.mxu0 %v4450_v63 }
 0xef7   :  { %3747 = vmatpush.msrb.mxu2 %v4402_v52  ;;  %3770 = vmatpush.msra.mxu3 %v4418_v17 }
 0xef8   :  { %3794 = vmatpush.msrb.mxu1 %v4433_v50  ;;  %3817 = vmatpush.msra.mxu0 %v4449_v51  ;;  %v2953_v50 = vperm.slane %v7058_v35, 0  ;;  %v2954_v51 = vperm.slane %v7058_v35, 1 }
 0xef9   :  { %3748 = vmatpush.msrb.mxu2 %v4401_v56  ;;  %3771 = vmatpush.msra.mxu3 %v4417_v11 }
 0xefa   :  { %3795 = vmatpush.msrb.mxu1 %v4432_v53  ;;  %3818 = vmatpush.msra.mxu0 %v4448_v55  ;;  %v4500_v53 = vld [vmem:[%s7557_s11 + $0xd78] sm:$0xff] }
 0xefb   :  { %3749 = vmatpush.msrb.mxu2 %v4400_v59  ;;  %3772 = vmatpush.msra.mxu3 %v4416_v60  ;;  %v4516_v55 = vld [vmem:[%s7557_s11 + $0xdf8] sm:$0xff] }
 0xefc   :  { %3796 = vmatpush.msrb.mxu1 %v4431_v54  ;;  %3819 = vmatpush.msra.mxu0 %v4447_v57  ;;  %v4499_v54 = vld [vmem:[%s7557_s11 + $0xd70] sm:$0xff] }
 0xefd   :  { %3750 = vmatpush.msrb.mxu2 %v4399_v61  ;;  %3773 = vmatpush.msra.mxu3 %v4415_v62  ;;  %v4515_v57 = vld [vmem:[%s7557_s11 + $0xdf0] sm:$0xff] }
 0xefe   :  { %3797 = vmatpush.msrb.mxu1 %v4430_v29  ;;  %3820 = vmatpush.msra.mxu0 %v4446_v20  ;;  %v4498_v29 = vld [vmem:[%s7557_s11 + $0xd68] sm:$0xff] }
 0xeff   :  { %3751 = vmatpush.msrb.mxu2 %v4398_v2  ;;  %3774 = vmatpush.msra.mxu3 %v4414_v3  ;;  %v4514_v20 = vld [vmem:[%s7557_s11 + $0xde8] sm:$0xff]  ;;  %v4497_v2 = vld [vmem:[%s7557_s11 + $0xd60] sm:$0xff] }
 0xf00   :  { %3798 = vmatpush.msrb.mxu1 %v4429_v18  ;;  %3821 = vmatpush.msra.mxu0 %v4445_v13  ;;  %v4468_v18 = vld [vmem:[%s7557_s11 + $0xc78] sm:$0xff]  ;;  %v4513_v3 = vld [vmem:[%s7557_s11 + $0xde0] sm:$0xff] }
 0xf01   :  { %3752 = vmatpush.msrb.mxu2 %v4397_v6  ;;  %3775 = vmatpush.msra.mxu3 %v4413_v8  ;;  %v4484_v13 = vld [vmem:[%s7557_s11 + $0xcf8] sm:$0xff]  ;;  %v4467_v6 = vld [vmem:[%s7557_s11 + $0xc70] sm:$0xff] }
 0xf02   :  { %3799 = vmatpush.msrb.mxu1 %v4428_v4  ;;  %3822 = vmatpush.msra.mxu0 %v4444_v5  ;;  %v4483_v8 = vld [vmem:[%s7557_s11 + $0xcf0] sm:$0xff] }
 0xf03   :  { %3753 = vmatpush.msrb.mxu2 %v4396_v44  ;;  %3776 = vmatpush.msra.mxu3 %v4412_v0  ;;  %v4496_v44 = vld [vmem:[%s7557_s11 + $0xd58] sm:$0xff] }
 0xf04   :  { %3800 = vmatpush.msrb.mxu1 %v4427_v10  ;;  %3823 = vmatpush.msra.mxu0 %v4443_v58  ;;  %v4512_v0 = vld [vmem:[%s7557_s11 + $0xdd8] sm:$0xff] }
 0xf05   :  { %3754 = vmatpush.msrb.mxu2 %v4395_v1  ;;  %3777 = vmatpush.msra.mxu3 %v4411_v22 }
 0xf06   :  { %3801 = vmatpush.msrb.mxu1 %v4426_v19  ;;  %3824 = vmatpush.msra.mxu0 %v4442_v21  ;;  %v4466_v19 = vld [vmem:[%s7557_s11 + $0xc68] sm:$0xff] }
 0xf07   :  { %3755 = vmatpush.msrb.mxu2 %v4394_v34  ;;  %3778 = vmatpush.msra.mxu3 %v4410_v14  ;;  %v4482_v21 = vld [vmem:[%s7557_s11 + $0xce8] sm:$0xff]  ;;  %v4465_v34 = vld [vmem:[%s7557_s11 + $0xc60] sm:$0xff] }
 0xf08   :  { %3802 = vmatpush.msrb.mxu1 %v4425_v25  ;;  %3825 = vmatpush.msra.mxu0 %v4441_v12  ;;  %v4495_v25 = vld [vmem:[%s7557_s11 + $0xd50] sm:$0xff]  ;;  %v4481_v14 = vld [vmem:[%s7557_s11 + $0xce0] sm:$0xff] }
 0xf09   :  { %3756 = vmatpush.msrb.mxu2 %v4393_v30  ;;  %3779 = vmatpush.msra.mxu3 %v4409_v31  ;;  %v4511_v12 = vld [vmem:[%s7557_s11 + $0xdd0] sm:$0xff]  ;;  %v2959_v30 = vperm.slane %v7058_v35, 6  ;;  %v2960_v31 = vperm.slane %v7058_v35, 7 }
 0xf0a   :  { %3803 = vmatpush.msrb.mxu1 %v4424_v27  ;;  %3826 = vmatpush.msra.mxu0 %v4440_v7 }
 0xf0b   :  { %3757 = vmatpush.msrb.mxu2 %v4392_v36  ;;  %3780 = vmatpush.msra.mxu3 %v4408_v16 }
 0xf0c   :  { %3804 = vmatpush.msrb.mxu1 %v4423_v32  ;;  %3827 = vmatpush.msra.mxu0 %v4439_v33  ;;  %v4494_v32 = vld [vmem:[%s7557_s11 + $0xd48] sm:$0xff] }
 0xf0d   :  { %3758 = vmatpush.msrb.mxu2 %v4391_v38  ;;  %3781 = vmatpush.msra.mxu3 %v4407_v37  ;;  %v4510_v33 = vld [vmem:[%s7557_s11 + $0xdc8] sm:$0xff]  ;;  %v4493_v38 = vld [vmem:[%s7557_s11 + $0xd40] sm:$0xff] }
 0xf0e   :  { %3805 = vmatpush.msrb.mxu1 %v4422_v24  ;;  %3828 = vmatpush.msra.mxu0 %v4438_v15  ;;  %v4464_v24 = vld [vmem:[%s7557_s11 + $0xc58] sm:$0xff]  ;;  %v4509_v37 = vld [vmem:[%s7557_s11 + $0xdc0] sm:$0xff] }
 0xf0f   :  { %3759 = vmatpush.msrb.mxu2 %v4390_v43  ;;  %3782 = vmatpush.msra.mxu3 %v4406_v40  ;;  %v4480_v15 = vld [vmem:[%s7557_s11 + $0xcd8] sm:$0xff] }
 0xf10   :  { %3806 = vmatpush.msrb.mxu1 %v4421_v39  ;;  %3829 = vmatpush.msra.mxu0 %v4437_v41 }
 0xf11   :  { %3760 = vmatpush.msrb.mxu2 %v4389_v45  ;;  %3783 = vmatpush.msra.mxu3 %v4405_v26  ;;  %v4463_v45 = vld [vmem:[%s7557_s11 + $0xc50] sm:$0xff] }
 0xf12   :  { %v4479_v26 = vld [vmem:[%s7557_s11 + $0xcd0] sm:$0xff] }
 0xf24   :  { %v3054_v49 = vpop.f32.mrf.mxu1  ;;  %v3077_v63 = vpop.f32.mrf.mxu0 }
 0xf25   :  { %v3055_v47 = vadd.f32 %v3054_v49, %v2955_v28  ;;  %v3078_v48 = vadd.f32 %v3077_v63, %v2956_v46  ;;  %v4492_v49 = vld [vmem:[%s7557_s11 + $0xd38] sm:$0xff] }
 0xf26   :  { %v4508_v63 = vld [vmem:[%s7557_s11 + $0xdb8] sm:$0xff] }
 0xf27   :  { %v3361_v52 = vmax.f32 %v3055_v47, 0.0  ;;  %v3362_v17 = vmax.f32 %v3078_v48, 0.0  ;;  %v4462_v47 = vld [vmem:[%s7557_s11 + $0xc48] sm:$0xff] }
 0xf28   :  { %v4478_v48 = vld [vmem:[%s7557_s11 + $0xcc8] sm:$0xff] }
 0xf29   :  { %3715 = vmatmul.f32.vlgmr.msra.gmra.mxu1 %v3361_v52  ;;  %3738 = vmatmul.f32.vlgmr.msrb.gmra.mxu0 %v3362_v17  ;;  %v3008_v56 = vpop.f32.mrf.mxu2  ;;  %v3031_v11 = vpop.f32.mrf.mxu3 }
 0xf2a   :  { %3883 = vmatpush.msra.mxu1 %v4500_v53  ;;  %3906 = vmatpush.msrb.mxu0 %v4516_v55  ;;  %v3009_v59 = vadd.f32 %v3008_v56, %v2953_v50  ;;  %v3032_v60 = vadd.f32 %v3031_v11, %v2954_v51  ;;  %v4491_v53 = vld [vmem:[%s7557_s11 + $0xd30] sm:$0xff] }
 0xf2b   :  { %v4507_v55 = vld [vmem:[%s7557_s11 + $0xdb0] sm:$0xff] }
 0xf2c   :  { %v3359_v61 = vmax.f32 %v3009_v59, 0.0  ;;  %v3360_v62 = vmax.f32 %v3032_v60, 0.0  ;;  %3884 = vmatpush.msra.mxu1 %v4499_v54  ;;  %3907 = vmatpush.msrb.mxu0 %v4515_v57  ;;  %v4461_v54 = vld [vmem:[%s7557_s11 + $0xc40] sm:$0xff]  ;;  %v4490_v59 = vld [vmem:[%s7557_s11 + $0xd28] sm:$0xff] }
 0xf2d   :  { %v4477_v57 = vld [vmem:[%s7557_s11 + $0xcc0] sm:$0xff]  ;;  %v4506_v60 = vld [vmem:[%s7557_s11 + $0xda8] sm:$0xff] }
 0xf2e   :  { %3885 = vmatpush.msra.mxu1 %v4498_v29  ;;  %3908 = vmatpush.msrb.mxu0 %v4514_v20 }
 0xf2f   :  { %3669 = vmatmul.f32.vlgmr.msra.gmra.mxu2 %v3359_v61  ;;  %3692 = vmatmul.f32.vlgmr.msrb.gmra.mxu3 %v3360_v62 }
 0xf30   :  { %v3057_v4 = vpop.f32.mrf.mxu1  ;;  %v3080_v5 = vpop.f32.mrf.mxu0  ;;  %3837 = vmatpush.msra.mxu2 %v4468_v18  ;;  %3860 = vmatpush.msrb.mxu3 %v4484_v13  ;;  %v4460_v18 = vld [vmem:[%s7557_s11 + $0xc38] sm:$0xff] }
 0xf31   :  { %v3058_v10 = vadd.f32 %v3057_v4, %v2955_v28  ;;  %v3081_v58 = vadd.f32 %v3080_v5, %v2956_v46  ;;  %3886 = vmatpush.msra.mxu1 %v4497_v2  ;;  %3909 = vmatpush.msrb.mxu0 %v4513_v3  ;;  %v4476_v13 = vld [vmem:[%s7557_s11 + $0xcb8] sm:$0xff]  ;;  %v4489_v2 = vld [vmem:[%s7557_s11 + $0xd20] sm:$0xff] }
 0xf32   :  { %3838 = vmatpush.msra.mxu2 %v4467_v6  ;;  %3861 = vmatpush.msrb.mxu3 %v4483_v8  ;;  %v4505_v3 = vld [vmem:[%s7557_s11 + $0xda0] sm:$0xff]  ;;  %v4459_v6 = vld [vmem:[%s7557_s11 + $0xc30] sm:$0xff] }
 0xf33   :  { %v3377_v1 = vmax.f32 %v3058_v10, 0.0  ;;  %v3378_v22 = vmax.f32 %v3081_v58, 0.0  ;;  %3887 = vmatpush.msra.mxu1 %v4496_v44  ;;  %3910 = vmatpush.msrb.mxu0 %v4512_v0  ;;  %v4475_v8 = vld [vmem:[%s7557_s11 + $0xcb0] sm:$0xff]  ;;  %v4488_v44 = vld [vmem:[%s7557_s11 + $0xd18] sm:$0xff] }
 0xf34   :  { %3839 = vmatpush.msra.mxu2 %v4466_v19  ;;  %3862 = vmatpush.msrb.mxu3 %v4482_v21  ;;  %v4504_v0 = vld [vmem:[%s7557_s11 + $0xd98] sm:$0xff]  ;;  %v4458_v19 = vld [vmem:[%s7557_s11 + $0xc28] sm:$0xff] }
 0xf35   :  { %v3011_v27 = vpop.f32.mrf.mxu2  ;;  %v3034_v7 = vpop.f32.mrf.mxu3  ;;  %3888 = vmatpush.msra.mxu1 %v4495_v25  ;;  %3911 = vmatpush.msrb.mxu0 %v4511_v12  ;;  %v4474_v21 = vld [vmem:[%s7557_s11 + $0xca8] sm:$0xff]  ;;  %v4487_v25 = vld [vmem:[%s7557_s11 + $0xd10] sm:$0xff] }
 0xf36   :  { %v3012_v36 = vadd.f32 %v3011_v27, %v2953_v50  ;;  %v3035_v16 = vadd.f32 %v3034_v7, %v2954_v51  ;;  %3718 = vmatmul.f32.gmra.mxu1 %v3377_v1  ;;  %3741 = vmatmul.f32.gmra.mxu0 %v3378_v22  ;;  %v2957_v50 = vperm.slane %v7058_v35, 4  ;;  %v2958_v51 = vperm.slane %v7058_v35, 5  ;;  %v4503_v12 = vld [vmem:[%s7557_s11 + $0xd90] sm:$0xff]  ;;  %v7241_v27 = vld [vmem:[%s7558_s10 + $0x18] sm:$0xff]  ;;  %v4457_v7 = vld [vmem:[%s7557_s11 + $0xc20] sm:$0xff] }
 0xf37   :  { %3840 = vmatpush.msra.mxu2 %v4465_v34  ;;  %3863 = vmatpush.msrb.mxu3 %v4481_v14  ;;  %v4501_v35 = vld [vmem:[%s7557_s11 + $0xd80] sm:$0xff] }
 0xf38   :  { %v3146_v39 = vpop.f32.mrf.mxu1  ;;  %v3169_v41 = vpop.f32.mrf.mxu0  ;;  %3889 = vmatpush.msra.mxu1 %v4494_v32  ;;  %3912 = vmatpush.msrb.mxu0 %v4510_v33  ;;  %v3375_v28 = vmax.f32 %v3012_v36, 0.0  ;;  %v3376_v46 = vmax.f32 %v3035_v16, 0.0  ;;  %v4502_v32 = vld [vmem:[%s7557_s11 + $0xd88] sm:$0xff]  ;;  %v4456_v16 = vld [vmem:[%s7557_s11 + $0xc18] sm:$0xff] }
 0xf39   :  { %v3147_v43 = vadd.f32 %v3146_v39, %v2959_v30  ;;  %v3170_v40 = vadd.f32 %v3169_v41, %v2960_v31  ;;  %3841 = vmatpush.msra.mxu2 %v4464_v24  ;;  %3864 = vmatpush.msrb.mxu3 %v4480_v15  ;;  %v4472_v24 = vld [vmem:[%s7557_s11 + $0xc98] sm:$0xff]  ;;  %v2963_v15 = vperm.slane %v7241_v27, 2 }
 0xf3a   :  { %3890 = vmatpush.msra.mxu1 %v4493_v38  ;;  %3913 = vmatpush.msrb.mxu0 %v4509_v37  ;;  %v2964_v38 = vperm.slane %v7241_v27, 3  ;;  %v4485_v37 = vld [vmem:[%s7557_s11 + $0xd00] sm:$0xff] }
 0xf3b   :  { %3842 = vmatpush.msra.mxu2 %v4463_v45  ;;  %3865 = vmatpush.msrb.mxu3 %v4479_v26  ;;  %v3365_v52 = vmax.f32 %v3147_v43, 0.0  ;;  %v3366_v17 = vmax.f32 %v3170_v40, 0.0  ;;  %v4564_v43 = vld [vmem:[%s7557_s11 + $0xf78] sm:$0xff]  ;;  %v4455_v45 = vld [vmem:[%s7557_s11 + $0xc10] sm:$0xff] }
 0xf3c   :  { %3891 = vmatpush.msra.mxu1 %v4492_v49  ;;  %3914 = vmatpush.msrb.mxu0 %v4508_v63  ;;  %v4580_v40 = vld [vmem:[%s7557_s11 + $0xff8] sm:$0xff]  ;;  %v4471_v26 = vld [vmem:[%s7557_s11 + $0xc90] sm:$0xff] }
 0xf3d   :  { %v3100_v56 = vpop.f32.mrf.mxu2  ;;  %v3123_v11 = vpop.f32.mrf.mxu3  ;;  %3672 = vmatmul.f32.gmra.mxu2 %v3375_v28  ;;  %3695 = vmatmul.f32.gmra.mxu3 %v3376_v46 }
 0xf3e   :  { %3843 = vmatpush.msra.mxu2 %v4462_v47  ;;  %3866 = vmatpush.msrb.mxu3 %v4478_v48  ;;  %v3101_v29 = vadd.f32 %v3100_v56, %v2957_v50  ;;  %v3124_v20 = vadd.f32 %v3123_v11, %v2958_v51  ;;  %v4563_v47 = vld [vmem:[%s7557_s11 + $0xf70] sm:$0xff] }
 0xf3f   :  { %3892 = vmatpush.msra.mxu1 %v4491_v53  ;;  %3915 = vmatpush.msrb.mxu0 %v4507_v55  ;;  %v4579_v48 = vld [vmem:[%s7557_s11 + $0xff0] sm:$0xff]  ;;  %v2961_v53 = vperm.slane %v7241_v27, 0  ;;  %v2962_v55 = vperm.slane %v7241_v27, 1 }
 0xf40   :  { %v3149_v61 = vpop.f32.mrf.mxu1  ;;  %v3172_v62 = vpop.f32.mrf.mxu0  ;;  %3807 = vmatmul.f32.vlgmr.msrb.gmra.mxu1 %v3365_v52  ;;  %3830 = vmatmul.f32.vlgmr.msra.gmra.mxu0 %v3366_v17  ;;  %v3363_v10 = vmax.f32 %v3101_v29, 0.0  ;;  %v3364_v58 = vmax.f32 %v3124_v20, 0.0  ;;  %v4562_v52 = vld [vmem:[%s7557_s11 + $0xf68] sm:$0xff]  ;;  %v4532_v29 = vld [vmem:[%s7557_s11 + $0xe78] sm:$0xff] }
 0xf41   :  { %3844 = vmatpush.msra.mxu2 %v4461_v54  ;;  %3867 = vmatpush.msrb.mxu3 %v4477_v57  ;;  %v3150_v4 = vadd.f32 %v3149_v61, %v2959_v30  ;;  %v3173_v5 = vadd.f32 %v3172_v62, %v2960_v31  ;;  %v4473_v30 = vld [vmem:[%s7557_s11 + $0xca0] sm:$0xff]  ;;  %v4486_v31 = vld [vmem:[%s7557_s11 + $0xd08] sm:$0xff]  ;;  %v4548_v20 = vld [vmem:[%s7557_s11 + $0xef8] sm:$0xff] }
 0xf42   :  { %3893 = vmatpush.msra.mxu1 %v4490_v59  ;;  %3916 = vmatpush.msrb.mxu0 %v4506_v60  ;;  %v4578_v17 = vld [vmem:[%s7557_s11 + $0xfe8] sm:$0xff]  ;;  %v4453_v54 = vld [vmem:[%s7557_s11 + $0xc00] sm:$0xff] }
 0xf43   :  { %3845 = vmatpush.msra.mxu2 %v4460_v18  ;;  %3868 = vmatpush.msrb.mxu3 %v4476_v13  ;;  %v3381_v1 = vmax.f32 %v3150_v4, 0.0  ;;  %v3382_v22 = vmax.f32 %v3173_v5, 0.0  ;;  %v4469_v57 = vld [vmem:[%s7557_s11 + $0xc80] sm:$0xff]  ;;  %v4531_v4 = vld [vmem:[%s7557_s11 + $0xe70] sm:$0xff] }
 0xf44   :  { %3894 = vmatpush.msra.mxu1 %v4489_v2  ;;  %3917 = vmatpush.msrb.mxu0 %v4505_v3  ;;  %v4561_v18 = vld [vmem:[%s7557_s11 + $0xf60] sm:$0xff]  ;;  %v4547_v5 = vld [vmem:[%s7557_s11 + $0xef0] sm:$0xff] }
 0xf45   :  { %3846 = vmatpush.msra.mxu2 %v4459_v6  ;;  %3869 = vmatpush.msrb.mxu3 %v4475_v8  ;;  %v3103_v34 = vpop.f32.mrf.mxu2  ;;  %v3126_v14 = vpop.f32.mrf.mxu3  ;;  %v4577_v13 = vld [vmem:[%s7557_s11 + $0xfe0] sm:$0xff]  ;;  %v4560_v6 = vld [vmem:[%s7557_s11 + $0xf58] sm:$0xff] }
 0xf46   :  { %3895 = vmatpush.msra.mxu1 %v4488_v44  ;;  %3918 = vmatpush.msrb.mxu0 %v4504_v0  ;;  %v3104_v33 = vadd.f32 %v3103_v34, %v2957_v50  ;;  %v3127_v36 = vadd.f32 %v3126_v14, %v2958_v51  ;;  %v4454_v50 = vld [vmem:[%s7557_s11 + $0xc08] sm:$0xff]  ;;  %v4576_v8 = vld [vmem:[%s7557_s11 + $0xfd8] sm:$0xff] }
 0xf47   :  { %3761 = vmatmul.f32.vlgmr.msrb.gmra.mxu2 %v3363_v10  ;;  %3784 = vmatmul.f32.vlgmr.msra.gmra.mxu3 %v3364_v58  ;;  %v4470_v51 = vld [vmem:[%s7557_s11 + $0xc88] sm:$0xff] }
 0xf48   :  { %3847 = vmatpush.msra.mxu2 %v4458_v19  ;;  %3870 = vmatpush.msrb.mxu3 %v4474_v21  ;;  %v3238_v39 = vpop.f32.mrf.mxu1  ;;  %v3261_v41 = vpop.f32.mrf.mxu0  ;;  %v3379_v28 = vmax.f32 %v3104_v33, 0.0  ;;  %v3380_v46 = vmax.f32 %v3127_v36, 0.0  ;;  %v4530_v44 = vld [vmem:[%s7557_s11 + $0xe68] sm:$0xff]  ;;  %v4528_v33 = vld [vmem:[%s7557_s11 + $0xe58] sm:$0xff] }
 0xf49   :  { %3896 = vmatpush.msra.mxu1 %v4487_v25  ;;  %3919 = vmatpush.msrb.mxu0 %v4503_v12  ;;  %v3239_v49 = vadd.f32 %v3238_v39, %v2963_v15  ;;  %v3262_v63 = vadd.f32 %v3261_v41, %v2964_v38  ;;  %v4546_v0 = vld [vmem:[%s7557_s11 + $0xee8] sm:$0xff]  ;;  %v4529_v25 = vld [vmem:[%s7557_s11 + $0xe60] sm:$0xff]  ;;  %v4544_v36 = vld [vmem:[%s7557_s11 + $0xed8] sm:$0xff] }
 0xf4a   :  { %3810 = vmatmul.f32.gmra.mxu1 %v3381_v1  ;;  %3833 = vmatmul.f32.gmra.mxu0 %v3382_v22  ;;  %v4559_v1 = vld [vmem:[%s7557_s11 + $0xf50] sm:$0xff]  ;;  %v4545_v12 = vld [vmem:[%s7557_s11 + $0xee0] sm:$0xff]  ;;  %v4556_v39 = vld [vmem:[%s7557_s11 + $0xf38] sm:$0xff] }
 0xf4b   :  { %3848 = vmatpush.msra.mxu2 %v4457_v7  ;;  %3871 = vmatpush.msrb.mxu3 %v4473_v30  ;;  %v3369_v56 = vmax.f32 %v3239_v49, 0.0  ;;  %v3370_v11 = vmax.f32 %v3262_v63, 0.0  ;;  %v4575_v22 = vld [vmem:[%s7557_s11 + $0xfd0] sm:$0xff]  ;;  %v4558_v7 = vld [vmem:[%s7557_s11 + $0xf48] sm:$0xff]  ;;  %v4572_v41 = vld [vmem:[%s7557_s11 + $0xfb8] sm:$0xff] }
 0xf4c   :  { %3897 = vmatpush.msra.mxu1 %v4486_v31  ;;  %3920 = vmatpush.msrb.mxu0 %v4502_v32  ;;  %v4574_v30 = vld [vmem:[%s7557_s11 + $0xfc8] sm:$0xff]  ;;  %v4525_v49 = vld [vmem:[%s7557_s11 + $0xe40] sm:$0xff] }
 0xf4d   :  { %3849 = vmatpush.msra.mxu2 %v4456_v16  ;;  %3872 = vmatpush.msrb.mxu3 %v4472_v24  ;;  %v3192_v59 = vpop.f32.mrf.mxu2  ;;  %v3215_v60 = vpop.f32.mrf.mxu3  ;;  %v4541_v63 = vld [vmem:[%s7557_s11 + $0xec0] sm:$0xff] }
 0xf4e   :  { %3898 = vmatpush.msra.mxu1 %v4485_v37  ;;  %3921 = vmatpush.msrb.mxu0 %v4501_v35  ;;  %v3193_v61 = vadd.f32 %v3192_v59, %v2961_v53  ;;  %v3216_v62 = vadd.f32 %v3215_v60, %v2962_v55  ;;  %v4527_v37 = vld [vmem:[%s7557_s11 + $0xe50] sm:$0xff]  ;;  %v4552_v59 = vld [vmem:[%s7557_s11 + $0xf18] sm:$0xff] }
 0xf4f   :  { %3850 = vmatpush.msra.mxu2 %v4455_v45  ;;  %3873 = vmatpush.msrb.mxu3 %v4471_v26  ;;  %v4543_v35 = vld [vmem:[%s7557_s11 + $0xed0] sm:$0xff]  ;;  %v4568_v60 = vld [vmem:[%s7557_s11 + $0xf98] sm:$0xff] }
 0xf50   :  { %3975 = vmatpush.msrb.mxu1 %v4564_v43  ;;  %3998 = vmatpush.msra.mxu0 %v4580_v40  ;;  %v3241_v2 = vpop.f32.mrf.mxu1  ;;  %v3264_v3 = vpop.f32.mrf.mxu0  ;;  %v3367_v19 = vmax.f32 %v3193_v61, 0.0  ;;  %v3368_v21 = vmax.f32 %v3216_v62, 0.0  ;;  %v4526_v43 = vld [vmem:[%s7557_s11 + $0xe48] sm:$0xff]  ;;  %v4551_v61 = vld [vmem:[%s7557_s11 + $0xf10] sm:$0xff] }
 0xf51   :  { %3764 = vmatmul.f32.gmra.mxu2 %v3379_v28  ;;  %3787 = vmatmul.f32.gmra.mxu3 %v3380_v46  ;;  %v3242_v10 = vadd.f32 %v3241_v2, %v2963_v15  ;;  %v3265_v58 = vadd.f32 %v3264_v3, %v2964_v38  ;;  %v4557_v15 = vld [vmem:[%s7557_s11 + $0xf40] sm:$0xff]  ;;  %v4542_v40 = vld [vmem:[%s7557_s11 + $0xec8] sm:$0xff]  ;;  %v4555_v28 = vld [vmem:[%s7557_s11 + $0xf30] sm:$0xff] }
 0xf52   :  { %3976 = vmatpush.msrb.mxu1 %v4563_v47  ;;  %3999 = vmatpush.msra.mxu0 %v4579_v48  ;;  %v4573_v38 = vld [vmem:[%s7557_s11 + $0xfc0] sm:$0xff]  ;;  %v4571_v46 = vld [vmem:[%s7557_s11 + $0xfb0] sm:$0xff]  ;;  %v4554_v47 = vld [vmem:[%s7557_s11 + $0xf28] sm:$0xff] }
 0xf53   :  { %3851 = vmatpush.msra.mxu2 %v4454_v50  ;;  %3874 = vmatpush.msrb.mxu3 %v4470_v51  ;;  %v3385_v34 = vmax.f32 %v3242_v10, 0.0  ;;  %v3386_v14 = vmax.f32 %v3265_v58, 0.0  ;;  %v4570_v48 = vld [vmem:[%s7557_s11 + $0xfa8] sm:$0xff]  ;;  %v4524_v50 = vld [vmem:[%s7557_s11 + $0xe38] sm:$0xff]  ;;  %v4567_v62 = vld [vmem:[%s7557_s11 + $0xf90] sm:$0xff] }
 0xf54   :  { %3977 = vmatpush.msrb.mxu1 %v4562_v52  ;;  %4000 = vmatpush.msra.mxu0 %v4578_v17  ;;  %v4540_v51 = vld [vmem:[%s7557_s11 + $0xeb8] sm:$0xff]  ;;  %v4553_v52 = vld [vmem:[%s7557_s11 + $0xf20] sm:$0xff] }
 0xf55   :  { %3852 = vmatpush.msra.mxu2 %v4453_v54  ;;  %3875 = vmatpush.msrb.mxu3 %v4469_v57  ;;  %v3195_v31 = vpop.f32.mrf.mxu2  ;;  %v3218_v32 = vpop.f32.mrf.mxu3  ;;  %v4569_v17 = vld [vmem:[%s7557_s11 + $0xfa0] sm:$0xff]  ;;  %v2967_v54 = vperm.slane %v7241_v27, 6  ;;  %v2968_v57 = vperm.slane %v7241_v27, 7  ;;  %v4520_v10 = vld [vmem:[%s7557_s11 + $0xe18] sm:$0xff] }
 0xf56   :  { %3899 = vmatmul.f32.vlgmr.msra.gmra.mxu1 %v3369_v56  ;;  %3922 = vmatmul.f32.vlgmr.msrb.gmra.mxu0 %v3370_v11  ;;  %v3196_v16 = vadd.f32 %v3195_v31, %v2961_v53  ;;  %v3219_v24 = vadd.f32 %v3218_v32, %v2962_v55  ;;  %v4523_v56 = vld [vmem:[%s7557_s11 + $0xe30] sm:$0xff]  ;;  %v4536_v58 = vld [vmem:[%s7557_s11 + $0xe98] sm:$0xff]  ;;  %v4534_v31 = vld [vmem:[%s7557_s11 + $0xe88] sm:$0xff] }
 0xf57   :  { %3929 = vmatpush.msrb.mxu2 %v4532_v29  ;;  %3952 = vmatpush.msra.mxu3 %v4548_v20  ;;  %v4539_v11 = vld [vmem:[%s7557_s11 + $0xeb0] sm:$0xff]  ;;  %v4522_v29 = vld [vmem:[%s7557_s11 + $0xe28] sm:$0xff] }
 0xf58   :  { %3978 = vmatpush.msrb.mxu1 %v4561_v18  ;;  %4001 = vmatpush.msra.mxu0 %v4577_v13  ;;  %v3383_v45 = vmax.f32 %v3196_v16, 0.0  ;;  %v3384_v26 = vmax.f32 %v3219_v24, 0.0  ;;  %v3330_v53 = vpop.f32.mrf.mxu1  ;;  %v3353_v55 = vpop.f32.mrf.mxu0  ;;  %v4538_v20 = vld [vmem:[%s7557_s11 + $0xea8] sm:$0xff]  ;;  %v4521_v18 = vld [vmem:[%s7557_s11 + $0xe20] sm:$0xff] }
 0xf59   :  { %3930 = vmatpush.msrb.mxu2 %v4531_v4  ;;  %3953 = vmatpush.msra.mxu3 %v4547_v5  ;;  %v4537_v13 = vld [vmem:[%s7557_s11 + $0xea0] sm:$0xff]  ;;  %v3331_v2 = vadd.f32 %v3330_v53, %v2967_v54  ;;  %v3354_v3 = vadd.f32 %v3353_v55, %v2968_v57  ;;  %v4550_v4 = vld [vmem:[%s7557_s11 + $0xf08] sm:$0xff] }
 0xf5a   :  { %3979 = vmatpush.msrb.mxu1 %v4560_v6  ;;  %4002 = vmatpush.msra.mxu0 %v4576_v8  ;;  %v4566_v5 = vld [vmem:[%s7557_s11 + $0xf88] sm:$0xff]  ;;  %v4533_v16 = vld [vmem:[%s7557_s11 + $0xe80] sm:$0xff] }
 0xf5b   :  { %3931 = vmatpush.msrb.mxu2 %v4530_v44  ;;  %3954 = vmatpush.msra.mxu3 %v4546_v0  ;;  %v2965_v44 = vperm.slane %v7241_v27, 4  ;;  %v2966_v0 = vperm.slane %v7241_v27, 5  ;;  %v4519_v27 = vld [vmem:[%s7557_s11 + $0xe10] sm:$0xff] }
 0xf5c   :  { %3980 = vmatpush.msrb.mxu1 %v4559_v1  ;;  %4003 = vmatpush.msra.mxu0 %v4575_v22  ;;  %v3373_v1 = vmax.f32 %v3331_v2, 0.0  ;;  %v3374_v22 = vmax.f32 %v3354_v3, 0.0 }
 0xf5d   :  { %3853 = vmatmul.f32.vlgmr.msra.gmra.mxu2 %v3367_v19  ;;  %3876 = vmatmul.f32.vlgmr.msrb.gmra.mxu3 %v3368_v21  ;;  %v3284_v6 = vpop.f32.mrf.mxu2  ;;  %v3307_v8 = vpop.f32.mrf.mxu3  ;;  %v4549_v19 = vld [vmem:[%s7557_s11 + $0xf00] sm:$0xff] }
 0xf5e   :  { %3932 = vmatpush.msrb.mxu2 %v4529_v25  ;;  %3955 = vmatpush.msra.mxu3 %v4545_v12  ;;  %v4565_v21 = vld [vmem:[%s7557_s11 + $0xf80] sm:$0xff]  ;;  %v4535_v25 = vld [vmem:[%s7557_s11 + $0xe90] sm:$0xff] }
 0xf5f   :  { %3981 = vmatpush.msrb.mxu1 %v4558_v7  ;;  %4004 = vmatpush.msra.mxu0 %v4574_v30  ;;  %v3308_v7 = vadd.f32 %v3307_v8, %v2966_v0  ;;  %v4518_v30 = vld [vmem:[%s7557_s11 + $0xe08] sm:$0xff] }
 0xf60   :  { %3902 = vmatmul.f32.gmra.mxu1 %v3385_v34  ;;  %3925 = vmatmul.f32.gmra.mxu0 %v3386_v14  ;;  %v3333_v12 = vpop.f32.mrf.mxu1  ;;  %v3356_v34 = vpop.f32.mrf.mxu0  ;;  %v3285_v14 = vadd.f32 %v3284_v6, %v2965_v44 }
 0xf61   :  { %3933 = vmatpush.msrb.mxu2 %v4528_v33  ;;  %3956 = vmatpush.msra.mxu3 %v4544_v36  ;;  %v3334_v32 = vadd.f32 %v3333_v12, %v2967_v54  ;;  %v3357_v33 = vadd.f32 %v3356_v34, %v2968_v57  ;;  %v4517_v36 = vld [vmem:[%s7557_s11 + $0xe00] sm:$0xff] }
 0xf62   :  { %3982 = vmatpush.msrb.mxu1 %v4557_v15  ;;  %4005 = vmatpush.msra.mxu0 %v4573_v38  ;;  %v3371_v24 = vmax.f32 %v3285_v14, 0.0  ;;  %v3372_v15 = vmax.f32 %v3308_v7, 0.0 }
 0xf63   :  { %3934 = vmatpush.msrb.mxu2 %v4527_v37  ;;  %3957 = vmatpush.msra.mxu3 %v4543_v35  ;;  %v3389_v35 = vmax.f32 %v3334_v32, 0.0 }
 0xf64   :  { %3983 = vmatpush.msrb.mxu1 %v4556_v39  ;;  %4006 = vmatpush.msra.mxu0 %v4572_v41  ;;  %v3390_v39 = vmax.f32 %v3357_v33, 0.0 }
 0xf65   :  { %3935 = vmatpush.msrb.mxu2 %v4526_v43  ;;  %3958 = vmatpush.msra.mxu3 %v4542_v40  ;;  %v3287_v38 = vpop.f32.mrf.mxu2  ;;  %v3310_v37 = vpop.f32.mrf.mxu3 }
 0xf66   :  { %3984 = vmatpush.msrb.mxu1 %v4555_v28  ;;  %4007 = vmatpush.msra.mxu0 %v4571_v46  ;;  %v3288_v41 = vadd.f32 %v3287_v38, %v2965_v44  ;;  %v3311_v43 = vadd.f32 %v3310_v37, %v2966_v0 }
 0xf67   :  { %3856 = vmatmul.f32.gmra.mxu2 %v3383_v45  ;;  %3879 = vmatmul.f32.gmra.mxu3 %v3384_v26 }
 0xf68   :  { %3936 = vmatpush.msrb.mxu2 %v4525_v49  ;;  %3959 = vmatpush.msra.mxu3 %v4541_v63  ;;  %v3387_v40 = vmax.f32 %v3288_v41, 0.0  ;;  %v3388_v45 = vmax.f32 %v3311_v43, 0.0 }
 0xf69   :  { %3985 = vmatpush.msrb.mxu1 %v4554_v47  ;;  %4008 = vmatpush.msra.mxu0 %v4570_v48 }
 0xf6a   :  { %3937 = vmatpush.msrb.mxu2 %v4524_v50  ;;  %3960 = vmatpush.msra.mxu3 %v4540_v51  ;;  %v4619_v50 = vld [vmem:[%s7559_s12 + $0x1] ss:$0 sm:$0xff] }
 0xf6b   :  { %3986 = vmatpush.msrb.mxu1 %v4553_v52  ;;  %4009 = vmatpush.msra.mxu0 %v4569_v17 }
 0xf6c   :  { %3938 = vmatpush.msrb.mxu2 %v4523_v56  ;;  %3961 = vmatpush.msra.mxu3 %v4539_v11 }
 0xf6d   :  { %3987 = vmatpush.msrb.mxu1 %v4552_v59  ;;  %4010 = vmatpush.msra.mxu0 %v4568_v60 }
 0xf6e   :  { %3939 = vmatpush.msrb.mxu2 %v4522_v29  ;;  %3962 = vmatpush.msra.mxu3 %v4538_v20 }
 0xf6f   :  { %3988 = vmatpush.msrb.mxu1 %v4551_v61  ;;  %4011 = vmatpush.msra.mxu0 %v4567_v62 }
 0xf70   :  { %3940 = vmatpush.msrb.mxu2 %v4521_v18  ;;  %3963 = vmatpush.msra.mxu3 %v4537_v13 }
 0xf71   :  { %3989 = vmatpush.msrb.mxu1 %v4550_v4  ;;  %4012 = vmatpush.msra.mxu0 %v4566_v5 }
 0xf72   :  { %3941 = vmatpush.msrb.mxu2 %v4520_v10  ;;  %3964 = vmatpush.msra.mxu3 %v4536_v58 }
 0xf73   :  { %3990 = vmatpush.msrb.mxu1 %v4549_v19  ;;  %4013 = vmatpush.msra.mxu0 %v4565_v21 }
 0xf74   :  { %3991 = vmatmul.f32.vlgmr.msrb.gmra.mxu1 %v3373_v1  ;;  %4014 = vmatmul.f32.vlgmr.msra.gmra.mxu0 %v3374_v22 }
 0xf75   :  { %3942 = vmatpush.msrb.mxu2 %v4519_v27  ;;  %3965 = vmatpush.msra.mxu3 %v4535_v25 }
 0xf77   :  { %3943 = vmatpush.msrb.mxu2 %v4518_v30  ;;  %3966 = vmatpush.msra.mxu3 %v4534_v31 }
 0xf79   :  { %3944 = vmatpush.msrb.mxu2 %v4517_v36  ;;  %3967 = vmatpush.msra.mxu3 %v4533_v16 }
 0xf7a   :  { %3945 = vmatmul.f32.vlgmr.msrb.gmra.mxu2 %v3371_v24  ;;  %3968 = vmatmul.f32.vlgmr.msra.gmra.mxu3 %v3372_v15 }
 0xf7c   :  { %3994 = vmatmul.f32.gmra.mxu1 %v3389_v35  ;;  %4017 = vmatmul.f32.gmra.mxu0 %v3390_v39 }
 0xf82   :  { %3948 = vmatmul.f32.gmra.mxu2 %v3387_v40  ;;  %3971 = vmatmul.f32.gmra.mxu3 %v3388_v45 }
 0xfa6   :  { %v3716_v46 = vpop.f32.mrf.mxu1  ;;  %v3739_v49 = vpop.f32.mrf.mxu0 }
 0xfb2   :  { %v3670_v26 = vpop.f32.mrf.mxu2  ;;  %v3693_v28 = vpop.f32.mrf.mxu3 }
 0xfb3   :  { %v3719_v48 = vpop.f32.mrf.mxu1  ;;  %v3742_v51 = vpop.f32.mrf.mxu0  ;;  %v3671_v52 = vadd.f32 %v4619_v50, %v3670_v26 }
 0xfb5   :  { %v3694_v55 = vadd.f32 %v3693_v28, %v3671_v52 }
 0xfb7   :  { %v3717_v54 = vadd.f32 %v3716_v46, %v3694_v55 }
 0xfb9   :  { %v3740_v60 = vadd.f32 %v3739_v49, %v3717_v54 }
 0xfbd   :  { %v3808_v56 = vpop.f32.mrf.mxu1  ;;  %v3831_v11 = vpop.f32.mrf.mxu0 }
 0xfc0   :  { %v3673_v63 = vpop.f32.mrf.mxu2  ;;  %v3696_v47 = vpop.f32.mrf.mxu3 }
 0xfc1   :  { %v3674_v57 = vadd.f32 %v4619_v50, %v3673_v63 }
 0xfc3   :  { %v3697_v59 = vadd.f32 %v3696_v47, %v3674_v57 }
 0xfc5   :  { %v3720_v18 = vadd.f32 %v3719_v48, %v3697_v59  ;;  %v4083_v59 = vld [vmem:[%s7562_s15 + $0x10] sm:$0xff] }
 0xfc7   :  { %v3811_v62 = vpop.f32.mrf.mxu1  ;;  %v3834_v13 = vpop.f32.mrf.mxu0  ;;  %v3743_v3 = vadd.f32 %v3742_v51, %v3720_v18  ;;  %v22_v18 = vstv %s7563_s16 }
 0xfc8   :  { %23 = vst [vmem:[#allocation2] sm:$0x1] %v22_v18 }
 0xfca   :  { %v3762_v17 = vpop.f32.mrf.mxu2  ;;  %v3785_v53 = vpop.f32.mrf.mxu3 }
 0xfcb   :  { %v3763_v61 = vadd.f32 %v3762_v17, %v3740_v60  ;;  %v4082_v60 = vld [vmem:[%s7562_s15 + $0x8] sm:$0xff] }
 0xfcd   :  { %v3786_v2 = vadd.f32 %v3785_v53, %v3763_v61 }
 0xfcf   :  { %v3809_v4 = vadd.f32 %v3808_v56, %v3786_v2 }
 0xfd1   :  { %v3832_v44 = vadd.f32 %v3831_v11, %v3809_v4 }
 0xfd3   :  { %v3900_v10 = vpop.f32.mrf.mxu1  ;;  %v3923_v0 = vpop.f32.mrf.mxu0 }
 0xfd4   :  { %v3765_v29 = vpop.f32.mrf.mxu2  ;;  %v3788_v20 = vpop.f32.mrf.mxu3 }
 0xfd5   :  { %v3766_v5 = vadd.f32 %v3765_v29, %v3743_v3  ;;  %v4081_v29 = vld [vmem:[%s7562_s15] sm:$0xff] }
 0xfd7   :  { %v3789_v58 = vadd.f32 %v3788_v20, %v3766_v5 }
 0xfd9   :  { %v3812_v21 = vadd.f32 %v3811_v62, %v3789_v58 }
 0xfdb   :  { %v3835_v25 = vadd.f32 %v3834_v13, %v3812_v21 }
 0xfdd   :  { %v3903_v12 = vpop.f32.mrf.mxu1  ;;  %v3926_v7 = vpop.f32.mrf.mxu0 }
 0xfe0   :  { %v3854_v6 = vpop.f32.mrf.mxu2  ;;  %v3877_v8 = vpop.f32.mrf.mxu3 }
 0xfe1   :  { %v3855_v19 = vadd.f32 %v3854_v6, %v3832_v44 }
 0xfe3   :  { %v3878_v1 = vadd.f32 %v3877_v8, %v3855_v19  ;;  %v4620_v19 = vld [vmem:[%s7560_s13 + $0x1] ss:$0 sm:$0xff] }
 0xfe5   :  { %v3901_v34 = vadd.f32 %v3900_v10, %v3878_v1 }
 0xfe7   :  { %v3924_v31 = vadd.f32 %v3923_v0, %v3901_v34 }
 0xfea   :  { %v3857_v22 = vpop.f32.mrf.mxu2  ;;  %v3880_v27 = vpop.f32.mrf.mxu3 }
 0xfeb   :  { %v3858_v14 = vadd.f32 %v3857_v22, %v3835_v25 }
 0xfed   :  { %v3881_v30 = vadd.f32 %v3880_v27, %v3858_v14 }
 0xfef   :  { %v3904_v24 = vadd.f32 %v3903_v12, %v3881_v30 }
 0xff1   :  { %v3992_v16 = vpop.f32.mrf.mxu1  ;;  %v4015_v38 = vpop.f32.mrf.mxu0  ;;  %v3927_v35 = vadd.f32 %v3926_v7, %v3904_v24 }
 0xff9   :  { %v3995_v46 = vpop.f32.mrf.mxu1  ;;  %v4018_v63 = vpop.f32.mrf.mxu0 }
 0xffd   :  { %v3946_v32 = vpop.f32.mrf.mxu2  ;;  %v3969_v33 = vpop.f32.mrf.mxu3 }
 0xffe   :  { %v3947_v36 = vadd.f32 %v3946_v32, %v3924_v31 }
0x1000   :  { %v3970_v15 = vadd.f32 %v3969_v33, %v3947_v36  ;;  %v4622_v33 = vld [vmem:[#allocation2] ss:$0 sm:$0xff] }
0x1002   :  { %v3993_v37 = vadd.f32 %v3992_v16, %v3970_v15 }
0x1004   :  { %v4016_v39 = vadd.f32 %v4015_v38, %v3993_v37 }
0x1005   :  { %v3949_v41 = vpop.f32.mrf.mxu2  ;;  %v3972_v45 = vpop.f32.mrf.mxu3 }
0x1006   :  { %v3950_v43 = vadd.f32 %v3949_v41, %v3927_v35  ;;  %v4021_v40 = vadd.f32 %v4016_v39, %v6505_v42 }
0x1008   :  { %v3973_v26 = vadd.f32 %v3972_v45, %v3950_v43  ;;  %v4027_v28 = vsel %vm103_vm1, %v4021_v40, 0.0 }
0x1009   :  { %4028 = vadd.xlane.f32.xlu2 %v4027_v28 }
0x100a   :  { %v3996_v49 = vadd.f32 %v3995_v46, %v3973_v26 }
0x100c   :  { %v4019_v47 = vadd.f32 %v4018_v63, %v3996_v49 }
0x100e   :  { %v4022_v48 = vadd.f32 %v4019_v47, %v6565_v23  ;;  %v4084_v23 = vld [vmem:[%s7562_s15 + $0x18] sm:$0xff] }
0x100f   :  { %4107 = vmatpush.msra.mxu2 %v4084_v23 }
0x1010   :  { %v4030_v50 = vsel %vm103_vm1, %v4022_v48, 0.0 }
0x1011   :  { %4031 = vadd.xlane.f32.xlu0 %v4030_v50  ;;  %4108 = vmatpush.msra.mxu2 %v4083_v59 }
0x1013   :  { %4109 = vmatpush.msra.mxu2 %v4082_v60 }
0x1015   :  { %4110 = vmatpush.msra.mxu2 %v4081_v29 }
0x107c   :  { %v4029_v51 = vpop.xlane.xlu2 %4028 }
0x107d   :  { %v4033_v52 = vmul.f32 %v4029_v51, %v5011_v9 }
0x107f   :  { %v4035_v17 = vsub.f32 %v4021_v40, %v4033_v52 }
0x1081   :  { %v4037_v53 = vmul.f32 %v4035_v17, %v4035_v17 }
0x1083   :  { %v4039_v42 = vsel %vm103_vm1, %v4037_v53, 0.0 }
0x1084   :  { %4040 = vadd.xlane.f32.xlu2 %v4039_v42  ;;  %v4032_v55 = vpop.xlane.xlu0 %4031 }
0x1085   :  { %v4034_v56 = vmul.f32 %v4032_v55, %v5011_v9 }
0x1087   :  { %v4036_v11 = vsub.f32 %v4022_v48, %v4034_v56 }
0x1089   :  { %v4038_v54 = vmul.f32 %v4036_v11, %v4036_v11 }
0x108b   :  { %v4042_v57 = vsel %vm103_vm1, %v4038_v54, 0.0 }
0x108c   :  { %4043 = vadd.xlane.f32.xlu0 %v4042_v57 }
0x10f7   :  { %v4041_v20 = vpop.xlane.xlu2 %4040 }
0x10f8   :  { %v4045_v61 = vmul.f32 %v4041_v20, %v5011_v9 }
0x10fa   :  { %v4047_v62 = vadd.f32 1e-05, %v4045_v61 }
0x10fc   :  { %4701 = vrsqrt.f32 %v4047_v62  ;;  %vm4055_vm9 = vweird.f32 %v4047_v62 }
0x10ff   :  { %v4044_v13 = vpop.xlane.xlu0 %4043 }
0x1100   :  { %v4046_v2 = vmul.f32 %v4044_v13, %v5011_v9  ;;  %v4621_v9 = vld [vmem:[%s7561_s14 + $0x1] ss:$0 sm:$0xff] }
0x1102   :  { %v4702_v3 = vpop.eup %4701  ;;  %v4048_v4 = vadd.f32 1e-05, %v4046_v2 }
0x1103   :  { %v4050_v5 = vmul.f32 %v4702_v3, %v4047_v62  ;;  %vm4056_vm8 = vweird.f32 %v4702_v3 }
0x1104   :  { %4703 = vrsqrt.f32 %v4048_v4  ;;  %vm4057_vm10 = vmor %vm4055_vm9, %vm4056_vm8  ;;  %vm4065_vm12 = vweird.f32 %v4048_v4 }
0x1105   :  { %v4051_v6 = vmul.f32 %v4702_v3, %v4050_v5 }
0x1107   :  { %v4052_v8 = vmul.f32 0.5, %v4051_v6 }
0x1109   :  { %v4053_v10 = vsub.f32 1.5, %v4052_v8 }
0x110a   :  { %v4704_v58 = vpop.eup %4703 }
0x110b   :  { %v4054_v44 = vmul.f32 %v4702_v3, %v4053_v10  ;;  %v4060_v0 = vmul.f32 %v4704_v58, %v4048_v4  ;;  %vm4066_vm11 = vweird.f32 %v4704_v58 }
0x110c   :  { %vm4067_vm13 = vmor %vm4065_vm12, %vm4066_vm11 }
0x110d   :  { %v4058_v21 = vsel %vm4057_vm10, %v4702_v3, %v4054_v44  ;;  %v4061_v1 = vmul.f32 %v4704_v58, %v4060_v0 }
0x110e   :  { %v4069_v22 = vmul.f32 %v4058_v21, %v4035_v17 }
0x110f   :  { %v4062_v27 = vmul.f32 0.5, %v4061_v1 }
0x1110   :  { %v4074_v25 = vmul.f32 %v4620_v19, %v4069_v22 }
0x1111   :  { %v4063_v12 = vsub.f32 1.5, %v4062_v27 }
0x1112   :  { %v4079_v34 = vadd.f32 %v4621_v9, %v4074_v25 }
0x1113   :  { %v4064_v14 = vmul.f32 %v4704_v58, %v4063_v12 }
0x1114   :  { %4584 = vmatmul.msk.f32.vlgmr.msra.gmra.mxu2 %vm103_vm1, %v4079_v34 }
0x1115   :  { %v4068_v7 = vsel %vm4067_vm13, %v4704_v58, %v4064_v14 }
0x1116   :  { %v4070_v30 = vmul.f32 %v4068_v7, %v4036_v11 }
0x1118   :  { %v4075_v31 = vmul.f32 %v4620_v19, %v4070_v30 }
0x111a   :  { %v4080_v32 = vadd.f32 %v4621_v9, %v4075_v31 }
0x111c   :  { %4585 = vmatmul.msk.f32.gmra.mxu2 %vm103_vm1, %v4080_v32 }
0x1197   :  { %v4112_v36 = vpop.f32.mrf.mxu2 }
0x1198   :  { %v4113_v16 = vadd.f32 %v4622_v33, %v4112_v36 }
0x119a   :  { %4119 = vst.msk [vmem:[%s7564_s17] sm:$0xff] %vm4118_vm14, %v4113_v16 }
0x119f   :  { %v4115_v24 = vpop.f32.mrf.mxu2 }
0x11a0   :  { %v4116_v15 = vadd.f32 %v4622_v33, %v4115_v24 }
0x11a2   :  { %4120 = vst.msk [vmem:[%s7564_s17 + $0x8] sm:$0xff] %vm4118_vm14, %v4116_v15 }

</bundles_post_ra>
